<compile_context>
chip_gen: v5e
topology: v5e:2x2
jax: 0.10.0
libtpu: 0.0.40
codegen_flags: <defaults>
</compile_context>

<pallas_src>
from functools import partial

import jax
import jax.numpy as jnp
from jax import lax
from jax.experimental import pallas as pl
from jax.experimental.pallas import tpu as pltpu

POOL_SIZES = (5, 9, 13)


def _min_value(dtype):
    """Dtype-aware 'minus infinity' for max-pool padding."""
    if jnp.issubdtype(dtype, jnp.floating):
        return jnp.asarray(-jnp.inf, dtype=dtype)
    return jnp.asarray(jnp.iinfo(dtype).min, dtype=dtype)


def _chain_windows(pool_sizes):
    """Incremental window sizes so chained same-size max pools reproduce the
    independent pools: pool_{s_i}(x) == pool_{w_i}(pool_{s_{i-1}}(...)) with
    w_i = s_i - s_{i-1} + 1 (stride 1, -inf padding)."""
    prev = 1
    wins = []
    for s in pool_sizes:
        if s % 2 != 1 or s < prev:
            raise ValueError(
                f"pool_sizes must be odd and non-decreasing, got {pool_sizes}")
        wins.append(int(s - prev + 1))
        prev = s
    return tuple(wins)


def _physical_vmem_bytes():
    try:
        return int(pltpu.get_tpu_info().vmem_capacity_bytes)
    except Exception:
        return 64 * 2**20          # conservative fallback (v7x per-core VMEM)


def _choose_strip_h(H, W, C, c_out, in_itemsize, halo, budget):
    """Largest strip height that divides H, can host the halo, and keeps the
    estimated per-step VMEM footprint under `budget`."""
    cands = sorted(s for s in range(1, H + 1)
                   if H % s == 0 and (s >= halo or s == H))

    def footprint(s):
        feat = (s + 2 * halo) * W * C * in_itemsize          # padded strip + pool temps
        acc = s * W * c_out * 4                              # f32 accumulator
        io = 2 * (3 * s * W * C + s * W * c_out) * in_itemsize  # double-buffered blocks
        return 4 * feat + 2 * acc + io

    fitting = [s for s in cands if footprint(s) <= budget]
    return max(fitting) if fitting else min(cands)


def _pool_step(feat, win, neg):
    """One chained max-pool step (stride 1).
    H axis: 'valid' max (the strip halo supplies real neighbours) -> shrinks by
            2*(win//2), every shift is a static leading-dim slice (no pad).
    W axis: 'same' max: ONE -inf pad then static sublane slices."""
    p = win // 2
    if p == 0:
        return feat
    hp, w = feat.shape[0], feat.shape[1]
    nh = hp - 2 * p
    m = feat[p:p + nh]
    for d in range(2 * p + 1):
        if d != p:
            m = jnp.maximum(m, feat[d:d + nh])
    mp = lax.pad(m, neg, [(0, 0, 0), (p, p, 0), (0, 0, 0)])
    out = m
    for d in range(2 * p + 1):
        if d != p:
            out = jnp.maximum(out, mp[:, d:d + w])
    return out


def _spp_kernel(prev_ref, cur_ref, next_ref, w_ref, scale_ref, bias_ref, o_ref,
                *, chain_windows, halo):
    # prev/cur/next_ref: (1, strip, W, C)  current strip plus its neighbours
    #                    (clamped at the image border; fixed up with -inf below)
    # w_ref:     (F, C, C_out)  folded 1x1-conv weight, one block per feature
    # scale_ref: (1, C_out)     folded BN scale
    # bias_ref:  (1, C_out)     folded BN bias
    # o_ref:     (1, strip, W, C_out)
    _, strip, W, C = cur_ref.shape
    h = pl.program_id(1)
    neg = _min_value(cur_ref.dtype)                 # dtype-aware -inf, hoisted

    # --- assemble the H-padded strip: [halo above | strip | halo below] ------
    take = min(halo, strip)
    top = prev_ref[0][strip - take:]                # last rows of previous strip
    bot = next_ref[0][:take]                        # first rows of next strip
    # Border strips: the clamped neighbour duplicates in-image rows, but the
    # rows it stands in for are entirely outside the image -> whole-region -inf
    # select with a scalar predicate (nothing rebuilt inside the chain loop).
    top = jnp.where(h == 0, neg, top)
    bot = jnp.where(h == pl.num_programs(1) - 1, neg, bot)
    feat = jnp.concatenate([top, cur_ref[0], bot], axis=0)
    if take < halo:                                 # tiny-image single-strip case
        pad = halo - take
        feat = lax.pad(feat, neg, [(pad, pad, 0), (0, 0, 0), (0, 0, 0)])
    # feat: (strip + 2*halo, W, C); row r corresponds to image row h*strip - halo + r.

    # --- SPPF chain + per-feature 1x1-conv matmuls (f32 accumulation) --------
    hw = strip * W

    def block_dot(rows, wi):
        return jnp.dot(rows.reshape(hw, C), wi,
                       preferred_element_type=jnp.float32)

    r = halo                                        # remaining halo of `feat`
    acc = block_dot(feat[r:r + strip], w_ref[0])
    for i, win in enumerate(chain_windows, start=1):
        feat = _pool_step(feat, win, neg)           # SPPF chaining
        r -= win // 2
        acc = acc + block_dot(feat[r:r + strip], w_ref[i])

    # --- folded BatchNorm + swish --------------------------------------------
    out = acc * scale_ref[...] + bias_ref[...]
    out = out * jax.nn.sigmoid(out)
    o_ref[0] = out.reshape(strip, W, -1).astype(o_ref.dtype)


def spp_forward_nhwc(x_nhwc, w, scale, bias, pool_sizes=POOL_SIZES,
                     strip_h=None):
    """x_nhwc: (N, H, W, C).  w: (C*(1+len(pool_sizes)), C_out) folded 1x1-conv
    weight (rows ordered [x, pool_0, pool_1, ...]).  scale/bias: (1, C_out)."""
    N, H, W, C = x_nhwc.shape
    c_tot, c_out = w.shape
    n_feats = 1 + len(pool_sizes)
    if c_tot != n_feats * C:
        raise ValueError(f"weight rows {c_tot} != {n_feats} * C ({C})")
    wins = _chain_windows(pool_sizes)
    halo = sum(win // 2 for win in wins)            # == max(pool_sizes) // 2
    w_blocks = w.reshape(n_feats, C, c_out)

    in_itemsize = jnp.dtype(x_nhwc.dtype).itemsize
    phys = _physical_vmem_bytes()
    if strip_h is None:
        strip_h = _choose_strip_h(H, W, C, c_out, in_itemsize, halo,
                                  budget=min(20 * 2**20, phys // 3))
    if H % strip_h != 0:
        raise ValueError(f"strip_h={strip_h} must divide H={H}")
    n_strips = H // strip_h
    if n_strips > 1 and strip_h < halo:
        raise ValueError(f"strip_h={strip_h} must be >= halo={halo} "
                         f"when H is split into strips")

    # VMEM: double-buffered pipeline blocks + in-kernel temporaries, clamped to
    # the chip's physical VMEM (v7x: 64 MiB) -- never below the 32 MiB default.
    blk_in = strip_h * W * C * in_itemsize
    blk_out = strip_h * W * c_out * in_itemsize
    feat_bytes = (strip_h + 2 * halo) * W * C * in_itemsize
    acc_bytes = strip_h * W * c_out * 4
    const_bytes = int(w_blocks.size * w_blocks.dtype.itemsize
                      + (scale.size + bias.size) * 4)
    est = (2 * (3 * blk_in + blk_out) + 2 * const_bytes
           + 4 * feat_bytes + 2 * acc_bytes + (2 << 20))
    vmem_limit = int(min(int(0.9 * phys), max(32 * 2**20, est)))

    # Advisory cost so XLA schedules surrounding ops (e.g. layout transposes).
    cost = pl.CostEstimate(
        flops=int(2 * n_feats * N * H * W * C * c_out),
        transcendentals=int(N * H * W * c_out),
        bytes_accessed=int(3 * N * H * W * C * in_itemsize
                           + N * H * W * c_out * in_itemsize
                           + const_bytes))

    kernel = partial(_spp_kernel, chain_windows=wins, halo=halo)
    strip_block = (1, strip_h, W, C)

    return pl.pallas_call(
        kernel,
        out_shape=jax.ShapeDtypeStruct((N, H, W, c_out), x_nhwc.dtype),
        grid=(N, n_strips),
        in_specs=[
            # previous / current / next strip of the same input (halo source).
            pl.BlockSpec(strip_block,
                         lambda n, s: (n, jnp.maximum(s - 1, 0), 0, 0)),
            pl.BlockSpec(strip_block, lambda n, s: (n, s, 0, 0)),
            pl.BlockSpec(strip_block,
                         lambda n, s: (n, jnp.minimum(s + 1, n_strips - 1), 0, 0)),
            # Constant operands (constant block index -> no re-copy per step).
            pl.BlockSpec((n_feats, C, c_out), lambda n, s: (0, 0, 0)),
            pl.BlockSpec((1, c_out), lambda n, s: (0, 0)),
            pl.BlockSpec((1, c_out), lambda n, s: (0, 0)),
        ],
        out_specs=pl.BlockSpec((1, strip_h, W, c_out),
                               lambda n, s: (n, s, 0, 0)),
        compiler_params=pltpu.CompilerParams(
            dimension_semantics=("parallel", "parallel"),
            vmem_limit_bytes=vmem_limit),
        cost_estimate=cost,
    )(x_nhwc, x_nhwc, x_nhwc, w_blocks, scale, bias)


def spp_forward_nchw(x_nchw, w, scale, bias, pool_sizes=POOL_SIZES,
                     strip_h=None):
    """PyTorch-layout (NCHW) compatibility wrapper.  Production code should keep
    activations NHWC end-to-end instead of paying these two HBM transposes."""
    x_nhwc = jnp.transpose(x_nchw, (0, 2, 3, 1))
    out_nhwc = spp_forward_nhwc(x_nhwc, w, scale, bias, pool_sizes, strip_h)
    return jnp.transpose(out_nhwc, (0, 3, 1, 2))


def _reference_spp_nhwc(x, w_oihw, gamma, beta, mean, var, eps, pool_sizes):
    """Pure-JAX NHWC reference matching the PyTorch forward (inference BN)."""
    outs = [x]
    for size in pool_sizes:
        pad = size // 2
        pooled = lax.reduce_window(
            x, -jnp.inf, lax.max,
            window_dimensions=(1, size, size, 1),
            window_strides=(1, 1, 1, 1),
            padding=[(0, 0), (pad, pad), (pad, pad), (0, 0)],
        )
        outs.append(pooled)
    y = jnp.concatenate(outs, axis=-1)                      # (N, H, W, C_tot)
    wm = w_oihw.reshape(w_oihw.shape[0], w_oihw.shape[1])   # (C_out, C_tot), k=1
    out = jnp.einsum('nhwc,oc->nhwo', y, wm)
    s = gamma / jnp.sqrt(var + eps)
    b = beta - mean * s
    out = out * s + b
    return out * jax.nn.sigmoid(out)


if __name__ == "__main__":
    # Small deterministic config: SPP(in_channels=4, out_channels=8, k=1,
    # pool_size=(5, 9, 13)), batch 2, 16x16 spatial.
    N, C_in, H, W = 2, 4, 16, 16
    C_out, k = 8, 1
    c_tot = C_in * (1 + len(POOL_SIZES))
    eps = 1e-5

    key = jax.random.PRNGKey(0)
    kx, kw, kg, kb, km, kv = jax.random.split(key, 6)

    x_nhwc = jax.random.normal(kx, (N, H, W, C_in), dtype=jnp.float32)

    # Conv weight (OIHW, k=1, no bias) and BN params.
    w_oihw = 0.1 * jax.random.normal(kw, (C_out, c_tot, k, k), dtype=jnp.float32)
    gamma = 0.5 + jax.random.uniform(kg, (C_out,), dtype=jnp.float32)
    beta = 0.1 * jax.random.normal(kb, (C_out,), dtype=jnp.float32)
    running_mean = 0.1 * jax.random.normal(km, (C_out,), dtype=jnp.float32)
    running_var = 0.5 + jax.random.uniform(kv, (C_out,), dtype=jnp.float32)

    # Fold BN into per-output-channel scale/bias applied after the conv matmul.
    scale_vec = gamma / jnp.sqrt(running_var + eps)
    bias_vec = beta - running_mean * scale_vec
    w_mat = w_oihw.reshape(C_out, c_tot).T          # (C_tot, C_out)
    scale = scale_vec.reshape(1, C_out)
    bias = bias_vec.reshape(1, C_out)

    ref_nhwc = jax.block_until_ready(_reference_spp_nhwc(
        x_nhwc, w_oihw, gamma, beta, running_mean, running_var, eps, POOL_SIZES))

    # Auto strip selection (small image -> one strip per batch element).
    out_auto = jax.block_until_ready(spp_forward_nhwc(x_nhwc, w_mat, scale, bias))
    assert out_auto.shape == (N, H, W, C_out), out_auto.shape
    assert jnp.allclose(out_auto, ref_nhwc, rtol=1e-3, atol=1e-3), float(
        jnp.max(jnp.abs(out_auto - ref_nhwc)))

    # Forced multi-strip path (two 8-row strips, 6-row halo): exercises the
    # halo assembly, border -inf masking and the strip-tiled output.
    out_strips = jax.block_until_ready(
        spp_forward_nhwc(x_nhwc, w_mat, scale, bias, strip_h=8))
    assert jnp.allclose(out_strips, ref_nhwc, rtol=1e-3, atol=1e-3), float(
        jnp.max(jnp.abs(out_strips - ref_nhwc)))

    # PyTorch-layout (NCHW) wrapper parity check.
    x_nchw = jnp.transpose(x_nhwc, (0, 3, 1, 2))
    out_nchw = jax.block_until_ready(
        spp_forward_nchw(x_nchw, w_mat, scale, bias, strip_h=8))
    ref_nchw = jnp.transpose(ref_nhwc, (0, 3, 1, 2))
    assert out_nchw.shape == (N, C_out, H, W), out_nchw.shape
    assert jnp.allclose(out_nchw, ref_nchw, rtol=1e-3, atol=1e-3), float(
        jnp.max(jnp.abs(out_nchw - ref_nchw)))

    print("KERNEL_OK")
</pallas_src>

<mosaic_0001>
module attributes {stable_mosaic.version = 11 : i64} {
  func.func @_spp_kernel(%arg0: i32, %arg1: i32, %arg2: memref<1x16x16x4xf32, #tpu.memory_space<vmem>>, %arg3: memref<1x16x16x4xf32, #tpu.memory_space<vmem>>, %arg4: memref<1x16x16x4xf32, #tpu.memory_space<vmem>>, %arg5: memref<4x4x8xf32, #tpu.memory_space<vmem>>, %arg6: memref<1x8xf32, #tpu.memory_space<vmem>>, %arg7: memref<1x8xf32, #tpu.memory_space<vmem>>, %arg8: memref<1x16x16x8xf32, #tpu.memory_space<vmem>>) attributes {dimension_semantics = [#tpu.dimension_semantics<parallel>, #tpu.dimension_semantics<parallel>], iteration_bounds = array<i64: 2, 1>, scalar_prefetch = 0 : i64, scratch_operands = 0 : i64, tpu.core_type = #tpu.core_type<tc>, window_params = [{transform_indices = @transform_0, window_bounds = array<i64: 1, 16, 16, 4>}, {transform_indices = @transform_1, window_bounds = array<i64: 1, 16, 16, 4>}, {transform_indices = @transform_2, window_bounds = array<i64: 1, 16, 16, 4>}, {pipeline_mode = #tpu.pipeline_mode<synchronous>, transform_indices = @transform_3, window_bounds = array<i64: 4, 4, 8>}, {pipeline_mode = #tpu.pipeline_mode<synchronous>, transform_indices = @transform_4, window_bounds = array<i64: 1, 8>}, {pipeline_mode = #tpu.pipeline_mode<synchronous>, transform_indices = @transform_5, window_bounds = array<i64: 1, 8>}, {transform_indices = @transform_6, window_bounds = array<i64: 1, 16, 16, 8>}]} {
    %c0 = arith.constant 0 : index
    %c0_0 = arith.constant 0 : index
    %c0_1 = arith.constant 0 : index
    %c0_2 = arith.constant 0 : index
    %0 = vector.load %arg2[%c0, %c0_0, %c0_1, %c0_2] : memref<1x16x16x4xf32, #tpu.memory_space<vmem>>, vector<1x16x16x4xf32>
    %1 = vector.shape_cast %0 : vector<1x16x16x4xf32> to vector<16x16x4xf32>
    %2 = vector.extract_strided_slice %1 {offsets = [10, 0, 0], sizes = [6, 16, 4], strides = [1, 1, 1]} : vector<16x16x4xf32> to vector<6x16x4xf32>
    %c0_3 = arith.constant 0 : index
    %c0_4 = arith.constant 0 : index
    %c0_5 = arith.constant 0 : index
    %c0_6 = arith.constant 0 : index
    %3 = vector.load %arg4[%c0_3, %c0_4, %c0_5, %c0_6] : memref<1x16x16x4xf32, #tpu.memory_space<vmem>>, vector<1x16x16x4xf32>
    %4 = vector.shape_cast %3 : vector<1x16x16x4xf32> to vector<16x16x4xf32>
    %5 = vector.extract_strided_slice %4 {offsets = [0, 0, 0], sizes = [6, 16, 4], strides = [1, 1, 1]} : vector<16x16x4xf32> to vector<6x16x4xf32>
    %c0_i32 = arith.constant 0 : i32
    %6 = arith.cmpi eq, %arg1, %c0_i32 : i32
    %cst = arith.constant 0xFF800000 : f32
    %7 = vector.broadcast %cst : f32 to vector<6x16x4xf32>
    %8 = arith.select %6, %7, %2 : vector<6x16x4xf32>
    %c0_i32_7 = arith.constant 0 : i32
    %9 = arith.cmpi eq, %arg1, %c0_i32_7 : i32
    %cst_8 = arith.constant 0xFF800000 : f32
    %10 = vector.broadcast %cst_8 : f32 to vector<6x16x4xf32>
    %11 = arith.select %9, %10, %5 : vector<6x16x4xf32>
    %c0_9 = arith.constant 0 : index
    %c0_10 = arith.constant 0 : index
    %c0_11 = arith.constant 0 : index
    %c0_12 = arith.constant 0 : index
    %12 = vector.load %arg3[%c0_9, %c0_10, %c0_11, %c0_12] : memref<1x16x16x4xf32, #tpu.memory_space<vmem>>, vector<1x16x16x4xf32>
    %13 = vector.shape_cast %12 : vector<1x16x16x4xf32> to vector<16x16x4xf32>
    %14 = tpu.concatenate %8, %13, %11 in 0 : vector<6x16x4xf32>, vector<16x16x4xf32>, vector<6x16x4xf32> -> vector<28x16x4xf32>
    %15 = vector.extract_strided_slice %14 {offsets = [6, 0, 0], sizes = [16, 16, 4], strides = [1, 1, 1]} : vector<28x16x4xf32> to vector<16x16x4xf32>
    %c0_13 = arith.constant 0 : index
    %c0_14 = arith.constant 0 : index
    %c0_15 = arith.constant 0 : index
    %16 = vector.load %arg5[%c0_13, %c0_14, %c0_15] : memref<4x4x8xf32, #tpu.memory_space<vmem>>, vector<1x4x8xf32>
    %17 = vector.shape_cast %16 : vector<1x4x8xf32> to vector<4x8xf32>
    %18 = vector.shape_cast %15 : vector<16x16x4xf32> to vector<256x4xf32>
    %cst_16 = arith.constant dense<0.000000e+00> : vector<256x8xf32>
    %19 = tpu.matmul %18, %17, %cst_16 {dimension_numbers = #tpu.dot_dimension_numbers<[1], [0], [0], [1], [0, 0, 1, 1], [], []>} : vector<256x4xf32>, vector<4x8xf32>, vector<256x8xf32> -> vector<256x8xf32>
    %20 = vector.extract_strided_slice %14 {offsets = [2, 0, 0], sizes = [24, 16, 4], strides = [1, 1, 1]} : vector<28x16x4xf32> to vector<24x16x4xf32>
    %21 = vector.extract_strided_slice %14 {offsets = [0, 0, 0], sizes = [24, 16, 4], strides = [1, 1, 1]} : vector<28x16x4xf32> to vector<24x16x4xf32>
    %22 = arith.maximumf %20, %21 : vector<24x16x4xf32>
    %23 = vector.extract_strided_slice %14 {offsets = [1, 0, 0], sizes = [24, 16, 4], strides = [1, 1, 1]} : vector<28x16x4xf32> to vector<24x16x4xf32>
    %24 = arith.maximumf %22, %23 : vector<24x16x4xf32>
    %25 = vector.extract_strided_slice %14 {offsets = [3, 0, 0], sizes = [24, 16, 4], strides = [1, 1, 1]} : vector<28x16x4xf32> to vector<24x16x4xf32>
    %26 = arith.maximumf %24, %25 : vector<24x16x4xf32>
    %27 = vector.extract_strided_slice %14 {offsets = [4, 0, 0], sizes = [24, 16, 4], strides = [1, 1, 1]} : vector<28x16x4xf32> to vector<24x16x4xf32>
    %28 = arith.maximumf %26, %27 : vector<24x16x4xf32>
    %cst_17 = arith.constant 0xFF800000 : f32
    %29 = vector.broadcast %cst_17 : f32 to vector<24x2x4xf32>
    %30 = tpu.concatenate %29, %28 in 1 : vector<24x2x4xf32>, vector<24x16x4xf32> -> vector<24x18x4xf32>
    %31 = vector.broadcast %cst_17 : f32 to vector<24x2x4xf32>
    %32 = tpu.concatenate %30, %31 in 1 : vector<24x18x4xf32>, vector<24x2x4xf32> -> vector<24x20x4xf32>
    %33 = vector.extract_strided_slice %32 {offsets = [0, 0, 0], sizes = [24, 16, 4], strides = [1, 1, 1]} : vector<24x20x4xf32> to vector<24x16x4xf32>
    %34 = arith.maximumf %28, %33 : vector<24x16x4xf32>
    %35 = vector.extract_strided_slice %32 {offsets = [0, 1, 0], sizes = [24, 16, 4], strides = [1, 1, 1]} : vector<24x20x4xf32> to vector<24x16x4xf32>
    %36 = arith.maximumf %34, %35 : vector<24x16x4xf32>
    %37 = vector.extract_strided_slice %32 {offsets = [0, 3, 0], sizes = [24, 16, 4], strides = [1, 1, 1]} : vector<24x20x4xf32> to vector<24x16x4xf32>
    %38 = arith.maximumf %36, %37 : vector<24x16x4xf32>
    %39 = vector.extract_strided_slice %32 {offsets = [0, 4, 0], sizes = [24, 16, 4], strides = [1, 1, 1]} : vector<24x20x4xf32> to vector<24x16x4xf32>
    %40 = arith.maximumf %38, %39 : vector<24x16x4xf32>
    %41 = vector.extract_strided_slice %40 {offsets = [4, 0, 0], sizes = [16, 16, 4], strides = [1, 1, 1]} : vector<24x16x4xf32> to vector<16x16x4xf32>
    %c1 = arith.constant 1 : index
    %c0_18 = arith.constant 0 : index
    %c0_19 = arith.constant 0 : index
    %42 = vector.load %arg5[%c1, %c0_18, %c0_19] : memref<4x4x8xf32, #tpu.memory_space<vmem>>, vector<1x4x8xf32>
    %43 = vector.shape_cast %42 : vector<1x4x8xf32> to vector<4x8xf32>
    %44 = vector.shape_cast %41 : vector<16x16x4xf32> to vector<256x4xf32>
    %cst_20 = arith.constant dense<0.000000e+00> : vector<256x8xf32>
    %45 = tpu.matmul %44, %43, %cst_20 {dimension_numbers = #tpu.dot_dimension_numbers<[1], [0], [0], [1], [0, 0, 1, 1], [], []>} : vector<256x4xf32>, vector<4x8xf32>, vector<256x8xf32> -> vector<256x8xf32>
    %46 = arith.addf %19, %45 : vector<256x8xf32>
    %47 = vector.extract_strided_slice %40 {offsets = [2, 0, 0], sizes = [20, 16, 4], strides = [1, 1, 1]} : vector<24x16x4xf32> to vector<20x16x4xf32>
    %48 = vector.extract_strided_slice %40 {offsets = [0, 0, 0], sizes = [20, 16, 4], strides = [1, 1, 1]} : vector<24x16x4xf32> to vector<20x16x4xf32>
    %49 = arith.maximumf %47, %48 : vector<20x16x4xf32>
    %50 = vector.extract_strided_slice %40 {offsets = [1, 0, 0], sizes = [20, 16, 4], strides = [1, 1, 1]} : vector<24x16x4xf32> to vector<20x16x4xf32>
    %51 = arith.maximumf %49, %50 : vector<20x16x4xf32>
    %52 = vector.extract_strided_slice %40 {offsets = [3, 0, 0], sizes = [20, 16, 4], strides = [1, 1, 1]} : vector<24x16x4xf32> to vector<20x16x4xf32>
    %53 = arith.maximumf %51, %52 : vector<20x16x4xf32>
    %54 = vector.extract_strided_slice %40 {offsets = [4, 0, 0], sizes = [20, 16, 4], strides = [1, 1, 1]} : vector<24x16x4xf32> to vector<20x16x4xf32>
    %55 = arith.maximumf %53, %54 : vector<20x16x4xf32>
    %cst_21 = arith.constant 0xFF800000 : f32
    %56 = vector.broadcast %cst_21 : f32 to vector<20x2x4xf32>
    %57 = tpu.concatenate %56, %55 in 1 : vector<20x2x4xf32>, vector<20x16x4xf32> -> vector<20x18x4xf32>
    %58 = vector.broadcast %cst_21 : f32 to vector<20x2x4xf32>
    %59 = tpu.concatenate %57, %58 in 1 : vector<20x18x4xf32>, vector<20x2x4xf32> -> vector<20x20x4xf32>
    %60 = vector.extract_strided_slice %59 {offsets = [0, 0, 0], sizes = [20, 16, 4], strides = [1, 1, 1]} : vector<20x20x4xf32> to vector<20x16x4xf32>
    %61 = arith.maximumf %55, %60 : vector<20x16x4xf32>
    %62 = vector.extract_strided_slice %59 {offsets = [0, 1, 0], sizes = [20, 16, 4], strides = [1, 1, 1]} : vector<20x20x4xf32> to vector<20x16x4xf32>
    %63 = arith.maximumf %61, %62 : vector<20x16x4xf32>
    %64 = vector.extract_strided_slice %59 {offsets = [0, 3, 0], sizes = [20, 16, 4], strides = [1, 1, 1]} : vector<20x20x4xf32> to vector<20x16x4xf32>
    %65 = arith.maximumf %63, %64 : vector<20x16x4xf32>
    %66 = vector.extract_strided_slice %59 {offsets = [0, 4, 0], sizes = [20, 16, 4], strides = [1, 1, 1]} : vector<20x20x4xf32> to vector<20x16x4xf32>
    %67 = arith.maximumf %65, %66 : vector<20x16x4xf32>
    %68 = vector.extract_strided_slice %67 {offsets = [2, 0, 0], sizes = [16, 16, 4], strides = [1, 1, 1]} : vector<20x16x4xf32> to vector<16x16x4xf32>
    %c2 = arith.constant 2 : index
    %c0_22 = arith.constant 0 : index
    %c0_23 = arith.constant 0 : index
    %69 = vector.load %arg5[%c2, %c0_22, %c0_23] : memref<4x4x8xf32, #tpu.memory_space<vmem>>, vector<1x4x8xf32>
    %70 = vector.shape_cast %69 : vector<1x4x8xf32> to vector<4x8xf32>
    %71 = vector.shape_cast %68 : vector<16x16x4xf32> to vector<256x4xf32>
    %cst_24 = arith.constant dense<0.000000e+00> : vector<256x8xf32>
    %72 = tpu.matmul %71, %70, %cst_24 {dimension_numbers = #tpu.dot_dimension_numbers<[1], [0], [0], [1], [0, 0, 1, 1], [], []>} : vector<256x4xf32>, vector<4x8xf32>, vector<256x8xf32> -> vector<256x8xf32>
    %73 = arith.addf %46, %72 : vector<256x8xf32>
    %74 = vector.extract_strided_slice %67 {offsets = [2, 0, 0], sizes = [16, 16, 4], strides = [1, 1, 1]} : vector<20x16x4xf32> to vector<16x16x4xf32>
    %75 = vector.extract_strided_slice %67 {offsets = [0, 0, 0], sizes = [16, 16, 4], strides = [1, 1, 1]} : vector<20x16x4xf32> to vector<16x16x4xf32>
    %76 = arith.maximumf %74, %75 : vector<16x16x4xf32>
    %77 = vector.extract_strided_slice %67 {offsets = [1, 0, 0], sizes = [16, 16, 4], strides = [1, 1, 1]} : vector<20x16x4xf32> to vector<16x16x4xf32>
    %78 = arith.maximumf %76, %77 : vector<16x16x4xf32>
    %79 = vector.extract_strided_slice %67 {offsets = [3, 0, 0], sizes = [16, 16, 4], strides = [1, 1, 1]} : vector<20x16x4xf32> to vector<16x16x4xf32>
    %80 = arith.maximumf %78, %79 : vector<16x16x4xf32>
    %81 = vector.extract_strided_slice %67 {offsets = [4, 0, 0], sizes = [16, 16, 4], strides = [1, 1, 1]} : vector<20x16x4xf32> to vector<16x16x4xf32>
    %82 = arith.maximumf %80, %81 : vector<16x16x4xf32>
    %cst_25 = arith.constant 0xFF800000 : f32
    %83 = vector.broadcast %cst_25 : f32 to vector<16x2x4xf32>
    %84 = tpu.concatenate %83, %82 in 1 : vector<16x2x4xf32>, vector<16x16x4xf32> -> vector<16x18x4xf32>
    %85 = vector.broadcast %cst_25 : f32 to vector<16x2x4xf32>
    %86 = tpu.concatenate %84, %85 in 1 : vector<16x18x4xf32>, vector<16x2x4xf32> -> vector<16x20x4xf32>
    %87 = vector.extract_strided_slice %86 {offsets = [0, 0, 0], sizes = [16, 16, 4], strides = [1, 1, 1]} : vector<16x20x4xf32> to vector<16x16x4xf32>
    %88 = arith.maximumf %82, %87 : vector<16x16x4xf32>
    %89 = vector.extract_strided_slice %86 {offsets = [0, 1, 0], sizes = [16, 16, 4], strides = [1, 1, 1]} : vector<16x20x4xf32> to vector<16x16x4xf32>
    %90 = arith.maximumf %88, %89 : vector<16x16x4xf32>
    %91 = vector.extract_strided_slice %86 {offsets = [0, 3, 0], sizes = [16, 16, 4], strides = [1, 1, 1]} : vector<16x20x4xf32> to vector<16x16x4xf32>
    %92 = arith.maximumf %90, %91 : vector<16x16x4xf32>
    %93 = vector.extract_strided_slice %86 {offsets = [0, 4, 0], sizes = [16, 16, 4], strides = [1, 1, 1]} : vector<16x20x4xf32> to vector<16x16x4xf32>
    %94 = arith.maximumf %92, %93 : vector<16x16x4xf32>
    %c3 = arith.constant 3 : index
    %c0_26 = arith.constant 0 : index
    %c0_27 = arith.constant 0 : index
    %95 = vector.load %arg5[%c3, %c0_26, %c0_27] : memref<4x4x8xf32, #tpu.memory_space<vmem>>, vector<1x4x8xf32>
    %96 = vector.shape_cast %95 : vector<1x4x8xf32> to vector<4x8xf32>
    %97 = vector.shape_cast %94 : vector<16x16x4xf32> to vector<256x4xf32>
    %cst_28 = arith.constant dense<0.000000e+00> : vector<256x8xf32>
    %98 = tpu.matmul %97, %96, %cst_28 {dimension_numbers = #tpu.dot_dimension_numbers<[1], [0], [0], [1], [0, 0, 1, 1], [], []>} : vector<256x4xf32>, vector<4x8xf32>, vector<256x8xf32> -> vector<256x8xf32>
    %99 = arith.addf %73, %98 : vector<256x8xf32>
    %c0_29 = arith.constant 0 : index
    %c0_30 = arith.constant 0 : index
    %100 = vector.load %arg6[%c0_29, %c0_30] : memref<1x8xf32, #tpu.memory_space<vmem>>, vector<1x8xf32>
    %101 = vector.broadcast %100 : vector<1x8xf32> to vector<256x8xf32>
    %102 = arith.mulf %99, %101 : vector<256x8xf32>
    %c0_31 = arith.constant 0 : index
    %c0_32 = arith.constant 0 : index
    %103 = vector.load %arg7[%c0_31, %c0_32] : memref<1x8xf32, #tpu.memory_space<vmem>>, vector<1x8xf32>
    %104 = vector.broadcast %103 : vector<1x8xf32> to vector<256x8xf32>
    %105 = arith.addf %102, %104 : vector<256x8xf32>
    %106 = arith.negf %105 : vector<256x8xf32>
    %107 = math.exp %106 : vector<256x8xf32>
    %cst_33 = arith.constant 1.000000e+00 : f32
    %108 = vector.broadcast %cst_33 : f32 to vector<256x8xf32>
    %109 = arith.addf %108, %107 : vector<256x8xf32>
    %110 = arith.divf %108, %109 : vector<256x8xf32>
    %111 = arith.mulf %105, %110 : vector<256x8xf32>
    %112 = vector.shape_cast %111 : vector<256x8xf32> to vector<16x16x8xf32>
    %c0_34 = arith.constant 0 : index
    %c0_35 = arith.constant 0 : index
    %c0_36 = arith.constant 0 : index
    %c0_37 = arith.constant 0 : index
    %113 = vector.load %arg8[%c0_34, %c0_35, %c0_36, %c0_37] : memref<1x16x16x8xf32, #tpu.memory_space<vmem>>, vector<1x16x16x8xf32>
    %114 = vector.shape_cast %113 : vector<1x16x16x8xf32> to vector<16x16x8xf32>
    %115 = vector.shape_cast %112 : vector<16x16x8xf32> to vector<1x16x16x8xf32>
    tpu.vector_store %arg8[%c0_34, %c0_35, %c0_36, %c0_37], %115 {strides = array<i32>} : memref<1x16x16x8xf32, #tpu.memory_space<vmem>>, vector<1x16x16x8xf32>,
    return
  }
  func.func @transform_0(%arg0: i32, %arg1: i32) -> (i32, i32, i32, i32) {
    %c1_i32 = arith.constant 1 : i32
    %0 = arith.subi %arg1, %c1_i32 : i32
    %c0_i32 = arith.constant 0 : i32
    %1 = arith.maxsi %0, %c0_i32 : i32
    %c0_i32_0 = arith.constant 0 : i32
    %c0_i32_1 = arith.constant 0 : i32
    %c0_i32_2 = arith.constant 0 : i32
    return %arg0, %1, %c0_i32_0, %c0_i32_1 : i32, i32, i32, i32
  }
  func.func @transform_1(%arg0: i32, %arg1: i32) -> (i32, i32, i32, i32) {
    %c0_i32 = arith.constant 0 : i32
    %c0_i32_0 = arith.constant 0 : i32
    %c0_i32_1 = arith.constant 0 : i32
    return %arg0, %arg1, %c0_i32, %c0_i32_0 : i32, i32, i32, i32
  }
  func.func @transform_2(%arg0: i32, %arg1: i32) -> (i32, i32, i32, i32) {
    %c1_i32 = arith.constant 1 : i32
    %0 = arith.addi %arg1, %c1_i32 : i32
    %c0_i32 = arith.constant 0 : i32
    %1 = arith.minsi %0, %c0_i32 : i32
    %c0_i32_0 = arith.constant 0 : i32
    %c0_i32_1 = arith.constant 0 : i32
    %c0_i32_2 = arith.constant 0 : i32
    return %arg0, %1, %c0_i32_0, %c0_i32_1 : i32, i32, i32, i32
  }
  func.func @transform_3(%arg0: i32, %arg1: i32) -> (i32, i32, i32) {
    %c0_i32 = arith.constant 0 : i32
    %c0_i32_0 = arith.constant 0 : i32
    %c0_i32_1 = arith.constant 0 : i32
    %c0_i32_2 = arith.constant 0 : i32
    return %c0_i32, %c0_i32_0, %c0_i32_1 : i32, i32, i32
  }
  func.func @transform_4(%arg0: i32, %arg1: i32) -> (i32, i32) {
    %c0_i32 = arith.constant 0 : i32
    %c0_i32_0 = arith.constant 0 : i32
    %c0_i32_1 = arith.constant 0 : i32
    return %c0_i32, %c0_i32_0 : i32, i32
  }
  func.func @transform_5(%arg0: i32, %arg1: i32) -> (i32, i32) {
    %c0_i32 = arith.constant 0 : i32
    %c0_i32_0 = arith.constant 0 : i32
    %c0_i32_1 = arith.constant 0 : i32
    return %c0_i32, %c0_i32_0 : i32, i32
  }
  func.func @transform_6(%arg0: i32, %arg1: i32) -> (i32, i32, i32, i32) {
    %c0_i32 = arith.constant 0 : i32
    %c0_i32_0 = arith.constant 0 : i32
    %c0_i32_1 = arith.constant 0 : i32
    return %arg0, %arg1, %c0_i32, %c0_i32_0 : i32, i32, i32, i32
  }
}

</mosaic_0001>

<bundles_post_ra>
// kernel: tpu_custom_call.1
= control target key start
LH: loop header
LB: loop body
LE: loop exit
PB: predicated region body
PF: predicated region fallthrough
CT: control target
= control target key end

     0   :  { %s5676_s21 = smov 0   ;;  %s5678_s0 = smov 0   ;;  %s8536_s0 = inlined_call_operand.vmem [shape: f32[2,16,16,4], index: 0, kind: input, shape index: {}]   ;;  %s8537_s1 = inlined_call_operand.vmem [shape: f32[2,16,16,4], index: 1, kind: input, shape index: {}]   ;;  %s8538_s2 = inlined_call_operand.vmem [shape: f32[2,16,16,4], index: 2, kind: input, shape index: {}]   ;;  %s8539_s3 = inlined_call_operand.vmem [shape: f32[4,4,8], index: 3, kind: input, shape index: {}]   ;;  %s8540_s4 = inlined_call_operand.vmem [shape: f32[1,8], index: 4, kind: input, shape index: {}]   ;;  %s8541_s5 = inlined_call_operand.vmem [shape: f32[1,8], index: 5, kind: input, shape index: {}]   ;;  %s8542_s6 = inlined_call_operand.vmem [shape: f32[2,16,16,8], index: 6, kind: output, shape index: {}]  }
   0x1   :  { %s5680_s22 = smov 0  }
   0x2 LB: > { %s28_s2 = sadd.s32 1, %s5634_s0  ;;  %p5251_p0 = scmp.ge.s32.totalorder %s5638_s22, 1  ;;  %s5638_s22 = sphi %s5680_s22, %s16_s22   ;;  %s5634_s0 = sphi %s5678_s0, %s8603_s0   ;;  %s5630_s21 = sphi %s5676_s21, %s8602_s21  }
   0x3   : > { %p30_p1 = scmp.ge.s32.totalorder %s28_s2, 2  ;;  %p294_p2 = scmp.lt.s32.totalorder %s5638_s22, 3 }
   0x5   : > { %s8605_s2 = smov (%p30_p1, %s28_s2), 0  ;;  %p295_p3 = pnand %p5251_p0, %p294_p2 }
   0x7   : > { %298 = sbr.rel (%p295_p3) target bundleno = 778 (0x30a), region = 44 }
   0xc   : > { %vm1464_vm0 = vcmask 1043456   ;;  %v5327_v0 = vld [vmem:[%s8539_s3 + $0x8] sm:$0xf]  ;;  %p378_p4 = scmp.lt.s32.totalorder %s5630_s21, 1  ;;  %vm741_vm1 = vcmask 1041408   ;;  %v5640_v1 = vmov -inf  }
   0xd   : > { %5328 = vmatpush.msk.msra.mxu2 %vm1464_vm0, %v5327_v0  ;;  %v5698_v2 = vrot.slane %v5640_v1, 6  ;;  %vm1030_vm2 = vcmask 1046528   ;;  %vm1247_vm3 = vcmask 1044480   ;;  %vm1683_vm4 = vcmask 31744  }
   0xe   : > { %s8607_s21 = smov (!%p378_p4, %s5630_s21), 1  ;;  %vm5076_vm5 = vcmask 64512  }
   0xf   : > { %v5704_v3 = vsel %vm741_vm1, -inf, %v5698_v2  ;;  %v5708_v4 = vsel %vm741_vm1, %v5698_v2, -inf  ;;  %v1032_v5 = vrot.slane %v5698_v2, 1  ;;  %s5430_s25 = sshll.u32 %s8607_s21, 8 }
  0x10   : > { %v1031_v6 = vrot.slane %v5704_v3, 1  ;;  %v1034_v7 = vrot.slane %v5708_v4, 1  ;;  %s5719_s28 = scalar_lea.vmem %s8537_s1, %s5430_s25  ;;  %s7460_s17 = scalar_lea.vmem %s8542_s6, %s5430_s25 }
  0x11   : > { %v5722_v8 = vld [vmem:[%s5719_s28] sm:$0xff]  ;;  %v5725_v9 = vld [vmem:[%s5719_s28 + $0x8] sm:$0xff]  ;;  %v5728_v10 = vld [vmem:[%s5719_s28 + $0x10] sm:$0xff] }
  0x12   : > { %8557 = vst [vmem:[#allocation2_spill] sm:$0xff] %v5722_v8  ;;  %v5731_v11 = vsel %vm1030_vm2, %v1031_v6, %v1032_v5  ;;  %v471_v12 = vld [vmem:[%s5719_s28 + $0x18] sm:$0xff]  ;;  %v472_v13 = vld [vmem:[%s5719_s28 + $0x20] sm:$0xff]  ;;  %v473_v14 = vld [vmem:[%s5719_s28 + $0x28] sm:$0xff]  ;;  %v559_v15 = vmax.f32 %v5728_v10, %v5722_v8  ;;  %v5740_v16 = vmax.f32 %v5722_v8, %v5728_v10  ;;  %v748_v17 = vrot.slane %v5722_v8, 6 }
  0x13   : > { %8558 = vst [vmem:[#allocation3_spill] sm:$0xff] %v5725_v9  ;;  %v5744_v18 = vsel %vm1030_vm2, %v1032_v5, %v1034_v7  ;;  %v474_v19 = vld [vmem:[%s5719_s28 + $0x30] sm:$0xff]  ;;  %v475_v20 = vld [vmem:[%s5719_s28 + $0x38] sm:$0xff]  ;;  %v476_v21 = vld [vmem:[%s5719_s28 + $0x40] sm:$0xff]  ;;  %v513_v22 = vmax.f32 %v472_v13, %v5722_v8  ;;  %v514_v23 = vmax.f32 %v473_v14, %v5725_v9  ;;  %v560_v24 = vmax.f32 %v471_v12, %v5725_v9 }
  0x14   : > { %8559 = vst [vmem:[#allocation4_spill] sm:$0xff] %v5728_v10  ;;  %v5753_v25 = vmax.f32 %v5725_v9, %v471_v12  ;;  %v477_v26 = vld [vmem:[%s5719_s28 + $0x48] sm:$0xff]  ;;  %v478_v27 = vld [vmem:[%s5719_s28 + $0x50] sm:$0xff]  ;;  %v479_v28 = vld [vmem:[%s5719_s28 + $0x58] sm:$0xff]  ;;  %v515_v29 = vmax.f32 %v474_v19, %v5728_v10  ;;  %v516_v30 = vmax.f32 %v475_v20, %v471_v12  ;;  %v517_v31 = vmax.f32 %v476_v21, %v472_v13 }
  0x15   : > { %v607_v32 = vmax.f32 %v559_v15, %v472_v13  ;;  %v480_v33 = vld [vmem:[%s5719_s28 + $0x60] sm:$0xff]  ;;  %v481_v34 = vld [vmem:[%s5719_s28 + $0x68] sm:$0xff]  ;;  %v518_v35 = vmax.f32 %v477_v26, %v473_v14  ;;  %v519_v36 = vmax.f32 %v478_v27, %v474_v19  ;;  %v520_v37 = vmax.f32 %v479_v28, %v475_v20  ;;  %v5767_v55 = vld [vmem:[%s5719_s28 + $0x70] sm:$0xff] }
  0x16   : > { %v561_v38 = vmax.f32 %v513_v22, %v5728_v10  ;;  %v521_v39 = vmax.f32 %v480_v33, %v476_v21  ;;  %v522_v40 = vmax.f32 %v481_v34, %v477_v26  ;;  %v562_v41 = vmax.f32 %v514_v23, %v471_v12  ;;  %8562 = vst [vmem:[#allocation7_spill] sm:$0xff] %v5767_v55  ;;  %v5770_v60 = vld [vmem:[%s5719_s28 + $0x78] sm:$0xff] }
  0x17   : > { %v563_v42 = vmax.f32 %v515_v29, %v472_v13  ;;  %v564_v43 = vmax.f32 %v516_v30, %v473_v14  ;;  %v565_v44 = vmax.f32 %v517_v31, %v474_v19  ;;  %v566_v45 = vmax.f32 %v518_v35, %v475_v20  ;;  %8563 = vst [vmem:[#allocation8_spill] sm:$0xff] %v5770_v60 }
  0x18   : > { %v567_v46 = vmax.f32 %v519_v36, %v476_v21  ;;  %v568_v47 = vmax.f32 %v520_v37, %v477_v26  ;;  %v5762_v48 = vmax.f32 %v521_v39, %v478_v27  ;;  %v5764_v49 = vmax.f32 %v522_v40, %v479_v28 }
  0x19   : > { %v608_v50 = vmax.f32 %v560_v24, %v473_v14  ;;  %v609_v51 = vmax.f32 %v561_v38, %v474_v19  ;;  %v610_v52 = vmax.f32 %v562_v41, %v475_v20  ;;  %v611_v53 = vmax.f32 %v563_v42, %v476_v21 }
  0x1a   : > { %8560 = vst [vmem:[#allocation5_spill] sm:$0xff] %v5762_v48  ;;  %v612_v54 = vmax.f32 %v564_v43, %v477_v26  ;;  %v613_v56 = vmax.f32 %v565_v44, %v478_v27  ;;  %v614_v57 = vmax.f32 %v566_v45, %v479_v28  ;;  %v615_v58 = vmax.f32 %v567_v46, %v480_v33 }
  0x1b   : > { %8561 = vst [vmem:[#allocation6_spill] sm:$0xff] %v5764_v49  ;;  %v616_v59 = vmax.f32 %v568_v47, %v481_v34  ;;  %v5775_v62 = vmax.f32 %v5740_v16, %v472_v13  ;;  %v5778_v63 = vmax.f32 %v5753_v25, %v473_v14  ;;  %v749_v0 = vrot.slane %v5725_v9, 6 }
  0x1c   : > { %v5781_v1 = vmax.f32 %v607_v32, %v474_v19  ;;  %v5783_v5 = vmax.f32 %v608_v50, %v475_v20  ;;  %v5785_v6 = vmax.f32 %v609_v51, %v476_v21  ;;  %v5787_v7 = vmax.f32 %v610_v52, %v477_v26 }
  0x1d   : > { %v5791_v15 = vmax.f32 %v611_v53, %v478_v27  ;;  %v5793_v13 = vmax.f32 %v612_v54, %v479_v28  ;;  %v5795_v22 = vmax.f32 %v613_v56, %v480_v33  ;;  %v5797_v14 = vmax.f32 %v614_v57, %v481_v34 }
  0x1e   : > { %v5800_v19 = vmax.f32 %v615_v58, %v5767_v55  ;;  %v5803_v20 = vmax.f32 %v616_v59, %v5770_v60  ;;  %v751_v21 = vrot.slane %v5740_v16, 6  ;;  %v752_v23 = vrot.slane %v5753_v25, 6 }
  0x1f   : > { %v754_v24 = vrot.slane %v5775_v62, 6  ;;  %v755_v26 = vrot.slane %v5778_v63, 6  ;;  %v757_v27 = vrot.slane %v5781_v1, 6  ;;  %v758_v28 = vrot.slane %v5783_v5, 6 }
  0x20   : > { %8564 = vst [vmem:[#allocation9_spill] sm:$0xff] %v5800_v19  ;;  %v760_v29 = vrot.slane %v5785_v6, 6  ;;  %v761_v30 = vrot.slane %v5787_v7, 6  ;;  %v763_v31 = vrot.slane %v5791_v15, 6  ;;  %v5817_v32 = vsel %vm741_vm1, %v748_v17, %v749_v0 }
  0x21   : > { %8565 = vst [vmem:[#allocation10_spill] sm:$0xff] %v5803_v20  ;;  %v5820_v33 = vsel %vm741_vm1, %v751_v21, %v752_v23  ;;  %v764_v34 = vrot.slane %v5793_v13, 6  ;;  %v766_v35 = vrot.slane %v5795_v22, 6  ;;  %v5825_v36 = vsel %vm741_vm1, %v754_v24, %v755_v26 }
  0x22   : > { %v5828_v37 = vsel %vm741_vm1, %v757_v27, %v758_v28  ;;  %v5831_v38 = vsel %vm741_vm1, %v760_v29, %v761_v30  ;;  %v767_v39 = vrot.slane %v5797_v14, 6  ;;  %v5840_v41 = vsel %vm741_vm1, -inf, %v748_v17 }
  0x23   : > { %v5835_v40 = vsel %vm741_vm1, %v763_v31, %v764_v34  ;;  %v5843_v42 = vsel %vm741_vm1, -inf, %v751_v21  ;;  %v5846_v43 = vsel %vm741_vm1, -inf, %v754_v24  ;;  %v5852_v45 = vsel %vm741_vm1, -inf, %v757_v27 }
  0x24   : > { %v5849_v44 = vsel %vm741_vm1, %v766_v35, %v767_v39  ;;  %v5855_v46 = vsel %vm741_vm1, -inf, %v760_v29  ;;  %v5858_v47 = vsel %vm741_vm1, -inf, %v763_v31  ;;  %v5861_v17 = vsel %vm741_vm1, -inf, %v766_v35 }
  0x25   : > { %8566 = vst [vmem:[#allocation11_spill] sm:$0xff] %v5849_v44  ;;  %v5864_v50 = vsel %vm741_vm1, %v749_v0, -inf  ;;  %v5867_v51 = vsel %vm741_vm1, %v752_v23, -inf  ;;  %v5870_v52 = vsel %vm741_vm1, %v755_v26, -inf  ;;  %v5873_v53 = vsel %vm741_vm1, %v758_v28, -inf }
  0x26   : > { %8567 = vst [vmem:[#allocation12_spill] sm:$0xff] %v5861_v17  ;;  %v5876_v54 = vsel %vm741_vm1, %v761_v30, -inf  ;;  %v5879_v56 = vsel %vm741_vm1, %v764_v34, -inf  ;;  %v5882_v57 = vsel %vm741_vm1, %v767_v39, -inf  ;;  %v938_v58 = vmax.f32 %v5722_v8, %v5840_v41 }
  0x27   : > { %8568 = vst [vmem:[#allocation13_spill] sm:$0xff] %v5882_v57  ;;  %v939_v59 = vmax.f32 %v5725_v9, %v5817_v32  ;;  %v940_v0 = vmax.f32 %v5740_v16, %v5843_v42  ;;  %v941_v21 = vmax.f32 %v5753_v25, %v5820_v33  ;;  %v942_v23 = vmax.f32 %v5775_v62, %v5846_v43 }
  0x28   : > { %v943_v24 = vmax.f32 %v5778_v63, %v5825_v36  ;;  %v944_v26 = vmax.f32 %v5781_v1, %v5852_v45  ;;  %v945_v27 = vmax.f32 %v5783_v5, %v5828_v37  ;;  %v946_v28 = vmax.f32 %v5785_v6, %v5855_v46 }
  0x29   : > { %v947_v16 = vmax.f32 %v5787_v7, %v5831_v38  ;;  %v948_v25 = vmax.f32 %v5791_v15, %v5858_v47  ;;  %v949_v62 = vmax.f32 %v5793_v13, %v5835_v40  ;;  %v950_v63 = vmax.f32 %v5795_v22, %v5861_v17 }
  0x2a   : > { %v951_v1 = vmax.f32 %v5797_v14, %v5849_v44  ;;  %v1041_v5 = vrot.slane %v5840_v41, 1  ;;  %v1042_v29 = vrot.slane %v5817_v32, 1  ;;  %v1044_v6 = vrot.slane %v5864_v50, 1 }
  0x2b   : > { %v1046_v7 = vrot.slane %v5843_v42, 1  ;;  %v1047_v30 = vrot.slane %v5820_v33, 1  ;;  %v1049_v15 = vrot.slane %v5867_v51, 1  ;;  %v1051_v31 = vrot.slane %v5846_v43, 1 }
  0x2c   : > { %v1043_v13 = vsel %vm1030_vm2, %v1041_v5, %v1042_v29  ;;  %v1052_v22 = vrot.slane %v5825_v36, 1  ;;  %v1054_v14 = vrot.slane %v5870_v52, 1  ;;  %v1045_v34 = vsel %vm1030_vm2, %v1042_v29, %v1044_v6 }
  0x2d   : > { %v1048_v35 = vsel %vm1030_vm2, %v1046_v7, %v1047_v30  ;;  %v1050_v39 = vsel %vm1030_vm2, %v1047_v30, %v1049_v15  ;;  %v1056_v12 = vrot.slane %v5852_v45, 1  ;;  %v1057_v5 = vrot.slane %v5828_v37, 1 }
  0x2e   : > { %v1053_v61 = vsel %vm1030_vm2, %v1051_v31, %v1052_v22  ;;  %v1055_v60 = vsel %vm1030_vm2, %v1052_v22, %v1054_v14  ;;  %v1059_v49 = vrot.slane %v5873_v53, 1  ;;  %v1061_v55 = vrot.slane %v5855_v46, 1 }
  0x2f   : > { %v1062_v48 = vrot.slane %v5831_v38, 1  ;;  %v1064_v29 = vrot.slane %v5876_v54, 1  ;;  %v1066_v6 = vrot.slane %v5858_v47, 1  ;;  %v1058_v7 = vsel %vm1030_vm2, %v1056_v12, %v1057_v5 }
  0x30   : > { %v1060_v30 = vsel %vm1030_vm2, %v1057_v5, %v1059_v49  ;;  %v1067_v15 = vrot.slane %v5835_v40, 1  ;;  %v1069_v31 = vrot.slane %v5879_v56, 1  ;;  %v1071_v10 = vrot.slane %v5861_v17, 1 }
  0x31   : > { %v1063_v22 = vsel %vm1030_vm2, %v1061_v55, %v1062_v48  ;;  %v1065_v14 = vsel %vm1030_vm2, %v1062_v48, %v1064_v29  ;;  %v1072_v9 = vrot.slane %v5849_v44, 1  ;;  %v1074_v12 = vrot.slane %v5882_v57, 1 }
  0x32   : > { %v1068_v20 = vsel %vm1030_vm2, %v1066_v6, %v1067_v15  ;;  %v1070_v8 = vsel %vm1030_vm2, %v1067_v15, %v1069_v31  ;;  %v1199_v49 = vmax.f32 %v5704_v3, %v5731_v11  ;;  %v1200_v55 = vmax.f32 %v5698_v2, %v5744_v18 }
  0x33   : > { %v1073_v5 = vsel %vm1030_vm2, %v1071_v10, %v1072_v9  ;;  %v5950_v19 = vmax.f32 %v938_v58, %v1043_v13  ;;  %v5952_v48 = vmax.f32 %v939_v59, %v1045_v34  ;;  %v1075_v29 = vsel %vm1030_vm2, %v1072_v9, %v1074_v12 }
  0x34   : > { %v5955_v44 = vmax.f32 %v940_v0, %v1048_v35  ;;  %v5957_v6 = vmax.f32 %v941_v21, %v1050_v39  ;;  %v5959_v15 = vmax.f32 %v942_v23, %v1053_v61  ;;  %v5961_v31 = vmax.f32 %v943_v24, %v1055_v60 }
  0x35   : > { %v5963_v11 = vmax.f32 %v944_v26, %v1058_v7  ;;  %v5965_v10 = vmax.f32 %v945_v27, %v1060_v30  ;;  %v5967_v57 = vmax.f32 %v946_v28, %v1063_v22  ;;  %v5969_v18 = vmax.f32 %v947_v16, %v1065_v14 }
  0x36   : > { %v5971_v58 = vmax.f32 %v948_v25, %v1068_v20  ;;  %v5973_v59 = vmax.f32 %v949_v62, %v1070_v8  ;;  %v5975_v9 = vmax.f32 %v950_v63, %v1073_v5  ;;  %v5977_v0 = vmax.f32 %v951_v1, %v1075_v29 }
  0x37   : > { %v1248_v60 = vrot.slane %v5704_v3, 3  ;;  %v1249_v61 = vrot.slane %v5698_v2, 3  ;;  %v1251_v21 = vrot.slane %v5708_v4, 3  ;;  %v1258_v23 = vrot.slane %v5840_v41, 3 }
  0x38   : > { %v1259_v24 = vrot.slane %v5817_v32, 3  ;;  %v1261_v20 = vrot.slane %v5864_v50, 3  ;;  %v1263_v26 = vrot.slane %v5843_v42, 3  ;;  %v1264_v27 = vrot.slane %v5820_v33, 3 }
  0x39   : > { %v1250_v8 = vsel %vm1247_vm3, %v1248_v60, %v1249_v61  ;;  %v1266_v28 = vrot.slane %v5867_v51, 3  ;;  %v1252_v16 = vsel %vm1247_vm3, %v1249_v61, %v1251_v21  ;;  %v1268_v63 = vrot.slane %v5846_v43, 3 }
  0x3a   : > { %v5991_v25 = vsel %vm1247_vm3, %v1258_v23, %v1259_v24  ;;  %v5994_v62 = vsel %vm1247_vm3, %v1259_v24, %v1261_v20  ;;  %v5998_v1 = vsel %vm1247_vm3, %v1263_v26, %v1264_v27  ;;  %v1269_v34 = vrot.slane %v5825_v36, 3 }
  0x3b   : > { %v6001_v13 = vsel %vm1247_vm3, %v1264_v27, %v1266_v28  ;;  %v1271_v35 = vrot.slane %v5870_v52, 3  ;;  %v1273_v39 = vrot.slane %v5852_v45, 3  ;;  %v1274_v7 = vrot.slane %v5828_v37, 3 }
  0x3c   : > { %v1276_v30 = vrot.slane %v5873_v53, 3  ;;  %v1278_v22 = vrot.slane %v5855_v46, 3  ;;  %v6010_v14 = vsel %vm1247_vm3, %v1268_v63, %v1269_v34  ;;  %v1279_v5 = vrot.slane %v5831_v38, 3  ;;  %v8569_v63 = vld [vmem:[#allocation11_spill] sm:$0xff] }
  0x3d   : > { %v6013_v12 = vsel %vm1247_vm3, %v1269_v34, %v1271_v35  ;;  %v1281_v29 = vrot.slane %v5876_v54, 3  ;;  %v6018_v60 = vsel %vm1247_vm3, %v1273_v39, %v1274_v7  ;;  %v1283_v21 = vrot.slane %v5858_v47, 3  ;;  %v8570_v35 = vld [vmem:[#allocation13_spill] sm:$0xff] }
  0x3e   : > { %v6021_v61 = vsel %vm1247_vm3, %v1274_v7, %v1276_v30  ;;  %v1284_v23 = vrot.slane %v5835_v40, 3  ;;  %v6026_v24 = vsel %vm1247_vm3, %v1278_v22, %v1279_v5  ;;  %v1286_v26 = vrot.slane %v5879_v56, 3 }
  0x3f   : > { %v6029_v20 = vsel %vm1247_vm3, %v1279_v5, %v1281_v29  ;;  %v1288_v27 = vrot.slane %v5861_v17, 3  ;;  %v1289_v34 = vrot.slane %v8569_v63, 3  ;;  %v1291_v39 = vrot.slane %v8570_v35, 3 }
  0x40   : > { %v6034_v28 = vsel %vm1247_vm3, %v1283_v21, %v1284_v23  ;;  %v1416_v7 = vmax.f32 %v1199_v49, %v1250_v8  ;;  %v6039_v30 = vsel %vm1247_vm3, %v1284_v23, %v1286_v26  ;;  %v1417_v22 = vmax.f32 %v1200_v55, %v1252_v16  ;;  %v8572_v26 = vld [vmem:[#allocation13_spill] sm:$0xff] }
  0x41   : > { %v1420_v5 = vmax.f32 %v5950_v19, %v5991_v25  ;;  %v1421_v29 = vmax.f32 %v5952_v48, %v5994_v62  ;;  %v6046_v17 = vsel %vm1247_vm3, %v1288_v27, %v1289_v34  ;;  %v6049_v21 = vsel %vm1247_vm3, %v1289_v34, %v1291_v39 }
  0x42   : > { %v1422_v35 = vmax.f32 %v5955_v44, %v5998_v1  ;;  %v1423_v49 = vmax.f32 %v5957_v6, %v6001_v13  ;;  %v1424_v55 = vmax.f32 %v5959_v15, %v6010_v14  ;;  %v1425_v19 = vmax.f32 %v5961_v31, %v6013_v12 }
  0x43   : > { %v1426_v48 = vmax.f32 %v5963_v11, %v6018_v60  ;;  %v1427_v8 = vmax.f32 %v5965_v10, %v6021_v61  ;;  %v1428_v16 = vmax.f32 %v5967_v57, %v6026_v24  ;;  %v1429_v44 = vmax.f32 %v5969_v18, %v6029_v20  ;;  %v8571_v24 = vld [vmem:[#allocation12_spill] sm:$0xff] }
  0x44   : > { %v1430_v6 = vmax.f32 %v5971_v58, %v6034_v28  ;;  %v1431_v15 = vmax.f32 %v5973_v59, %v6039_v30  ;;  %v1432_v31 = vmax.f32 %v5975_v9, %v6046_v17  ;;  %v1433_v11 = vmax.f32 %v5977_v0, %v6049_v21 }
  0x45   : > { %v1465_v10 = vrot.slane %v5704_v3, 4  ;;  %v1466_v25 = vrot.slane %v5698_v2, 4  ;;  %v1468_v57 = vrot.slane %v5708_v4, 4  ;;  %v1475_v18 = vrot.slane %v5840_v41, 4 }
  0x46   : > { %v1476_v62 = vrot.slane %v5817_v32, 4  ;;  %v1478_v58 = vrot.slane %v5864_v50, 4  ;;  %v1480_v1 = vrot.slane %v5843_v42, 4  ;;  %v1481_v17 = vrot.slane %v5820_v33, 4 }
  0x47   : > { %v1467_v59 = vsel %vm1464_vm0, %v1465_v10, %v1466_v25  ;;  %v1483_v9 = vrot.slane %v5867_v51, 4  ;;  %v1469_v3 = vsel %vm1464_vm0, %v1466_v25, %v1468_v57  ;;  %v1485_v41 = vrot.slane %v5846_v43, 4 }
  0x48   : > { %v1477_v2 = vsel %vm1464_vm0, %v1475_v18, %v1476_v62  ;;  %v1479_v4 = vsel %vm1464_vm0, %v1476_v62, %v1478_v58  ;;  %v1482_v32 = vsel %vm1464_vm0, %v1480_v1, %v1481_v17  ;;  %v1486_v0 = vrot.slane %v5825_v36, 4  ;;  %v8573_v18 = vld [vmem:[#allocation9_spill] sm:$0xff] }
  0x49   : > { %v1484_v50 = vsel %vm1464_vm0, %v1481_v17, %v1483_v9  ;;  %v1488_v42 = vrot.slane %v5870_v52, 4  ;;  %v1490_v33 = vrot.slane %v5852_v45, 4  ;;  %v1491_v51 = vrot.slane %v5828_v37, 4 }
  0x4a   : > { %v1493_v13 = vrot.slane %v5873_v53, 4  ;;  %v1495_v14 = vrot.slane %v5855_v46, 4  ;;  %v1487_v12 = vsel %vm1464_vm0, %v1485_v41, %v1486_v0  ;;  %v1496_v60 = vrot.slane %v5831_v38, 4 }
  0x4b   : > { %v1489_v43 = vsel %vm1464_vm0, %v1486_v0, %v1488_v42  ;;  %v1498_v61 = vrot.slane %v5876_v54, 4  ;;  %v1492_v36 = vsel %vm1464_vm0, %v1490_v33, %v1491_v51  ;;  %v1500_v45 = vrot.slane %v5858_v47, 4 }
  0x4c   : > { %v1494_v52 = vsel %vm1464_vm0, %v1491_v51, %v1493_v13  ;;  %v1501_v37 = vrot.slane %v5835_v40, 4  ;;  %v1497_v53 = vsel %vm1464_vm0, %v1495_v14, %v1496_v60  ;;  %v1503_v23 = vrot.slane %v5879_v56, 4 }
  0x4d   : > { %v1499_v46 = vsel %vm1464_vm0, %v1496_v60, %v1498_v61  ;;  %v1505_v20 = vrot.slane %v8571_v24, 4  ;;  %v1506_v54 = vrot.slane %v8569_v63, 4  ;;  %v1508_v27 = vrot.slane %v8572_v26, 4 }
  0x4e   : > { %v1502_v38 = vsel %vm1464_vm0, %v1500_v45, %v1501_v37  ;;  %v6112_v28 = vmax.f32 %v1416_v7, %v1467_v59  ;;  %v1504_v47 = vsel %vm1464_vm0, %v1501_v37, %v1503_v23  ;;  %v6115_v34 = vmax.f32 %v1417_v22, %v1469_v3  ;;  %v5361_v37 = vld [vmem:[%s8539_s3 + $0xc] sm:$0xf] }
  0x4f   : > { %v1637_v40 = vmax.f32 %v1420_v5, %v1477_v2  ;;  %v1638_v39 = vmax.f32 %v1421_v29, %v1479_v4  ;;  %v1507_v30 = vsel %vm1464_vm0, %v1505_v20, %v1506_v54  ;;  %v1509_v56 = vsel %vm1464_vm0, %v1506_v54, %v1508_v27  ;;  %5362 = vmatpush.msk.msra.mxu3 %vm1464_vm0, %v5361_v37 }
  0x50   : > { %v1639_v21 = vmax.f32 %v1422_v35, %v1482_v32  ;;  %v1640_v10 = vmax.f32 %v1423_v49, %v1484_v50  ;;  %v6119_v25 = vmax.f32 %v1424_v55, %v1487_v12  ;;  %v6121_v57 = vmax.f32 %v1425_v19, %v1489_v43 }
  0x51   : > { %v6123_v63 = vmax.f32 %v1426_v48, %v1492_v36  ;;  %v6125_v7 = vmax.f32 %v1427_v8, %v1494_v52  ;;  %v6128_v22 = vmax.f32 %v1428_v16, %v1497_v53  ;;  %v6130_v5 = vmax.f32 %v1429_v44, %v1499_v46 }
  0x52   : > { %v6132_v29 = vmax.f32 %v1430_v6, %v1502_v38  ;;  %v6134_v58 = vmax.f32 %v1431_v15, %v1504_v47  ;;  %v6136_v35 = vmax.f32 %v1432_v31, %v1507_v30  ;;  %v6138_v49 = vmax.f32 %v1433_v11, %v1509_v56 }
  0x53   : > { %v2108_v55 = vmax.f32 %v1637_v40, %v6112_v28  ;;  %v2109_v19 = vmax.f32 %v1638_v39, %v6115_v34  ;;  %v2110_v48 = vmax.f32 %v1639_v21, %v6112_v28  ;;  %v2111_v8 = vmax.f32 %v1640_v10, %v6115_v34 }
  0x54   : > { %v2112_v16 = vmax.f32 %v6119_v25, %v1637_v40  ;;  %v2113_v44 = vmax.f32 %v6121_v57, %v1638_v39  ;;  %v2114_v6 = vmax.f32 %v6123_v63, %v1639_v21  ;;  %v2115_v15 = vmax.f32 %v6125_v7, %v1640_v10 }
  0x55   : > { %v2116_v31 = vmax.f32 %v6128_v22, %v6119_v25  ;;  %v2117_v11 = vmax.f32 %v6130_v5, %v6121_v57  ;;  %v2148_v59 = vmax.f32 %v2108_v55, %v6112_v28  ;;  %v2149_v1 = vmax.f32 %v2109_v19, %v6115_v34 }
  0x56   : > { %v2150_v17 = vmax.f32 %v2110_v48, %v1637_v40  ;;  %v2151_v9 = vmax.f32 %v2111_v8, %v1638_v39  ;;  %v2152_v3 = vmax.f32 %v2112_v16, %v1639_v21  ;;  %v2153_v2 = vmax.f32 %v2113_v44, %v1640_v10 }
  0x57   : > { %v2154_v4 = vmax.f32 %v2114_v6, %v6119_v25  ;;  %v2155_v41 = vmax.f32 %v2115_v15, %v6121_v57  ;;  %v2156_v32 = vmax.f32 %v2116_v31, %v6123_v63  ;;  %v2157_v50 = vmax.f32 %v2117_v11, %v6125_v7 }
  0x58   : > { %v2188_v0 = vmax.f32 %v2148_v59, %v1639_v21  ;;  %v2189_v42 = vmax.f32 %v2149_v1, %v1640_v10  ;;  %v2190_v33 = vmax.f32 %v2150_v17, %v6119_v25  ;;  %v2191_v51 = vmax.f32 %v2151_v9, %v6121_v57 }
  0x59   : > { %v2192_v13 = vmax.f32 %v2152_v3, %v6123_v63  ;;  %v2193_v14 = vmax.f32 %v2153_v2, %v6125_v7  ;;  %v2194_v12 = vmax.f32 %v2154_v4, %v6128_v22  ;;  %v2195_v43 = vmax.f32 %v2155_v41, %v6130_v5 }
  0x5a   : > { %v2196_v60 = vmax.f32 %v2156_v32, %v6132_v29  ;;  %v2197_v61 = vmax.f32 %v2157_v50, %v6134_v58  ;;  %v2228_v36 = vmax.f32 %v2188_v0, %v6119_v25  ;;  %v6168_v52 = vmax.f32 %v2189_v42, %v6121_v57 }
  0x5b   : > { %v2230_v45 = vmax.f32 %v2190_v33, %v6123_v63  ;;  %v6175_v53 = vmax.f32 %v2191_v51, %v6125_v7  ;;  %v2232_v46 = vmax.f32 %v2192_v13, %v6128_v22  ;;  %v2233_v23 = vmax.f32 %v2193_v14, %v6130_v5 }
  0x5c   : > { %v2234_v24 = vmax.f32 %v2194_v12, %v6132_v29  ;;  %v6182_v20 = vmax.f32 %v2195_v43, %v6134_v58  ;;  %v2236_v38 = vmax.f32 %v2196_v60, %v6136_v35  ;;  %v6186_v54 = vmax.f32 %v2197_v61, %v6138_v49 }
  0x5d   : > { %v2308_v26 = vrot.slane %v2228_v36, 6  ;;  %v2309_v27 = vrot.slane %v6168_v52, 6  ;;  %v2311_v47 = vrot.slane %v2230_v45, 6  ;;  %v2312_v40 = vrot.slane %v6175_v53, 6 }
  0x5e   : > { %v2314_v39 = vrot.slane %v2232_v46, 6  ;;  %v2315_v30 = vrot.slane %v2233_v23, 6  ;;  %v2317_v56 = vrot.slane %v2234_v24, 6  ;;  %v2318_v21 = vrot.slane %v6182_v20, 6 }
  0x5f   : > { %v2320_v10 = vrot.slane %v2236_v38, 6  ;;  %v6192_v55 = vsel %vm741_vm1, %v2308_v26, %v2309_v27  ;;  %v6197_v19 = vsel %vm741_vm1, %v2311_v47, %v2312_v40  ;;  %v2321_v48 = vrot.slane %v6186_v54, 6 }
  0x60   : > { %v6201_v8 = vsel %vm741_vm1, -inf, %v2308_v26  ;;  %v6204_v16 = vsel %vm741_vm1, %v2314_v39, %v2315_v30  ;;  %v6209_v44 = vsel %vm741_vm1, %v2317_v56, %v2318_v21  ;;  %v6212_v6 = vsel %vm741_vm1, -inf, %v2311_v47 }
  0x61   : > { %v6215_v15 = vsel %vm741_vm1, -inf, %v2314_v39  ;;  %v6220_v31 = vsel %vm741_vm1, %v2320_v10, %v2321_v48  ;;  %v6223_v11 = vsel %vm741_vm1, -inf, %v2317_v56  ;;  %v6226_v59 = vsel %vm741_vm1, -inf, %v2320_v10 }
  0x62   : > { %v6229_v1 = vsel %vm741_vm1, %v2309_v27, -inf  ;;  %v6232_v17 = vsel %vm741_vm1, %v2315_v30, -inf  ;;  %v2468_v9 = vmax.f32 %v2228_v36, %v6201_v8  ;;  %v2469_v3 = vmax.f32 %v6168_v52, %v6192_v55 }
  0x63   : > { %v2470_v2 = vmax.f32 %v2230_v45, %v6212_v6  ;;  %v2472_v4 = vmax.f32 %v2232_v46, %v6215_v15  ;;  %v2473_v41 = vmax.f32 %v2233_v23, %v6204_v16  ;;  %v2474_v32 = vmax.f32 %v2234_v24, %v6223_v11 }
  0x64   : > { %v2476_v50 = vmax.f32 %v2236_v38, %v6226_v59  ;;  %v2548_v0 = vrot.slane %v6201_v8, 1  ;;  %v2549_v42 = vrot.slane %v6192_v55, 1  ;;  %v2551_v33 = vrot.slane %v6229_v1, 1 }
  0x65   : > { %v2553_v51 = vrot.slane %v6212_v6, 1  ;;  %v2554_v13 = vrot.slane %v6197_v19, 1  ;;  %v2558_v14 = vrot.slane %v6215_v15, 1  ;;  %v2559_v12 = vrot.slane %v6204_v16, 1 }
  0x66   : > { %v2561_v43 = vrot.slane %v6232_v17, 1  ;;  %v2550_v60 = vsel %vm1030_vm2, %v2548_v0, %v2549_v42  ;;  %v6252_v61 = vsel %vm1030_vm2, %v2549_v42, %v2551_v33  ;;  %v2563_v36 = vrot.slane %v6223_v11, 1 }
  0x67   : > { %v2564_v45 = vrot.slane %v6209_v44, 1  ;;  %v2555_v37 = vsel %vm1030_vm2, %v2553_v51, %v2554_v13  ;;  %v2560_v46 = vsel %vm1030_vm2, %v2558_v14, %v2559_v12  ;;  %v2568_v24 = vrot.slane %v6226_v59, 1 }
  0x68   : > { %v2562_v23 = vsel %vm1030_vm2, %v2559_v12, %v2561_v43  ;;  %v2569_v26 = vrot.slane %v6220_v31, 1  ;;  %v2688_v27 = vmax.f32 %v2468_v9, %v2550_v60  ;;  %v2690_v47 = vmax.f32 %v2470_v2, %v2555_v37 }
  0x69   : > { %v2565_v38 = vsel %vm1030_vm2, %v2563_v36, %v2564_v45  ;;  %v2692_v39 = vmax.f32 %v2472_v4, %v2560_v46  ;;  %v2693_v30 = vmax.f32 %v2473_v41, %v2562_v23  ;;  %v2728_v10 = vrot.slane %v6201_v8, 3 }
  0x6a   : > { %v2694_v56 = vmax.f32 %v2474_v32, %v2565_v38  ;;  %v2570_v0 = vsel %vm1030_vm2, %v2568_v24, %v2569_v26  ;;  %v2729_v42 = vrot.slane %v6192_v55, 3  ;;  %v2731_v33 = vrot.slane %v6229_v1, 3 }
  0x6b   : > { %v2733_v51 = vrot.slane %v6212_v6, 3  ;;  %v2696_v14 = vmax.f32 %v2476_v50, %v2570_v0  ;;  %v2734_v12 = vrot.slane %v6197_v19, 3  ;;  %v2738_v9 = vrot.slane %v6215_v15, 3 }
  0x6c   : > { %v2739_v2 = vrot.slane %v6204_v16, 3  ;;  %v2730_v4 = vsel %vm1247_vm3, %v2728_v10, %v2729_v42  ;;  %v6278_v41 = vsel %vm1247_vm3, %v2729_v42, %v2731_v33  ;;  %v2741_v32 = vrot.slane %v6232_v17, 3 }
  0x6d   : > { %v2743_v43 = vrot.slane %v6223_v11, 3  ;;  %v2735_v50 = vsel %vm1247_vm3, %v2733_v51, %v2734_v12  ;;  %v2744_v36 = vrot.slane %v6209_v44, 3  ;;  %v2748_v37 = vrot.slane %v6226_v59, 3 }
  0x6e   : > { %v2740_v60 = vsel %vm1247_vm3, %v2738_v9, %v2739_v2  ;;  %v2742_v46 = vsel %vm1247_vm3, %v2739_v2, %v2741_v32  ;;  %v2749_v23 = vrot.slane %v6220_v31, 3  ;;  %v2868_v24 = vmax.f32 %v2688_v27, %v2730_v4 }
  0x6f   : > { %v2870_v38 = vmax.f32 %v2690_v47, %v2735_v50  ;;  %v2745_v10 = vsel %vm1247_vm3, %v2743_v43, %v2744_v36  ;;  %v2872_v0 = vmax.f32 %v2692_v39, %v2740_v60  ;;  %v2873_v42 = vmax.f32 %v2693_v30, %v2742_v46 }
  0x70   : > { %v2908_v33 = vrot.slane %v6201_v8, 4  ;;  %v2750_v51 = vsel %vm1247_vm3, %v2748_v37, %v2749_v23  ;;  %v2874_v9 = vmax.f32 %v2694_v56, %v2745_v10  ;;  %v2909_v62 = vrot.slane %v6192_v55, 4 }
  0x71   : > { %v2911_v2 = vrot.slane %v6229_v1, 4  ;;  %v2876_v32 = vmax.f32 %v2696_v14, %v2750_v51  ;;  %v2913_v27 = vrot.slane %v6212_v6, 4  ;;  %v2914_v47 = vrot.slane %v6197_v19, 4 }
  0x72   : > { %v2918_v4 = vrot.slane %v6215_v15, 4  ;;  %v2910_v39 = vsel %vm1464_vm0, %v2908_v33, %v2909_v62  ;;  %v2919_v30 = vrot.slane %v6204_v16, 4  ;;  %v2921_v43 = vrot.slane %v6232_v17, 4 }
  0x73   : > { %v2912_v8 = vsel %vm1464_vm0, %v2909_v62, %v2911_v2  ;;  %v2915_v56 = vsel %vm1464_vm0, %v2913_v27, %v2914_v47  ;;  %v2923_v50 = vrot.slane %v6223_v11, 4  ;;  %v2924_v1 = vrot.slane %v6209_v44, 4  ;;  %v5260_v11 = vld [vmem:[%s8539_s3 + $0x4] sm:$0xf] }
  0x74   : > { %v2928_v6 = vrot.slane %v6226_v59, 4  ;;  %v2920_v14 = vsel %vm1464_vm0, %v2918_v4, %v2919_v30  ;;  %v2922_v15 = vsel %vm1464_vm0, %v2919_v30, %v2921_v43  ;;  %v2929_v60 = vrot.slane %v6220_v31, 4  ;;  %v500_v59 = vld [vmem:[%s8539_s3] sm:$0xf]  ;;  %5261 = vmatpush.msk.msra.mxu0 %vm1464_vm0, %v5260_v11 }
  0x75   : > { %v3048_v37 = vmax.f32 %v2868_v24, %v2910_v39  ;;  %v2925_v62 = vsel %vm1464_vm0, %v2923_v50, %v2924_v1  ;;  %v3050_v16 = vmax.f32 %v2870_v38, %v2915_v56  ;;  %v6314_v46 = vmax.f32 %v2872_v0, %v2920_v14  ;;  %5294 = vmatpush.msk.msra.mxu1 %vm1464_vm0, %v500_v59  ;;  %v8574_v27 = vld [vmem:[#allocation2_spill] sm:$0xff] }
  0x76   : > { %v6316_v17 = vmax.f32 %v2873_v42, %v2922_v15  ;;  %v2930_v10 = vsel %vm1464_vm0, %v2928_v6, %v2929_v60  ;;  %v6325_v33 = vmax.f32 %v2874_v9, %v2925_v62  ;;  %v2449_v24 = vsel %vm741_vm1, %v2312_v40, -inf  ;;  %5262 = vmatmul.msk.f32.vlgmr.msra.gmra.mxu0 %vm1683_vm4, %v6119_v25  ;;  %5295 = vmatmul.msk.f32.vlgmr.msra.gmra.mxu1 %vm1683_vm4, %v8574_v27 }
  0x77   : > { %v2451_v38 = vsel %vm741_vm1, %v2318_v21, -inf  ;;  %v6335_v0 = vmax.f32 %v2876_v32, %v2930_v10  ;;  %5329 = vmatmul.msk.f32.vlgmr.msra.gmra.mxu2 %vm1683_vm4, %v6314_v46  ;;  %v3334_v42 = vmax.f32 %v6314_v46, %v3048_v37  ;;  %v2452_v51 = vsel %vm741_vm1, %v2321_v48, -inf  ;;  %v8576_v10 = vld [vmem:[#allocation3_spill] sm:$0xff] }
  0x78   : > { %v2471_v40 = vmax.f32 %v6175_v53, %v6197_v19  ;;  %v3336_v21 = vmax.f32 %v6325_v33, %v3050_v16  ;;  %v2475_v9 = vmax.f32 %v6182_v20, %v6209_v44  ;;  %v2477_v2 = vmax.f32 %v6186_v54, %v6220_v31  ;;  %v8575_v44 = vld [vmem:[#allocation10_spill] sm:$0xff] }
  0x79   : > { %v2556_v32 = vrot.slane %v2449_v24, 1  ;;  %v3338_v48 = vmax.f32 %v6335_v0, %v6314_v46  ;;  %v2566_v4 = vrot.slane %v2451_v38, 1  ;;  %v2571_v53 = vrot.slane %v2452_v51, 1 }
  0x7a   : > { %v2689_v25 = vmax.f32 %v2469_v3, %v6252_v61  ;;  %v6361_v39 = vmax.f32 %v3336_v21, %v6314_v46  ;;  %v2736_v54 = vrot.slane %v2449_v24, 3  ;;  %v2746_v30 = vrot.slane %v2451_v38, 3 }
  0x7b   : > { %v2557_v20 = vsel %vm1030_vm2, %v2554_v13, %v2556_v32  ;;  %v2567_v43 = vsel %vm1030_vm2, %v2564_v45, %v2566_v4  ;;  %v2572_v56 = vsel %vm1030_vm2, %v2569_v26, %v2571_v53  ;;  %v2751_v52 = vrot.slane %v2452_v51, 3 }
  0x7c   : > { %v2691_v50 = vmax.f32 %v2471_v40, %v2557_v20  ;;  %v2695_v55 = vmax.f32 %v2475_v9, %v2567_v43  ;;  %v2697_v3 = vmax.f32 %v2477_v2, %v2572_v56  ;;  %v2737_v61 = vsel %vm1247_vm3, %v2734_v12, %v2736_v54 }
  0x7d   : > { %v2747_v13 = vsel %vm1247_vm3, %v2744_v36, %v2746_v30  ;;  %v2752_v45 = vsel %vm1247_vm3, %v2749_v23, %v2751_v52  ;;  %v2869_v6 = vmax.f32 %v2689_v25, %v6278_v41  ;;  %v2916_v26 = vrot.slane %v2449_v24, 4 }
  0x7e   : > { %v2871_v14 = vmax.f32 %v2691_v50, %v2737_v61  ;;  %v2875_v15 = vmax.f32 %v2695_v55, %v2747_v13  ;;  %v2877_v37 = vmax.f32 %v2697_v3, %v2752_v45  ;;  %v2926_v62 = vrot.slane %v2451_v38, 4  ;;  %5263 = vmatmul.msk.f32.gmra.mxu0 %vm1683_vm4, %v6121_v57  ;;  %5296 = vmatmul.msk.f32.gmra.mxu1 %vm1683_vm4, %v8576_v10 }
  0x7f   : > { %v2931_v11 = vrot.slane %v2452_v51, 4  ;;  %v2917_v19 = vsel %vm1464_vm0, %v2914_v47, %v2916_v26  ;;  %v3049_v59 = vmax.f32 %v2869_v6, %v2912_v8  ;;  %v3366_v12 = vmax.f32 %v3334_v42, %v3050_v16  ;;  %5330 = vmatmul.msk.f32.gmra.mxu2 %vm1683_vm4, %v6316_v17 }
  0x80   : > { %v770_v31 = vrot.slane %v8575_v44, 6  ;;  %v2927_v41 = vsel %vm1464_vm0, %v2924_v1, %v2926_v62  ;;  %v6390_v23 = vmax.f32 %v2871_v14, %v2917_v19  ;;  %v8577_v47 = vrot.slane %v8573_v18, 6 }
  0x81   : > { %v2932_v36 = vsel %vm1464_vm0, %v2929_v60, %v2931_v11  ;;  %v6397_v16 = vmax.f32 %v2875_v15, %v2927_v41  ;;  %v3335_v57 = vmax.f32 %v6316_v17, %v3049_v59  ;;  %v3398_v38 = vmax.f32 %v3366_v12, %v6325_v33  ;;  %v8579_v15 = vld [vmem:[#allocation4_spill] sm:$0xff] }
  0x82   : > { %v895_v8 = vsel %vm741_vm1, -inf, %v8577_v47  ;;  %v6399_v24 = vmax.f32 %v2877_v37, %v2932_v36  ;;  %v8578_v1 = vmov %v8577_v47  ;;  %v919_v42 = vsel %vm741_vm1, %v770_v31, -inf }
  0x83   : > { %v771_v60 = vsel %vm741_vm1, %v8578_v1, %v770_v31  ;;  %v952_v51 = vmax.f32 %v8573_v18, %v895_v8  ;;  %v1076_v40 = vrot.slane %v895_v8, 1  ;;  %v3367_v21 = vmax.f32 %v3335_v57, %v6390_v23 }
  0x84   : > { %v3430_v9 = vmax.f32 %v3398_v38, %v6335_v0  ;;  %v953_v2 = vmax.f32 %v8575_v44, %v771_v60  ;;  %v1077_v32 = vrot.slane %v771_v60, 1  ;;  %v1079_v27 = vrot.slane %v919_v42, 1 }
  0x85   : > { %v1293_v4 = vrot.slane %v895_v8, 3  ;;  %v1294_v53 = vrot.slane %v771_v60, 3  ;;  %v1296_v25 = vrot.slane %v919_v42, 3  ;;  %v3399_v20 = vmax.f32 %v3367_v21, %v6397_v16 }
  0x86   : > { %v3494_v54 = vrot.slane %v3430_v9, 6  ;;  %v1078_v30 = vsel %vm1030_vm2, %v1076_v40, %v1077_v32  ;;  %v1510_v43 = vrot.slane %v895_v8, 4  ;;  %v1080_v18 = vsel %vm1030_vm2, %v1077_v32, %v1079_v27  ;;  %5264 = vmatmul.msk.f32.gmra.mxu0 %vm1683_vm4, %v6123_v63  ;;  %5297 = vmatmul.msk.f32.gmra.mxu1 %vm1683_vm4, %v8579_v15  ;;  %v6447_v32 = vld [vmem:[%s5719_s28 + $0x88] sm:$0xff] }
  0x87   : > { %v1217_v56 = vmax.f32 %v952_v51, %v1078_v30  ;;  %v1295_v50 = vsel %vm1247_vm3, %v1293_v4, %v1294_v53  ;;  %v1297_v52 = vsel %vm1247_vm3, %v1294_v53, %v1296_v25  ;;  %v3431_v55 = vmax.f32 %v3399_v20, %v6399_v24  ;;  %5331 = vmatmul.msk.f32.gmra.mxu2 %vm1683_vm4, %v6325_v33 }
  0x88   : > { %v3590_v3 = vsel %vm741_vm1, -inf, %v3494_v54  ;;  %v1218_v61 = vmax.f32 %v953_v2, %v1080_v18  ;;  %v1511_v13 = vrot.slane %v771_v60, 4  ;;  %v1513_v59 = vrot.slane %v919_v42, 4  ;;  %v6444_v2 = vld [vmem:[%s5719_s28 + $0x80] sm:$0xff] }
  0x89   : > { %v3622_v45 = vmax.f32 %v3430_v9, %v3590_v3  ;;  %v3686_v6 = vrot.slane %v3590_v3, 1  ;;  %v3830_v14 = vrot.slane %v3590_v3, 3  ;;  %v3974_v26 = vrot.slane %v3590_v3, 4 }
  0x8a   : > { %v3495_v37 = vrot.slane %v3431_v55, 6  ;;  %v1434_v62 = vmax.f32 %v1217_v56, %v1295_v50  ;;  %v1435_v11 = vmax.f32 %v1218_v61, %v1297_v52  ;;  %v1512_v19 = vsel %vm1464_vm0, %v1510_v43, %v1511_v13  ;;  %v5588_v56 = vld [vmem:[%s5719_s28 + $0x18] sm:$0xff]  ;;  %v8581_v52 = vld [vmem:[#allocation7_spill] sm:$0xff]  ;;  %v8583_v61 = vld [vmem:[#allocation6_spill] sm:$0xff] }
  0x8b   : > { %v2118_v12 = vmax.f32 %v6132_v29, %v6123_v63  ;;  %v2119_v44 = vmax.f32 %v6134_v58, %v6125_v7  ;;  %v3337_v31 = vmax.f32 %v6397_v16, %v6390_v23  ;;  %v3400_v47 = vmax.f32 %v6361_v39, %v6335_v0  ;;  %v8580_v50 = vld [vmem:[#allocation5_spill] sm:$0xff] }
  0x8c   : > { %v3496_v41 = vsel %vm741_vm1, %v3494_v54, %v3495_v37  ;;  %v3606_v36 = vsel %vm741_vm1, %v3495_v37, -inf  ;;  %v6433_v10 = vmax.f32 %v1434_v62, %v1512_v19  ;;  %v1514_v23 = vsel %vm1464_vm0, %v1511_v13, %v1513_v59  ;;  %v8584_v13 = vld [vmem:[#allocation8_spill] sm:$0xff] }
  0x8d   : > { %v3687_v8 = vrot.slane %v3496_v41, 1  ;;  %v3831_v57 = vrot.slane %v3496_v41, 3  ;;  %v3975_v63 = vrot.slane %v3496_v41, 4  ;;  %v3623_v38 = vmax.f32 %v3431_v55, %v3496_v41 }
  0x8e   : > { %v3689_v1 = vrot.slane %v3606_v36, 1  ;;  %v3833_v60 = vrot.slane %v3606_v36, 3  ;;  %v3977_v42 = vrot.slane %v3606_v36, 4  ;;  %v6441_v9 = vmax.f32 %v1435_v11, %v1514_v23  ;;  %5265 = vmatmul.msk.f32.gmra.mxu0 %vm1683_vm4, %v6125_v7  ;;  %5298 = vmatmul.msk.f32.gmra.mxu1 %vm1683_vm4, %v5588_v56  ;;  %v5589_v56 = vld [vmem:[%s5719_s28 + $0x20] sm:$0xff] }
  0x8f   : > { %v3688_v51 = vsel %vm1030_vm2, %v3686_v6, %v3687_v8  ;;  %v3832_v40 = vsel %vm1247_vm3, %v3830_v14, %v3831_v57  ;;  %v3976_v21 = vsel %vm1464_vm0, %v3974_v26, %v3975_v63  ;;  %5332 = vmatmul.msk.f32.gmra.mxu2 %vm1683_vm4, %v6397_v16  ;;  %v2158_v54 = vmax.f32 %v2118_v12, %v6128_v22 }
  0x90   : > { %v3798_v27 = vmax.f32 %v3622_v45, %v3688_v51  ;;  %v3690_v4 = vsel %vm1030_vm2, %v3687_v8, %v3689_v1  ;;  %v3834_v53 = vsel %vm1247_vm3, %v3831_v57, %v3833_v60  ;;  %v3978_v25 = vsel %vm1464_vm0, %v3975_v63, %v3977_v42 }
  0x91   : > { %v3799_v20 = vmax.f32 %v3623_v38, %v3690_v4  ;;  %v2159_v30 = vmax.f32 %v2119_v44, %v6130_v5  ;;  %v6457_v43 = vmax.f32 %v3337_v31, %v6316_v17  ;;  %v8582_v55 = vmax.f32 %v8580_v50, %v8581_v52 }
  0x92   : > { %v3942_v18 = vmax.f32 %v3798_v27, %v3832_v40  ;;  %v8585_v45 = vmax.f32 %v8583_v61, %v8584_v13  ;;  %v2120_v14 = vmax.f32 %v6136_v35, %v6128_v22  ;;  %v2198_v7 = vmax.f32 %v2158_v54, %v6136_v35 }
  0x93   : > { %v665_v3 = vmax.f32 %v8582_v55, %v6444_v2  ;;  %v3943_v26 = vmax.f32 %v3799_v20, %v3834_v53  ;;  %v2199_v15 = vmax.f32 %v2159_v30, %v6138_v49  ;;  %v3401_v37 = vmax.f32 %v6457_v43, %v6399_v24  ;;  %v6568_v43 = vld [vmem:[%s5719_s28 + $0x70] sm:$0xff] }
  0x94   : > { %v666_v6 = vmax.f32 %v8585_v45, %v6447_v32  ;;  %v4086_v62 = vmax.f32 %v3942_v18, %v3976_v21  ;;  %v2121_v59 = vmax.f32 %v6138_v49, %v6130_v5  ;;  %v2238_v44 = vmax.f32 %v2198_v7, %v6433_v10 }
  0x95   : > { %v772_v11 = vrot.slane %v665_v3, 6  ;;  %v4087_v12 = vmax.f32 %v3943_v26, %v3978_v25  ;;  %v2239_v31 = vmax.f32 %v2199_v15, %v6441_v9  ;;  %v6482_v41 = vmax.f32 %v2120_v14, %v6132_v29 }
  0x96   : > { %v773_v19 = vrot.slane %v666_v6, 6  ;;  %5363 = vmatmul.msk.f32.vlgmr.msra.gmra.mxu3 %vm1683_vm4, %v4086_v62  ;;  %v6495_v63 = vmax.f32 %v2121_v59, %v6134_v58  ;;  %v2323_v38 = vrot.slane %v2238_v44, 6  ;;  %5266 = vmatmul.msk.f32.gmra.mxu0 %vm1683_vm4, %v6128_v22  ;;  %v6560_v39 = vmax.f32 %v3338_v48, %v6325_v33 }
  0x97   : > { %v6489_v8 = vsel %vm741_vm1, -inf, %v772_v11  ;;  %v2324_v1 = vrot.slane %v2239_v31, 6  ;;  %5333 = vmatmul.msk.f32.gmra.mxu2 %vm1683_vm4, %v6335_v0  ;;  %5299 = vmatmul.msk.f32.gmra.mxu1 %vm1683_vm4, %v5589_v56  ;;  %v6573_v56 = vld [vmem:[%s5719_s28 + $0x58] sm:$0xff] }
  0x98   : > { %v6486_v36 = vsel %vm741_vm1, %v772_v11, %v773_v19  ;;  %v6492_v57 = vsel %vm741_vm1, %v773_v19, -inf  ;;  %v954_v60 = vmax.f32 %v665_v3, %v6489_v8  ;;  %v1081_v23 = vrot.slane %v6489_v8, 1 }
  0x99   : > { %v955_v42 = vmax.f32 %v666_v6, %v6486_v36  ;;  %v1082_v51 = vrot.slane %v6486_v36, 1  ;;  %v1084_v40 = vrot.slane %v6492_v57, 1  ;;  %v1298_v21 = vrot.slane %v6489_v8, 3 }
  0x9a   : > { %v2325_v27 = vsel %vm741_vm1, %v2323_v38, %v2324_v1  ;;  %v2433_v4 = vsel %vm741_vm1, -inf, %v2323_v38  ;;  %v2453_v53 = vsel %vm741_vm1, %v2324_v1, -inf  ;;  %v1299_v25 = vrot.slane %v6486_v36, 3 }
  0x9b   : > { %v2478_v20 = vmax.f32 %v2238_v44, %v2433_v4  ;;  %v2479_v54 = vmax.f32 %v2239_v31, %v2325_v27  ;;  %v2573_v30 = vrot.slane %v2433_v4, 1  ;;  %v2574_v18 = vrot.slane %v2325_v27, 1 }
  0x9c   : > { %v2576_v50 = vrot.slane %v2453_v53, 1  ;;  %v2753_v52 = vrot.slane %v2433_v4, 3  ;;  %v2754_v55 = vrot.slane %v2325_v27, 3  ;;  %v2756_v3 = vrot.slane %v2453_v53, 3 }
  0x9d   : > { %v2575_v61 = vsel %vm1030_vm2, %v2573_v30, %v2574_v18  ;;  %v2933_v13 = vrot.slane %v2433_v4, 4  ;;  %v2934_v45 = vrot.slane %v2325_v27, 4  ;;  %v2936_v6 = vrot.slane %v2453_v53, 4 }
  0x9e   : > { %v2577_v14 = vsel %vm1030_vm2, %v2574_v18, %v2576_v50  ;;  %v2698_v26 = vmax.f32 %v2478_v20, %v2575_v61  ;;  %v2755_v22 = vsel %vm1247_vm3, %v2753_v52, %v2754_v55  ;;  %v2757_v7 = vsel %vm1247_vm3, %v2754_v55, %v2756_v3  ;;  %5364 = vmatmul.msk.f32.gmra.mxu3 %vm1683_vm4, %v4087_v12  ;;  %v6565_v18 = vld [vmem:[%s5719_s28 + $0x50] sm:$0xff] }
  0x9f   : > { %v2699_v15 = vmax.f32 %v2479_v54, %v2577_v14  ;;  %v2935_v62 = vsel %vm1464_vm0, %v2933_v13, %v2934_v45  ;;  %v2937_v11 = vsel %vm1464_vm0, %v2934_v45, %v2936_v6  ;;  %v1083_v19 = vsel %vm1030_vm2, %v1081_v23, %v1082_v51  ;;  %5334 = vmatmul.msk.f32.gmra.mxu2 %vm1683_vm4, %v6399_v24  ;;  %v6589_v13 = vld [vmem:[%s5719_s28 + $0x60] sm:$0xff]  ;;  %v6595_v6 = vld [vmem:[%s5719_s28 + $0x68] sm:$0xff] }
  0xa0   : > { %v2878_v59 = vmax.f32 %v2698_v26, %v2755_v22  ;;  %v1085_v44 = vsel %vm1030_vm2, %v1082_v51, %v1084_v40  ;;  %v1219_v31 = vmax.f32 %v954_v60, %v1083_v19  ;;  %v1300_v38 = vsel %vm1247_vm3, %v1298_v21, %v1299_v25  ;;  %5267 = vmatmul.msk.f32.gmra.mxu0 %vm1683_vm4, %v6130_v5  ;;  %v5590_v21 = vld [vmem:[%s5719_s28 + $0x28] sm:$0xff] }
  0xa1   : > { %v2879_v1 = vmax.f32 %v2699_v15, %v2757_v7  ;;  %v1220_v27 = vmax.f32 %v955_v42, %v1085_v44  ;;  %v1301_v4 = vrot.slane %v6492_v57, 3  ;;  %v1515_v12 = vrot.slane %v6489_v8, 4  ;;  %5300 = vmatmul.msk.f32.gmra.mxu1 %vm1683_vm4, %v5590_v21 }
  0xa2   : > { %v6527_v53 = vmax.f32 %v2878_v59, %v2935_v62  ;;  %v1436_v20 = vmax.f32 %v1219_v31, %v1300_v38  ;;  %v1516_v23 = vrot.slane %v6486_v36, 4  ;;  %v1518_v51 = vrot.slane %v6492_v57, 4 }
  0xa3   : > { %v6533_v60 = vmax.f32 %v2879_v1, %v2937_v11  ;;  %v1302_v42 = vsel %vm1247_vm3, %v1299_v25, %v1301_v4  ;;  %v2200_v8 = vmax.f32 %v6482_v41, %v6433_v10  ;;  %v2201_v40 = vmax.f32 %v6495_v63, %v6441_v9 }
  0xa4   : > { %v3432_v5 = vmax.f32 %v3400_v47, %v6527_v53  ;;  %v1437_v36 = vmax.f32 %v1220_v27, %v1302_v42  ;;  %v1517_v57 = vsel %vm1464_vm0, %v1515_v12, %v1516_v23  ;;  %v1519_v25 = vsel %vm1464_vm0, %v1516_v23, %v1518_v51  ;;  %v5597_v27 = vld [vmem:[%s5719_s28 + $0x30] sm:$0xff] }
  0xa5   : > { %v3433_v41 = vmax.f32 %v3401_v37, %v6533_v60  ;;  %v6552_v63 = vmax.f32 %v1436_v20, %v1517_v57  ;;  %v3339_v54 = vmax.f32 %v6399_v24, %v6316_v17  ;;  %v523_v37 = vmax.f32 %v6568_v43, %v6565_v18  ;;  %v6576_v17 = vld [vmem:[%s5719_s28 + $0x78] sm:$0xff] }
  0xa6   : > { %v3497_v47 = vrot.slane %v3432_v5, 6  ;;  %v6562_v30 = vmax.f32 %v1437_v36, %v1519_v25  ;;  %v524_v46 = vmax.f32 %v6576_v17, %v6573_v56  ;;  %v3402_v55 = vmax.f32 %v6560_v39, %v6527_v53 }
  0xa7   : > { %v3498_v48 = vrot.slane %v3433_v41, 6  ;;  %v2240_v50 = vmax.f32 %v2200_v8, %v6552_v63  ;;  %v6582_v52 = vmax.f32 %v3339_v54, %v6397_v16  ;;  %v6592_v45 = vmax.f32 %v523_v37, %v6589_v13  ;;  %5335 = vmatmul.msk.f32.gmra.mxu2 %vm1683_vm4, %v6527_v53 }
  0xa8   : > { %v3591_v3 = vsel %vm741_vm1, -inf, %v3497_v47  ;;  %v2241_v61 = vmax.f32 %v2201_v40, %v6562_v30  ;;  %v6598_v14 = vmax.f32 %v524_v46, %v6595_v6  ;;  %5268 = vmatmul.msk.f32.gmra.mxu0 %vm1683_vm4, %v6132_v29 }
  0xa9   : > { %v3499_v26 = vsel %vm741_vm1, %v3497_v47, %v3498_v48  ;;  %v3624_v22 = vmax.f32 %v3432_v5, %v3591_v3  ;;  %v3691_v7 = vrot.slane %v3591_v3, 1  ;;  %v3835_v15 = vrot.slane %v3591_v3, 3  ;;  %5301 = vmatmul.msk.f32.gmra.mxu1 %vm1683_vm4, %v5597_v27 }
  0xaa   : > { %v3692_v62 = vrot.slane %v3499_v26, 1  ;;  %v3836_v11 = vrot.slane %v3499_v26, 3  ;;  %v3979_v19 = vrot.slane %v3591_v3, 4  ;;  %v3980_v59 = vrot.slane %v3499_v26, 4 }
  0xab   : > { %v3607_v44 = vsel %vm741_vm1, %v3498_v48, -inf  ;;  %v3625_v31 = vmax.f32 %v3433_v41, %v3499_v26  ;;  %v2326_v38 = vrot.slane %v2240_v50, 6  ;;  %v2327_v1 = vrot.slane %v2241_v61, 6 }
  0xac   : > { %v3693_v4 = vsel %vm1030_vm2, %v3691_v7, %v3692_v62  ;;  %v3837_v12 = vsel %vm1247_vm3, %v3835_v15, %v3836_v11  ;;  %v3981_v20 = vsel %vm1464_vm0, %v3979_v19, %v3980_v59  ;;  %v3694_v23 = vrot.slane %v3607_v44, 1 }
  0xad   : > { %v3800_v51 = vmax.f32 %v3624_v22, %v3693_v4  ;;  %v3838_v42 = vrot.slane %v3607_v44, 3  ;;  %v3982_v8 = vrot.slane %v3607_v44, 4  ;;  %v2328_v40 = vsel %vm741_vm1, %v2326_v38, %v2327_v1 }
  0xae   : > { %v3695_v21 = vsel %vm1030_vm2, %v3692_v62, %v3694_v23  ;;  %v2434_v5 = vsel %vm741_vm1, -inf, %v2326_v38  ;;  %v2454_v36 = vsel %vm741_vm1, %v2327_v1, -inf  ;;  %v2481_v57 = vmax.f32 %v2241_v61, %v2328_v40  ;;  %v5598_v23 = vld [vmem:[%s5719_s28 + $0x38] sm:$0xff] }
  0xaf   : > { %v3944_v25 = vmax.f32 %v3800_v51, %v3837_v12  ;;  %v3801_v41 = vmax.f32 %v3625_v31, %v3695_v21  ;;  %v3839_v54 = vsel %vm1247_vm3, %v3836_v11, %v3838_v42  ;;  %v3983_v47 = vsel %vm1464_vm0, %v3980_v59, %v3982_v8  ;;  %5336 = vmatmul.msk.f32.gmra.mxu2 %vm1683_vm4, %v6533_v60  ;;  %v6629_v12 = vld [vmem:[%s5719_s28 + $0x90] sm:$0xff] }
  0xb0   : > { %v2480_v37 = vmax.f32 %v2240_v50, %v2434_v5  ;;  %v2578_v46 = vrot.slane %v2434_v5, 1  ;;  %v2579_v48 = vrot.slane %v2328_v40, 1  ;;  %v2581_v3 = vrot.slane %v2454_v36, 1  ;;  %5269 = vmatmul.msk.f32.gmra.mxu0 %vm1683_vm4, %v6134_v58 }
  0xb1   : > { %v4088_v26 = vmax.f32 %v3944_v25, %v3981_v20  ;;  %v3945_v22 = vmax.f32 %v3801_v41, %v3839_v54  ;;  %v2758_v7 = vrot.slane %v2434_v5, 3  ;;  %v2759_v15 = vrot.slane %v2328_v40, 3  ;;  %v6632_v20 = vld [vmem:[%s5719_s28 + $0x98] sm:$0xff]  ;;  %5302 = vmatmul.msk.f32.gmra.mxu1 %vm1683_vm4, %v5598_v23 }
  0xb2   : > { %v2580_v61 = vsel %vm1030_vm2, %v2578_v46, %v2579_v48  ;;  %v2582_v62 = vsel %vm1030_vm2, %v2579_v48, %v2581_v3  ;;  %v2761_v11 = vrot.slane %v2454_v36, 3  ;;  %v2938_v19 = vrot.slane %v2434_v5, 4 }
  0xb3   : > { %5365 = vmatmul.msk.f32.gmra.mxu3 %vm1683_vm4, %v4088_v26  ;;  %v4089_v50 = vmax.f32 %v3945_v22, %v3983_v47  ;;  %v2700_v59 = vmax.f32 %v2480_v37, %v2580_v61  ;;  %v2701_v44 = vmax.f32 %v2481_v57, %v2582_v62  ;;  %v2760_v31 = vsel %vm1247_vm3, %v2758_v7, %v2759_v15 }
  0xb4   : > { %v2762_v38 = vsel %vm1247_vm3, %v2759_v15, %v2761_v11  ;;  %v2939_v1 = vrot.slane %v2328_v40, 4  ;;  %v2941_v27 = vrot.slane %v2454_v36, 4  ;;  %v3403_v4 = vmax.f32 %v6582_v52, %v6533_v60 }
  0xb5   : > { %v2880_v51 = vmax.f32 %v2700_v59, %v2760_v31  ;;  %v2881_v42 = vmax.f32 %v2701_v44, %v2762_v38  ;;  %v619_v8 = vmax.f32 %v6592_v45, %v6444_v2  ;;  %v620_v21 = vmax.f32 %v6598_v14, %v6447_v32 }
  0xb6   : > { %v2940_v40 = vsel %vm1464_vm0, %v2938_v19, %v2939_v1  ;;  %v2942_v5 = vsel %vm1464_vm0, %v2939_v1, %v2941_v27  ;;  %v2122_v52 = vmax.f32 %v6433_v10, %v6132_v29  ;;  %v2123_v36 = vmax.f32 %v6441_v9, %v6134_v58  ;;  %v5599_v19 = vld [vmem:[%s5719_s28 + $0x40] sm:$0xff] }
  0xb7   : > { %v6646_v57 = vmax.f32 %v2880_v51, %v2940_v40  ;;  %v6648_v25 = vmax.f32 %v2881_v42, %v2942_v5  ;;  %v667_v41 = vmax.f32 %v619_v8, %v6629_v12  ;;  %v6652_v45 = vmax.f32 %v620_v21, %v6632_v20 }
  0xb8   : > { %v6655_v14 = vmax.f32 %v2122_v52, %v6136_v35  ;;  %v6658_v54 = vmax.f32 %v2123_v36, %v6138_v49  ;;  %v3340_v29 = vmax.f32 %v6527_v53, %v6325_v33  ;;  %v3341_v58 = vmax.f32 %v6533_v60, %v6397_v16  ;;  %5270 = vmatmul.msk.f32.gmra.mxu0 %vm1683_vm4, %v6136_v35 }
  0xb9   : > { %v3434_v47 = vmax.f32 %v3402_v55, %v6646_v57  ;;  %v3435_v37 = vmax.f32 %v3403_v4, %v6648_v25  ;;  %v775_v46 = vrot.slane %v667_v41, 6  ;;  %v776_v48 = vrot.slane %v6652_v45, 6  ;;  %5337 = vmatmul.msk.f32.gmra.mxu2 %vm1683_vm4, %v6646_v57  ;;  %5303 = vmatmul.msk.f32.gmra.mxu1 %vm1683_vm4, %v5599_v19 }
  0xba   : > { %v2202_v33 = vmax.f32 %v6655_v14, %v6552_v63  ;;  %v2203_v16 = vmax.f32 %v6658_v54, %v6562_v30  ;;  %v6677_v3 = vmax.f32 %v3340_v29, %v6335_v0  ;;  %v6680_v39 = vmax.f32 %v3341_v58, %v6399_v24 }
  0xbb   : > { %5366 = vmatmul.msk.f32.gmra.mxu3 %vm1683_vm4, %v4089_v50  ;;  %v3500_v55 = vrot.slane %v3434_v47, 6  ;;  %v3501_v26 = vrot.slane %v3435_v37, 6  ;;  %v777_v22 = vsel %vm741_vm1, %v775_v46, %v776_v48  ;;  %v897_v7 = vsel %vm741_vm1, -inf, %v775_v46 }
  0xbc   : > { %v921_v15 = vsel %vm741_vm1, %v776_v48, -inf  ;;  %v956_v61 = vmax.f32 %v667_v41, %v897_v7  ;;  %v957_v62 = vmax.f32 %v6652_v45, %v777_v22  ;;  %v1086_v11 = vrot.slane %v897_v7, 1 }
  0xbd   : > { %v3502_v59 = vsel %vm741_vm1, %v3500_v55, %v3501_v26  ;;  %v3592_v44 = vsel %vm741_vm1, -inf, %v3500_v55  ;;  %v3608_v50 = vsel %vm741_vm1, %v3501_v26, -inf  ;;  %v1087_v31 = vrot.slane %v777_v22, 1 }
  0xbe   : > { %v3626_v38 = vmax.f32 %v3434_v47, %v3592_v44  ;;  %v3696_v1 = vrot.slane %v3592_v44, 1  ;;  %v3697_v27 = vrot.slane %v3502_v59, 1  ;;  %v3840_v4 = vrot.slane %v3592_v44, 3 }
  0xbf   : > { %v3841_v23 = vrot.slane %v3502_v59, 3  ;;  %v3984_v51 = vrot.slane %v3592_v44, 4  ;;  %v3985_v42 = vrot.slane %v3502_v59, 4  ;;  %v3627_v8 = vmax.f32 %v3435_v37, %v3502_v59 }
  0xc0   : > { %v3698_v21 = vsel %vm1030_vm2, %v3696_v1, %v3697_v27  ;;  %v3699_v40 = vrot.slane %v3608_v50, 1  ;;  %v3843_v5 = vrot.slane %v3608_v50, 3  ;;  %v3987_v52 = vrot.slane %v3608_v50, 4  ;;  %5271 = vmatmul.msk.f32.gmra.mxu0 %vm1683_vm4, %v6138_v49 }
  0xc1   : > { %v3802_v36 = vmax.f32 %v3626_v38, %v3698_v21  ;;  %v3842_v41 = vsel %vm1247_vm3, %v3840_v4, %v3841_v23  ;;  %v3986_v45 = vsel %vm1464_vm0, %v3984_v51, %v3985_v42  ;;  %v1088_v29 = vsel %vm1030_vm2, %v1086_v11, %v1087_v31  ;;  %5338 = vmatmul.msk.f32.gmra.mxu2 %vm1683_vm4, %v6648_v25  ;;  %v5600_v38 = vld [vmem:[%s5719_s28 + $0x48] sm:$0xff] }
  0xc2   : > { %v3700_v58 = vsel %vm1030_vm2, %v3697_v27, %v3699_v40  ;;  %v3844_v47 = vsel %vm1247_vm3, %v3841_v23, %v3843_v5  ;;  %v3988_v37 = vsel %vm1464_vm0, %v3985_v42, %v3987_v52  ;;  %v1089_v46 = vrot.slane %v921_v15, 1  ;;  %5304 = vmatmul.msk.f32.gmra.mxu1 %vm1683_vm4, %v5600_v38 }
  0xc3   : > { %v3946_v48 = vmax.f32 %v3802_v36, %v3842_v41  ;;  %v3803_v55 = vmax.f32 %v3627_v8, %v3700_v58  ;;  %v1221_v26 = vmax.f32 %v956_v61, %v1088_v29  ;;  %v1303_v19 = vrot.slane %v897_v7, 3 }
  0xc4   : > { %v1090_v59 = vsel %vm1030_vm2, %v1087_v31, %v1089_v46  ;;  %v1304_v11 = vrot.slane %v777_v22, 3  ;;  %v1306_v44 = vrot.slane %v921_v15, 3  ;;  %v1520_v50 = vrot.slane %v897_v7, 4  ;;  %v6746_v46 = vld [vmem:[%s5719_s28 + $0xa0] sm:$0xff] }
  0xc5   : > { %v4090_v1 = vmax.f32 %v3946_v48, %v3986_v45  ;;  %v3947_v27 = vmax.f32 %v3803_v55, %v3844_v47  ;;  %v1222_v4 = vmax.f32 %v957_v62, %v1090_v59  ;;  %v1521_v23 = vrot.slane %v777_v22, 4  ;;  %v6749_v48 = vld [vmem:[%s5719_s28 + $0xa8] sm:$0xff] }
  0xc6   : > { %v1305_v51 = vsel %vm1247_vm3, %v1303_v19, %v1304_v11  ;;  %v1307_v42 = vsel %vm1247_vm3, %v1304_v11, %v1306_v44  ;;  %v1523_v21 = vrot.slane %v921_v15, 4  ;;  %v3404_v61 = vmax.f32 %v6677_v3, %v6646_v57 }
  0xc7   : > { %5367 = vmatmul.msk.f32.gmra.mxu3 %vm1683_vm4, %v4090_v1  ;;  %v4091_v31 = vmax.f32 %v3947_v27, %v3988_v37  ;;  %v1438_v8 = vmax.f32 %v1221_v26, %v1305_v51  ;;  %v1439_v7 = vmax.f32 %v1222_v4, %v1307_v42  ;;  %v1522_v40 = vsel %vm1464_vm0, %v1520_v50, %v1521_v23 }
  0xc8   : > { %v1524_v5 = vsel %vm1464_vm0, %v1521_v23, %v1523_v21  ;;  %v3405_v22 = vmax.f32 %v6680_v39, %v6648_v25  ;;  %v525_v15 = vmax.f32 %v6444_v2, %v6589_v13  ;;  %v526_v62 = vmax.f32 %v6447_v32, %v6595_v6  ;;  %5272 = vmatmul.msk.f32.gmra.mxu0 %vm1683_vm4, %v6433_v10 }
  0xc9   : > { %v6721_v52 = vmax.f32 %v1438_v8, %v1522_v40  ;;  %v6723_v36 = vmax.f32 %v1439_v7, %v1524_v5  ;;  %v2124_v41 = vmax.f32 %v6552_v63, %v6136_v35  ;;  %v2125_v45 = vmax.f32 %v6562_v30, %v6138_v49 }
  0xca   : > { %v573_v29 = vmax.f32 %v525_v15, %v6568_v43  ;;  %v574_v58 = vmax.f32 %v526_v62, %v6576_v17  ;;  %v527_v47 = vmax.f32 %v6629_v12, %v6568_v43  ;;  %v528_v37 = vmax.f32 %v6632_v20, %v6576_v17  ;;  %5305 = vmatmul.msk.f32.gmra.mxu1 %vm1683_vm4, %v6565_v18 }
  0xcb   : > { %v2242_v35 = vmax.f32 %v2202_v33, %v6721_v52  ;;  %v2243_v49 = vmax.f32 %v2203_v16, %v6723_v36  ;;  %v6752_v55 = vmax.f32 %v2124_v41, %v6433_v10  ;;  %v6755_v26 = vmax.f32 %v2125_v45, %v6441_v9 }
  0xcc   : > { %v621_v19 = vmax.f32 %v573_v29, %v6629_v12  ;;  %v622_v14 = vmax.f32 %v574_v58, %v6632_v20  ;;  %v575_v33 = vmax.f32 %v527_v47, %v6444_v2  ;;  %v6761_v59 = vmax.f32 %v528_v37, %v6447_v32  ;;  %v6789_v47 = vld [vmem:[%s5719_s28 + $0xb0] sm:$0xff] }
  0xcd   : > { %v2329_v54 = vrot.slane %v2242_v35, 6  ;;  %v2330_v16 = vrot.slane %v2243_v49, 6  ;;  %v2204_v11 = vmax.f32 %v6752_v55, %v6721_v52  ;;  %v2205_v44 = vmax.f32 %v6755_v26, %v6723_v36 }
  0xce   : > { %v669_v50 = vmax.f32 %v621_v19, %v6746_v46  ;;  %v6771_v38 = vmax.f32 %v622_v14, %v6749_v48  ;;  %v3342_v32 = vmax.f32 %v6646_v57, %v6335_v0  ;;  %v3343_v1 = vmax.f32 %v6648_v25, %v6399_v24 }
  0xcf   : > { %5368 = vmatmul.msk.f32.gmra.mxu3 %vm1683_vm4, %v4091_v31  ;;  %v2331_v18 = vsel %vm741_vm1, %v2329_v54, %v2330_v16  ;;  %v2435_v27 = vsel %vm741_vm1, -inf, %v2329_v54  ;;  %v2455_v4 = vsel %vm741_vm1, %v2330_v16, -inf  ;;  %v623_v23 = vmax.f32 %v575_v33, %v6746_v46 }
  0xd0   : > { %v2482_v51 = vmax.f32 %v2242_v35, %v2435_v27  ;;  %v2483_v42 = vmax.f32 %v2243_v49, %v2331_v18  ;;  %v2583_v21 = vrot.slane %v2435_v27, 1  ;;  %v2584_v8 = vrot.slane %v2331_v18, 1  ;;  %5273 = vmatmul.msk.f32.gmra.mxu0 %vm1683_vm4, %v6441_v9 }
  0xd1   : > { %v2586_v7 = vrot.slane %v2455_v4, 1  ;;  %v2763_v0 = vrot.slane %v2435_v27, 3  ;;  %v2764_v40 = vrot.slane %v2331_v18, 3  ;;  %v2766_v5 = vrot.slane %v2455_v4, 3 }
  0xd2   : > { %v2585_v24 = vsel %vm1030_vm2, %v2583_v21, %v2584_v8  ;;  %v2943_v31 = vrot.slane %v2435_v27, 4  ;;  %v2944_v15 = vrot.slane %v2331_v18, 4  ;;  %v2946_v62 = vrot.slane %v2455_v4, 4  ;;  %5306 = vmatmul.msk.f32.gmra.mxu1 %vm1683_vm4, %v6573_v56 }
  0xd3   : > { %v2587_v41 = vsel %vm1030_vm2, %v2584_v8, %v2586_v7  ;;  %v2702_v45 = vmax.f32 %v2482_v51, %v2585_v24  ;;  %v2765_v29 = vsel %vm1247_vm3, %v2763_v0, %v2764_v40  ;;  %v2767_v58 = vsel %vm1247_vm3, %v2764_v40, %v2766_v5 }
  0xd4   : > { %v2703_v37 = vmax.f32 %v2483_v42, %v2587_v41  ;;  %v2945_v35 = vsel %vm1464_vm0, %v2943_v31, %v2944_v15  ;;  %v2947_v49 = vsel %vm1464_vm0, %v2944_v15, %v2946_v62  ;;  %v778_v19 = vrot.slane %v669_v50, 6 }
  0xd5   : > { %v2882_v14 = vmax.f32 %v2702_v45, %v2765_v29  ;;  %v779_v33 = vrot.slane %v6771_v38, 6  ;;  %v6797_v54 = vmax.f32 %v3342_v32, %v6527_v53  ;;  %v6800_v16 = vmax.f32 %v3343_v1, %v6533_v60 }
  0xd6   : > { %v2883_v18 = vmax.f32 %v2703_v37, %v2767_v58  ;;  %v898_v27 = vsel %vm741_vm1, -inf, %v778_v19  ;;  %v624_v4 = vmax.f32 %v6761_v59, %v6749_v48  ;;  %v6806_v51 = vmax.f32 %v623_v23, %v6789_v47 }
  0xd7   : > { %v6808_v42 = vmax.f32 %v2882_v14, %v2945_v35  ;;  %v780_v56 = vsel %vm741_vm1, %v778_v19, %v779_v33  ;;  %v922_v21 = vsel %vm741_vm1, %v779_v33, -inf  ;;  %v958_v32 = vmax.f32 %v669_v50, %v898_v27 }
  0xd8   : > { %v6812_v8 = vmax.f32 %v2883_v18, %v2947_v49  ;;  %v959_v1 = vmax.f32 %v6771_v38, %v780_v56  ;;  %v1091_v7 = vrot.slane %v898_v27, 1  ;;  %v1092_v0 = vrot.slane %v780_v56, 1  ;;  %5274 = vmatmul.msk.f32.gmra.mxu0 %vm1683_vm4, %v6552_v63 }
  0xd9   : > { %v3436_v40 = vmax.f32 %v3404_v61, %v6808_v42  ;;  %v1094_v23 = vrot.slane %v922_v21, 1  ;;  %v1308_v5 = vrot.slane %v898_v27, 3  ;;  %v1309_v24 = vrot.slane %v780_v56, 3  ;;  %5339 = vmatmul.msk.f32.gmra.mxu2 %vm1683_vm4, %v6808_v42 }
  0xda   : > { %v3437_v50 = vmax.f32 %v3405_v22, %v6812_v8  ;;  %v1093_v38 = vsel %vm1030_vm2, %v1091_v7, %v1092_v0  ;;  %v1311_v31 = vrot.slane %v922_v21, 3  ;;  %v1525_v15 = vrot.slane %v898_v27, 4  ;;  %5307 = vmatmul.msk.f32.gmra.mxu1 %vm1683_vm4, %v6589_v13 }
  0xdb   : > { %v3503_v3 = vrot.slane %v3436_v40, 6  ;;  %v1095_v61 = vsel %vm1030_vm2, %v1092_v0, %v1094_v23  ;;  %v1223_v62 = vmax.f32 %v958_v32, %v1093_v38  ;;  %v1310_v41 = vsel %vm1247_vm3, %v1308_v5, %v1309_v24 }
  0xdc   : > { %v3504_v45 = vrot.slane %v3437_v50, 6  ;;  %v1224_v29 = vmax.f32 %v959_v1, %v1095_v61  ;;  %v1312_v58 = vsel %vm1247_vm3, %v1309_v24, %v1311_v31  ;;  %v1526_v37 = vrot.slane %v780_v56, 4 }
  0xdd   : > { %v3593_v39 = vsel %vm741_vm1, -inf, %v3503_v3  ;;  %v1440_v22 = vmax.f32 %v1223_v62, %v1310_v41  ;;  %v1528_v35 = vrot.slane %v922_v21, 4  ;;  %v3406_v49 = vmax.f32 %v6797_v54, %v6808_v42  ;;  %v6846_v62 = vld [vmem:[%s5719_s28 + $0xb8] sm:$0xff] }
  0xde   : > { %v3505_v19 = vsel %vm741_vm1, %v3503_v3, %v3504_v45  ;;  %v3628_v14 = vmax.f32 %v3436_v40, %v3593_v39  ;;  %v3701_v33 = vrot.slane %v3593_v39, 1  ;;  %v3845_v18 = vrot.slane %v3593_v39, 3 }
  0xdf   : > { %v3702_v27 = vrot.slane %v3505_v19, 1  ;;  %v3846_v32 = vrot.slane %v3505_v19, 3  ;;  %v3989_v1 = vrot.slane %v3593_v39, 4  ;;  %v3990_v56 = vrot.slane %v3505_v19, 4 }
  0xe0   : > { %v3609_v7 = vsel %vm741_vm1, %v3504_v45, -inf  ;;  %v3629_v13 = vmax.f32 %v3437_v50, %v3505_v19  ;;  %v1441_v0 = vmax.f32 %v1224_v29, %v1312_v58  ;;  %v1527_v23 = vsel %vm1464_vm0, %v1525_v15, %v1526_v37  ;;  %5275 = vmatmul.msk.f32.gmra.mxu0 %vm1683_vm4, %v6562_v30 }
  0xe1   : > { %v3703_v21 = vsel %vm1030_vm2, %v3701_v33, %v3702_v27  ;;  %v3847_v5 = vsel %vm1247_vm3, %v3845_v18, %v3846_v32  ;;  %v3991_v24 = vsel %vm1464_vm0, %v3989_v1, %v3990_v56  ;;  %v3704_v40 = vrot.slane %v3609_v7, 1  ;;  %5340 = vmatmul.msk.f32.gmra.mxu2 %vm1683_vm4, %v6812_v8 }
  0xe2   : > { %v3804_v38 = vmax.f32 %v3628_v14, %v3703_v21  ;;  %v3848_v31 = vrot.slane %v3609_v7, 3  ;;  %v3992_v3 = vrot.slane %v3609_v7, 4  ;;  %v1529_v61 = vsel %vm1464_vm0, %v1526_v37, %v1528_v35  ;;  %5308 = vmatmul.msk.f32.gmra.mxu1 %vm1683_vm4, %v6595_v6 }
  0xe3   : > { %v3705_v50 = vsel %vm1030_vm2, %v3702_v27, %v3704_v40  ;;  %v6851_v15 = vmax.f32 %v1440_v22, %v1527_v23  ;;  %v6853_v41 = vmax.f32 %v1441_v0, %v1529_v61  ;;  %v3407_v45 = vmax.f32 %v6800_v16, %v6812_v8 }
  0xe4   : > { %v3948_v29 = vmax.f32 %v3804_v38, %v3847_v5  ;;  %v3805_v58 = vmax.f32 %v3629_v13, %v3705_v50  ;;  %v3849_v39 = vsel %vm1247_vm3, %v3846_v32, %v3848_v31  ;;  %v3993_v37 = vsel %vm1464_vm0, %v3990_v56, %v3992_v3 }
  0xe5   : > { %v2244_v22 = vmax.f32 %v2204_v11, %v6851_v15  ;;  %v2245_v35 = vmax.f32 %v2205_v44, %v6853_v41  ;;  %v672_v19 = vmax.f32 %v624_v4, %v6846_v62  ;;  %v781_v14 = vrot.slane %v6806_v51, 6 }
  0xe6   : > { %v4092_v33 = vmax.f32 %v3948_v29, %v3991_v24  ;;  %v3949_v18 = vmax.f32 %v3805_v58, %v3849_v39  ;;  %v2126_v6 = vmax.f32 %v6721_v52, %v6433_v10  ;;  %v2127_v55 = vmax.f32 %v6723_v36, %v6441_v9 }
  0xe7   : > { %v2332_v11 = vrot.slane %v2244_v22, 6  ;;  %v2333_v27 = vrot.slane %v2245_v35, 6  ;;  %v782_v32 = vrot.slane %v672_v19, 6  ;;  %v899_v26 = vsel %vm741_vm1, -inf, %v781_v14 }
  0xe8   : > { %5369 = vmatmul.msk.f32.gmra.mxu3 %vm1683_vm4, %v4092_v33  ;;  %v4093_v44 = vmax.f32 %v3949_v18, %v3993_v37  ;;  %v960_v59 = vmax.f32 %v6806_v51, %v899_v26  ;;  %v1096_v4 = vrot.slane %v899_v26, 1  ;;  %v1313_v1 = vrot.slane %v899_v26, 3  ;;  %5276 = vmatmul.msk.f32.gmra.mxu0 %vm1683_vm4, %v6721_v52 }
  0xe9   : > { %v2334_v56 = vsel %vm741_vm1, %v2332_v11, %v2333_v27  ;;  %v2436_v7 = vsel %vm741_vm1, -inf, %v2332_v11  ;;  %v2456_v13 = vsel %vm741_vm1, %v2333_v27, -inf  ;;  %v783_v0 = vsel %vm741_vm1, %v781_v14, %v782_v32 }
  0xea   : > { %v2484_v23 = vmax.f32 %v2244_v22, %v2436_v7  ;;  %v2485_v21 = vmax.f32 %v2245_v35, %v2334_v56  ;;  %v2588_v5 = vrot.slane %v2436_v7, 1  ;;  %v2589_v24 = vrot.slane %v2334_v56, 1  ;;  %5309 = vmatmul.msk.f32.gmra.mxu1 %vm1683_vm4, %v6568_v43 }
  0xeb   : > { %v2591_v40 = vrot.slane %v2456_v13, 1  ;;  %v2768_v38 = vrot.slane %v2436_v7, 3  ;;  %v2769_v51 = vrot.slane %v2334_v56, 3  ;;  %v2771_v31 = vrot.slane %v2456_v13, 3 }
  0xec   : > { %v2590_v3 = vsel %vm1030_vm2, %v2588_v5, %v2589_v24  ;;  %v2948_v61 = vrot.slane %v2436_v7, 4  ;;  %v2949_v50 = vrot.slane %v2334_v56, 4  ;;  %v2951_v29 = vrot.slane %v2456_v13, 4 }
  0xed   : > { %v2592_v58 = vsel %vm1030_vm2, %v2589_v24, %v2591_v40  ;;  %v2704_v39 = vmax.f32 %v2484_v23, %v2590_v3  ;;  %v2770_v37 = vsel %vm1247_vm3, %v2768_v38, %v2769_v51  ;;  %v2772_v22 = vsel %vm1247_vm3, %v2769_v51, %v2771_v31 }
  0xee   : > { %v2705_v35 = vmax.f32 %v2485_v21, %v2592_v58  ;;  %v2950_v14 = vsel %vm1464_vm0, %v2948_v61, %v2949_v50  ;;  %v2952_v33 = vsel %vm1464_vm0, %v2949_v50, %v2951_v29  ;;  %v923_v18 = vsel %vm741_vm1, %v782_v32, -inf }
  0xef   : > { %v2884_v11 = vmax.f32 %v2704_v39, %v2770_v37  ;;  %v961_v27 = vmax.f32 %v672_v19, %v783_v0  ;;  %v1097_v56 = vrot.slane %v783_v0, 1  ;;  %v1099_v7 = vrot.slane %v923_v18, 1 }
  0xf0   : > { %5370 = vmatmul.msk.f32.gmra.mxu3 %vm1683_vm4, %v4093_v44  ;;  %v2885_v43 = vmax.f32 %v2705_v35, %v2772_v22  ;;  %v1314_v13 = vrot.slane %v783_v0, 3  ;;  %v1316_v23 = vrot.slane %v923_v18, 3  ;;  %v1530_v5 = vrot.slane %v899_v26, 4  ;;  %5277 = vmatmul.msk.f32.gmra.mxu0 %vm1683_vm4, %v6723_v36 }
  0xf1   : > { %v6897_v24 = vmax.f32 %v2884_v11, %v2950_v14  ;;  %v1098_v21 = vsel %vm1030_vm2, %v1096_v4, %v1097_v56  ;;  %v1100_v40 = vsel %vm1030_vm2, %v1097_v56, %v1099_v7  ;;  %v1531_v38 = vrot.slane %v783_v0, 4 }
  0xf2   : > { %v6901_v51 = vmax.f32 %v2885_v43, %v2952_v33  ;;  %v1225_v32 = vmax.f32 %v960_v59, %v1098_v21  ;;  %v1226_v31 = vmax.f32 %v961_v27, %v1100_v40  ;;  %v1315_v19 = vsel %vm1247_vm3, %v1313_v1, %v1314_v13  ;;  %5310 = vmatmul.msk.f32.gmra.mxu1 %vm1683_vm4, %v6576_v17 }
  0xf3   : > { %v3438_v26 = vmax.f32 %v3406_v49, %v6897_v24  ;;  %v1317_v44 = vsel %vm1247_vm3, %v1314_v13, %v1316_v23  ;;  %v1532_v4 = vsel %vm1464_vm0, %v1530_v5, %v1531_v38  ;;  %v1533_v3 = vrot.slane %v923_v18, 4  ;;  %5341 = vmatmul.msk.f32.gmra.mxu2 %vm1683_vm4, %v6897_v24 }
  0xf4   : > { %v3439_v59 = vmax.f32 %v3407_v45, %v6901_v51  ;;  %v1442_v1 = vmax.f32 %v1225_v32, %v1315_v19  ;;  %v1443_v0 = vmax.f32 %v1226_v31, %v1317_v44  ;;  %v2166_v54 = vmax.f32 %v2126_v6, %v6552_v63 }
  0xf5   : > { %v3506_v49 = vrot.slane %v3438_v26, 6  ;;  %v1534_v61 = vsel %vm1464_vm0, %v1531_v38, %v1533_v3  ;;  %v2167_v50 = vmax.f32 %v2127_v55, %v6562_v30  ;;  %v3344_v16 = vmax.f32 %v6808_v42, %v6527_v53 }
  0xf6   : > { %v3507_v45 = vrot.slane %v3439_v59, 6  ;;  %v6931_v29 = vmax.f32 %v1442_v1, %v1532_v4  ;;  %v6933_v58 = vmax.f32 %v1443_v0, %v1534_v61  ;;  %v2206_v10 = vmax.f32 %v2166_v54, %v6851_v15 }
  0xf7   : > { %v3594_v17 = vsel %vm741_vm1, -inf, %v3506_v49  ;;  %v2207_v6 = vmax.f32 %v2167_v50, %v6853_v41  ;;  %v3345_v39 = vmax.f32 %v6812_v8, %v6533_v60  ;;  %v6941_v9 = vmax.f32 %v3344_v16, %v6646_v57 }
  0xf8   : > { %v3508_v55 = vsel %vm741_vm1, %v3506_v49, %v3507_v45  ;;  %v3630_v53 = vmax.f32 %v3438_v26, %v3594_v17  ;;  %v3706_v37 = vrot.slane %v3594_v17, 1  ;;  %v3850_v22 = vrot.slane %v3594_v17, 3  ;;  %5278 = vmatmul.msk.f32.gmra.mxu0 %vm1683_vm4, %v6851_v15 }
  0xf9   : > { %v3707_v35 = vrot.slane %v3508_v55, 1  ;;  %v3851_v14 = vrot.slane %v3508_v55, 3  ;;  %v3994_v33 = vrot.slane %v3594_v17, 4  ;;  %v3995_v18 = vrot.slane %v3508_v55, 4 }
  0xfa   : > { %v3610_v11 = vsel %vm741_vm1, %v3507_v45, -inf  ;;  %v3631_v27 = vmax.f32 %v3439_v59, %v3508_v55  ;;  %v2246_v56 = vmax.f32 %v2206_v10, %v6931_v29  ;;  %v2247_v7 = vmax.f32 %v2207_v6, %v6933_v58  ;;  %5311 = vmatmul.msk.f32.gmra.mxu1 %vm1683_vm4, %v6444_v2 }
  0xfb   : > { %v3708_v60 = vsel %vm1030_vm2, %v3706_v37, %v3707_v35  ;;  %v3852_v43 = vsel %vm1247_vm3, %v3850_v22, %v3851_v14  ;;  %v3996_v13 = vsel %vm1464_vm0, %v3994_v33, %v3995_v18  ;;  %v3709_v23 = vrot.slane %v3610_v11, 1  ;;  %5342 = vmatmul.msk.f32.gmra.mxu2 %vm1683_vm4, %v6901_v51 }
  0xfc   : > { %v3806_v5 = vmax.f32 %v3630_v53, %v3708_v60  ;;  %v3853_v21 = vrot.slane %v3610_v11, 3  ;;  %v3997_v40 = vrot.slane %v3610_v11, 4  ;;  %v2335_v38 = vrot.slane %v2246_v56, 6 }
  0xfd   : > { %v3710_v32 = vsel %vm1030_vm2, %v3707_v35, %v3709_v23  ;;  %v2336_v31 = vrot.slane %v2247_v7, 6  ;;  %v3377_v19 = vmax.f32 %v3345_v39, %v6648_v25  ;;  %v3408_v26 = vmax.f32 %v6941_v9, %v6897_v24 }
  0xfe   : > { %v3950_v44 = vmax.f32 %v3806_v5, %v3852_v43  ;;  %v3807_v4 = vmax.f32 %v3631_v27, %v3710_v32  ;;  %v3854_v3 = vsel %vm1247_vm3, %v3851_v14, %v3853_v21  ;;  %v3998_v59 = vsel %vm1464_vm0, %v3995_v18, %v3997_v40  ;;  %v5602_v43 = vld [vmem:[%s5719_s28 + $0x80] sm:$0xff] }
  0xff   : > { %v2337_v1 = vsel %vm741_vm1, %v2335_v38, %v2336_v31  ;;  %v2437_v0 = vsel %vm741_vm1, -inf, %v2335_v38  ;;  %v2457_v2 = vsel %vm741_vm1, %v2336_v31, -inf  ;;  %v3409_v54 = vmax.f32 %v3377_v19, %v6901_v51 }
 0x100   : > { %v4094_v49 = vmax.f32 %v3950_v44, %v3996_v13  ;;  %v3951_v61 = vmax.f32 %v3807_v4, %v3854_v3  ;;  %v2486_v50 = vmax.f32 %v2246_v56, %v2437_v0  ;;  %v2487_v16 = vmax.f32 %v2247_v7, %v2337_v1  ;;  %5279 = vmatmul.msk.f32.gmra.mxu0 %vm1683_vm4, %v6853_v41  ;;  %v5601_v56 = vld [vmem:[%s5719_s28 + $0x88] sm:$0xff] }
 0x101   : > { %v2593_v45 = vrot.slane %v2437_v0, 1  ;;  %v2594_v10 = vrot.slane %v2337_v1, 1  ;;  %v2596_v17 = vrot.slane %v2457_v2, 1  ;;  %v2773_v6 = vrot.slane %v2437_v0, 3 }
 0x102   : > { %5371 = vmatmul.msk.f32.gmra.mxu3 %vm1683_vm4, %v4094_v49  ;;  %v4095_v39 = vmax.f32 %v3951_v61, %v3998_v59  ;;  %v2774_v9 = vrot.slane %v2337_v1, 3  ;;  %v2776_v55 = vrot.slane %v2457_v2, 3  ;;  %v2953_v53 = vrot.slane %v2437_v0, 4  ;;  %5312 = vmatmul.msk.f32.gmra.mxu1 %vm1683_vm4, %v5601_v56  ;;  %v6995_v59 = vld [vmem:[%s5719_s28 + $0xc0] sm:$0xff] }
 0x103   : > { %v2595_v37 = vsel %vm1030_vm2, %v2593_v45, %v2594_v10  ;;  %v2597_v22 = vsel %vm1030_vm2, %v2594_v10, %v2596_v17  ;;  %v2954_v35 = vrot.slane %v2337_v1, 4  ;;  %v2956_v14 = vrot.slane %v2457_v2, 4 }
 0x104   : > { %v2706_v33 = vmax.f32 %v2486_v50, %v2595_v37  ;;  %v2707_v18 = vmax.f32 %v2487_v16, %v2597_v22  ;;  %v2775_v11 = vsel %vm1247_vm3, %v2773_v6, %v2774_v9  ;;  %v2777_v27 = vsel %vm1247_vm3, %v2774_v9, %v2776_v55 }
 0x105   : > { %v2955_v7 = vsel %vm1464_vm0, %v2953_v53, %v2954_v35  ;;  %v2957_v60 = vsel %vm1464_vm0, %v2954_v35, %v2956_v14  ;;  %v529_v13 = vmax.f32 %v6746_v46, %v5602_v43  ;;  %v530_v23 = vmax.f32 %v6749_v48, %v5601_v56 }
 0x106   : > { %v2886_v5 = vmax.f32 %v2706_v33, %v2775_v11  ;;  %v2887_v21 = vmax.f32 %v2707_v18, %v2777_v27  ;;  %v2128_v40 = vmax.f32 %v6851_v15, %v6552_v63  ;;  %v2129_v38 = vmax.f32 %v6853_v41, %v6562_v30  ;;  %v6998_v63 = vld [vmem:[%s5719_s28 + $0xc8] sm:$0xff] }
 0x107   : > { %v577_v32 = vmax.f32 %v529_v13, %v6629_v12  ;;  %v578_v31 = vmax.f32 %v530_v23, %v6632_v20  ;;  %v3346_v19 = vmax.f32 %v6897_v24, %v6646_v57  ;;  %v3347_v44 = vmax.f32 %v6901_v51, %v6648_v25 }
 0x108   : > { %v6990_v4 = vmax.f32 %v2886_v5, %v2955_v7  ;;  %v6992_v3 = vmax.f32 %v2887_v21, %v2957_v60  ;;  %v7001_v30 = vmax.f32 %v2128_v40, %v6721_v52  ;;  %v7004_v1 = vmax.f32 %v2129_v38, %v6723_v36  ;;  %5280 = vmatmul.msk.f32.gmra.mxu0 %vm1683_vm4, %v6931_v29 }
 0x109   : > { %v625_v0 = vmax.f32 %v577_v32, %v6789_v47  ;;  %v626_v57 = vmax.f32 %v578_v31, %v6846_v62  ;;  %v7009_v25 = vmax.f32 %v3346_v19, %v6808_v42  ;;  %v7012_v2 = vmax.f32 %v3347_v44, %v6812_v8 }
 0x10a   : > { %5372 = vmatmul.msk.f32.gmra.mxu3 %vm1683_vm4, %v4095_v39  ;;  %v3440_v49 = vmax.f32 %v3408_v26, %v6990_v4  ;;  %v3441_v61 = vmax.f32 %v3409_v54, %v6992_v3  ;;  %v2208_v50 = vmax.f32 %v7001_v30, %v6931_v29  ;;  %v2209_v16 = vmax.f32 %v7004_v1, %v6933_v58 }
 0x10b   : > { %v673_v45 = vmax.f32 %v625_v0, %v6995_v59  ;;  %v674_v10 = vmax.f32 %v626_v57, %v6998_v63  ;;  %v3410_v17 = vmax.f32 %v7009_v25, %v6990_v4  ;;  %v3411_v6 = vmax.f32 %v7012_v2, %v6992_v3  ;;  %5343 = vmatmul.msk.f32.gmra.mxu2 %vm1683_vm4, %v6990_v4 }
 0x10c   : > { %v3509_v26 = vrot.slane %v3440_v49, 6  ;;  %v3510_v54 = vrot.slane %v3441_v61, 6  ;;  %v531_v39 = vmax.f32 %v6789_v47, %v6629_v12  ;;  %v532_v9 = vmax.f32 %v6846_v62, %v6632_v20  ;;  %5313 = vmatmul.msk.f32.gmra.mxu1 %vm1683_vm4, %v6629_v12 }
 0x10d   : > { %v784_v55 = vrot.slane %v673_v45, 6  ;;  %v785_v53 = vrot.slane %v674_v10, 6  ;;  %v2130_v37 = vmax.f32 %v6931_v29, %v6721_v52  ;;  %v2131_v22 = vmax.f32 %v6933_v58, %v6723_v36 }
 0x10e   : > { %v3511_v35 = vsel %vm741_vm1, %v3509_v26, %v3510_v54  ;;  %v3595_v14 = vsel %vm741_vm1, -inf, %v3509_v26  ;;  %v3611_v33 = vsel %vm741_vm1, %v3510_v54, -inf  ;;  %v579_v18 = vmax.f32 %v531_v39, %v6746_v46 }
 0x10f   : > { %v3632_v11 = vmax.f32 %v3440_v49, %v3595_v14  ;;  %v3711_v27 = vrot.slane %v3595_v14, 1  ;;  %v3712_v56 = vrot.slane %v3511_v35, 1  ;;  %v3855_v12 = vrot.slane %v3595_v14, 3 }
 0x110   : > { %v3856_v7 = vrot.slane %v3511_v35, 3  ;;  %v3999_v60 = vrot.slane %v3595_v14, 4  ;;  %v4000_v43 = vrot.slane %v3511_v35, 4  ;;  %v3633_v13 = vmax.f32 %v3441_v61, %v3511_v35  ;;  %5281 = vmatmul.msk.f32.gmra.mxu0 %vm1683_vm4, %v6933_v58 }
 0x111   : > { %v3713_v52 = vsel %vm1030_vm2, %v3711_v27, %v3712_v56  ;;  %v3714_v23 = vrot.slane %v3611_v33, 1  ;;  %v3858_v36 = vrot.slane %v3611_v33, 3  ;;  %v4002_v5 = vrot.slane %v3611_v33, 4 }
 0x112   : > { %v3808_v21 = vmax.f32 %v3632_v11, %v3713_v52  ;;  %v3857_v40 = vsel %vm1247_vm3, %v3855_v12, %v3856_v7  ;;  %v4001_v38 = vsel %vm1464_vm0, %v3999_v60, %v4000_v43  ;;  %v786_v32 = vsel %vm741_vm1, %v784_v55, %v785_v53 }
 0x113   : > { %v3715_v31 = vsel %vm1030_vm2, %v3712_v56, %v3714_v23  ;;  %v3859_v19 = vsel %vm1247_vm3, %v3856_v7, %v3858_v36  ;;  %v4003_v44 = vsel %vm1464_vm0, %v4000_v43, %v4002_v5  ;;  %v900_v0 = vsel %vm741_vm1, -inf, %v784_v55  ;;  %5344 = vmatmul.msk.f32.gmra.mxu2 %vm1683_vm4, %v6992_v3  ;;  %v7066_v23 = vld [vmem:[%s5719_s28 + $0xd0] sm:$0xff] }
 0x114   : > { %v3952_v57 = vmax.f32 %v3808_v21, %v3857_v40  ;;  %v3809_v49 = vmax.f32 %v3633_v13, %v3715_v31  ;;  %v924_v61 = vsel %vm741_vm1, %v785_v53, -inf  ;;  %v962_v26 = vmax.f32 %v673_v45, %v900_v0  ;;  %5314 = vmatmul.msk.f32.gmra.mxu1 %vm1683_vm4, %v6632_v20  ;;  %v7070_v40 = vld [vmem:[%s5719_s28 + $0xd8] sm:$0xff] }
 0x115   : > { %v963_v54 = vmax.f32 %v674_v10, %v786_v32  ;;  %v1101_v39 = vrot.slane %v900_v0, 1  ;;  %v1102_v35 = vrot.slane %v786_v32, 1  ;;  %v1104_v14 = vrot.slane %v924_v61, 1 }
 0x116   : > { %v4096_v33 = vmax.f32 %v3952_v57, %v4001_v38  ;;  %v3953_v55 = vmax.f32 %v3809_v49, %v3859_v19  ;;  %v1318_v11 = vrot.slane %v900_v0, 3  ;;  %v1319_v27 = vrot.slane %v786_v32, 3 }
 0x117   : > { %v1103_v56 = vsel %vm1030_vm2, %v1101_v39, %v1102_v35  ;;  %v1105_v45 = vsel %vm1030_vm2, %v1102_v35, %v1104_v14  ;;  %v1321_v53 = vrot.slane %v924_v61, 3  ;;  %v1535_v12 = vrot.slane %v900_v0, 4 }
 0x118   : > { %5373 = vmatmul.msk.f32.gmra.mxu3 %vm1683_vm4, %v4096_v33  ;;  %v4097_v7 = vmax.f32 %v3953_v55, %v4003_v44  ;;  %v1227_v20 = vmax.f32 %v962_v26, %v1103_v56  ;;  %v1228_v10 = vmax.f32 %v963_v54, %v1105_v45  ;;  %v1320_v60 = vsel %vm1247_vm3, %v1318_v11, %v1319_v27 }
 0x119   : > { %v1322_v43 = vsel %vm1247_vm3, %v1319_v27, %v1321_v53  ;;  %v1536_v13 = vrot.slane %v786_v32, 4  ;;  %v1538_v52 = vrot.slane %v924_v61, 4  ;;  %v580_v36 = vmax.f32 %v532_v9, %v6749_v48 }
 0x11a   : > { %v1444_v5 = vmax.f32 %v1227_v20, %v1320_v60  ;;  %v1445_v21 = vmax.f32 %v1228_v10, %v1322_v43  ;;  %v627_v38 = vmax.f32 %v579_v18, %v6995_v59  ;;  %v7074_v31 = vmax.f32 %v2130_v37, %v6851_v15 }
 0x11b   : > { %v1537_v19 = vsel %vm1464_vm0, %v1535_v12, %v1536_v13  ;;  %v1539_v44 = vsel %vm1464_vm0, %v1536_v13, %v1538_v52  ;;  %v628_v32 = vmax.f32 %v580_v36, %v6998_v63  ;;  %v7080_v0 = vmax.f32 %v2131_v22, %v6853_v41 }
 0x11c   : > { %v7082_v57 = vmax.f32 %v1444_v5, %v1537_v19  ;;  %v7084_v9 = vmax.f32 %v1445_v21, %v1539_v44  ;;  %v675_v49 = vmax.f32 %v627_v38, %v7066_v23  ;;  %v533_v18 = vmax.f32 %v6995_v59, %v6746_v46  ;;  %5315 = vmatmul.msk.f32.gmra.mxu1 %vm1683_vm4, %v6746_v46 }
 0x11d   : > { %v676_v37 = vmax.f32 %v628_v32, %v7070_v40  ;;  %v3348_v61 = vmax.f32 %v6990_v4, %v6808_v42  ;;  %v3349_v22 = vmax.f32 %v6992_v3, %v6812_v8  ;;  %v534_v26 = vmax.f32 %v6998_v63, %v6749_v48 }
 0x11e   : > { %v2248_v54 = vmax.f32 %v2208_v50, %v7082_v57  ;;  %v2249_v46 = vmax.f32 %v2209_v16, %v7084_v9  ;;  %v787_v39 = vrot.slane %v675_v49, 6  ;;  %v2210_v42 = vmax.f32 %v7074_v31, %v7082_v57  ;;  %5282 = vmatmul.msk.f32.gmra.mxu0 %vm1683_vm4, %v7082_v57 }
 0x11f   : > { %v788_v8 = vrot.slane %v676_v37, 6  ;;  %v2211_v35 = vmax.f32 %v7080_v0, %v7084_v9  ;;  %v7113_v14 = vmax.f32 %v3348_v61, %v6897_v24  ;;  %v7116_v30 = vmax.f32 %v3349_v22, %v6901_v51 }
 0x120   : > { %5374 = vmatmul.msk.f32.gmra.mxu3 %vm1683_vm4, %v4097_v7  ;;  %v2338_v1 = vrot.slane %v2248_v54, 6  ;;  %v2339_v50 = vrot.slane %v2249_v46, 6  ;;  %v901_v16 = vsel %vm741_vm1, -inf, %v787_v39  ;;  %v7121_v33 = vmax.f32 %v533_v18, %v6789_v47 }
 0x121   : > { %v789_v55 = vsel %vm741_vm1, %v787_v39, %v788_v8  ;;  %v925_v11 = vsel %vm741_vm1, %v788_v8, -inf  ;;  %v964_v27 = vmax.f32 %v675_v49, %v901_v16  ;;  %v1106_v56 = vrot.slane %v901_v16, 1 }
 0x122   : > { %v2340_v45 = vsel %vm741_vm1, %v2338_v1, %v2339_v50  ;;  %v2438_v53 = vsel %vm741_vm1, -inf, %v2338_v1  ;;  %v2458_v12 = vsel %vm741_vm1, %v2339_v50, -inf  ;;  %v965_v7 = vmax.f32 %v676_v37, %v789_v55 }
 0x123   : > { %v2488_v20 = vmax.f32 %v2248_v54, %v2438_v53  ;;  %v2489_v10 = vmax.f32 %v2249_v46, %v2340_v45  ;;  %v2598_v60 = vrot.slane %v2438_v53, 1  ;;  %v2599_v43 = vrot.slane %v2340_v45, 1 }
 0x124   : > { %v2601_v13 = vrot.slane %v2458_v12, 1  ;;  %v2778_v52 = vrot.slane %v2438_v53, 3  ;;  %v2779_v36 = vrot.slane %v2340_v45, 3  ;;  %v2781_v5 = vrot.slane %v2458_v12, 3  ;;  %5316 = vmatmul.msk.f32.gmra.mxu1 %vm1683_vm4, %v6749_v48 }
 0x125   : > { %v2600_v21 = vsel %vm1030_vm2, %v2598_v60, %v2599_v43  ;;  %v2958_v38 = vrot.slane %v2438_v53, 4  ;;  %v2959_v19 = vrot.slane %v2340_v45, 4  ;;  %v2961_v44 = vrot.slane %v2458_v12, 4 }
 0x126   : > { %v2602_v32 = vsel %vm1030_vm2, %v2599_v43, %v2601_v13  ;;  %v2708_v49 = vmax.f32 %v2488_v20, %v2600_v21  ;;  %v2780_v18 = vsel %vm1247_vm3, %v2778_v52, %v2779_v36  ;;  %v2782_v37 = vsel %vm1247_vm3, %v2779_v36, %v2781_v5  ;;  %5283 = vmatmul.msk.f32.gmra.mxu0 %vm1683_vm4, %v7084_v9 }
 0x127   : > { %v2709_v61 = vmax.f32 %v2489_v10, %v2602_v32  ;;  %v2960_v22 = vsel %vm1464_vm0, %v2958_v38, %v2959_v19  ;;  %v2962_v54 = vsel %vm1464_vm0, %v2959_v19, %v2961_v44  ;;  %v1107_v46 = vrot.slane %v789_v55, 1 }
 0x128   : > { %v2888_v39 = vmax.f32 %v2708_v49, %v2780_v18  ;;  %v1109_v8 = vrot.slane %v925_v11, 1  ;;  %v1323_v1 = vrot.slane %v901_v16, 3  ;;  %v1324_v50 = vrot.slane %v789_v55, 3 }
 0x129   : > { %v2889_v45 = vmax.f32 %v2709_v61, %v2782_v37  ;;  %v1108_v53 = vsel %vm1030_vm2, %v1106_v56, %v1107_v46  ;;  %v1326_v12 = vrot.slane %v925_v11, 3  ;;  %v1540_v20 = vrot.slane %v901_v16, 4 }
 0x12a   : > { %v7139_v60 = vmax.f32 %v2888_v39, %v2960_v22  ;;  %v1110_v43 = vsel %vm1030_vm2, %v1107_v46, %v1109_v8  ;;  %v1229_v13 = vmax.f32 %v964_v27, %v1108_v53  ;;  %v1325_v10 = vsel %vm1247_vm3, %v1323_v1, %v1324_v50  ;;  %v7193_v53 = vld [vmem:[%s5719_s28 + $0xe0] sm:$0xff] }
 0x12b   : > { %v7143_v52 = vmax.f32 %v2889_v45, %v2962_v54  ;;  %v1230_v36 = vmax.f32 %v965_v7, %v1110_v43  ;;  %v1327_v5 = vsel %vm1247_vm3, %v1324_v50, %v1326_v12  ;;  %v1541_v21 = vrot.slane %v789_v55, 4  ;;  %v7196_v12 = vld [vmem:[%s5719_s28 + $0xe8] sm:$0xff] }
 0x12c   : > { %v3442_v56 = vmax.f32 %v3410_v17, %v7139_v60  ;;  %v1446_v38 = vmax.f32 %v1229_v13, %v1325_v10  ;;  %v1543_v16 = vrot.slane %v925_v11, 4  ;;  %v3412_v19 = vmax.f32 %v7113_v14, %v7139_v60  ;;  %5345 = vmatmul.msk.f32.gmra.mxu2 %vm1683_vm4, %v7139_v60  ;;  %5317 = vmatmul.msk.f32.gmra.mxu1 %vm1683_vm4, %v6789_v47 }
 0x12d   : > { %v3443_v55 = vmax.f32 %v3411_v6, %v7143_v52  ;;  %v1447_v27 = vmax.f32 %v1230_v36, %v1327_v5  ;;  %v1542_v25 = vsel %vm1464_vm0, %v1540_v20, %v1541_v21  ;;  %v3413_v17 = vmax.f32 %v7116_v30, %v7143_v52 }
 0x12e   : > { %v3512_v11 = vrot.slane %v3442_v56, 6  ;;  %v1544_v7 = vsel %vm1464_vm0, %v1541_v21, %v1543_v16  ;;  %v7164_v44 = vmax.f32 %v1446_v38, %v1542_v25  ;;  %v582_v47 = vmax.f32 %v534_v26, %v6846_v62 }
 0x12f   : > { %v3513_v32 = vrot.slane %v3443_v55, 6  ;;  %v7170_v49 = vmax.f32 %v1447_v27, %v1544_v7  ;;  %v629_v2 = vmax.f32 %v7121_v33, %v7066_v23  ;;  %v2132_v6 = vmax.f32 %v7082_v57, %v6851_v15 }
 0x130   : > { %v3596_v18 = vsel %vm741_vm1, -inf, %v3512_v11  ;;  %v2250_v37 = vmax.f32 %v2210_v42, %v7164_v44  ;;  %v630_v48 = vmax.f32 %v582_v47, %v7070_v40  ;;  %v2133_v26 = vmax.f32 %v7084_v9, %v6853_v41  ;;  %5284 = vmatmul.msk.f32.gmra.mxu0 %vm1683_vm4, %v7164_v44 }
 0x131   : > { %v3514_v33 = vsel %vm741_vm1, %v3512_v11, %v3513_v32  ;;  %v3634_v61 = vmax.f32 %v3442_v56, %v3596_v18  ;;  %v3716_v22 = vrot.slane %v3596_v18, 1  ;;  %v3860_v54 = vrot.slane %v3596_v18, 3 }
 0x132   : > { %v3717_v46 = vrot.slane %v3514_v33, 1  ;;  %v3861_v39 = vrot.slane %v3514_v33, 3  ;;  %v4004_v8 = vrot.slane %v3596_v18, 4  ;;  %v4005_v31 = vrot.slane %v3514_v33, 4 }
 0x133   : > { %v3612_v42 = vsel %vm741_vm1, %v3513_v32, -inf  ;;  %v3635_v1 = vmax.f32 %v3443_v55, %v3514_v33  ;;  %v2251_v50 = vmax.f32 %v2211_v35, %v7170_v49  ;;  %v2341_v45 = vrot.slane %v2250_v37, 6 }
 0x134   : > { %v3718_v20 = vsel %vm1030_vm2, %v3716_v22, %v3717_v46  ;;  %v3862_v43 = vsel %vm1247_vm3, %v3860_v54, %v3861_v39  ;;  %v4006_v13 = vsel %vm1464_vm0, %v4004_v8, %v4005_v31  ;;  %v3719_v10 = vrot.slane %v3612_v42, 1  ;;  %5346 = vmatmul.msk.f32.gmra.mxu2 %vm1683_vm4, %v7143_v52  ;;  %5318 = vmatmul.msk.f32.gmra.mxu1 %vm1683_vm4, %v6846_v62 }
 0x135   : > { %v3810_v0 = vmax.f32 %v3634_v61, %v3718_v20  ;;  %v3863_v35 = vrot.slane %v3612_v42, 3  ;;  %v4007_v36 = vrot.slane %v3612_v42, 4  ;;  %v2342_v5 = vrot.slane %v2251_v50, 6  ;;  %v2012_v42 = vpop.f32.mrf.mxu1 }
 0x136   : > { %v3720_v21 = vsel %vm1030_vm2, %v3717_v46, %v3719_v10  ;;  %v2439_v56 = vsel %vm741_vm1, -inf, %v2341_v45  ;;  %v7208_v38 = vmax.f32 %v629_v2, %v7193_v53  ;;  %v7211_v16 = vmax.f32 %v630_v48, %v7196_v12 }
 0x137   : > { %v3954_v55 = vmax.f32 %v3810_v0, %v3862_v43  ;;  %v3811_v27 = vmax.f32 %v3635_v1, %v3720_v21  ;;  %v3864_v25 = vsel %vm1247_vm3, %v3861_v39, %v3863_v35  ;;  %v4008_v11 = vsel %vm1464_vm0, %v4005_v31, %v4007_v36  ;;  %v1800_v39 = vpop.f32.mrf.mxu0 }
 0x138   : > { %v2343_v7 = vsel %vm741_vm1, %v2341_v45, %v2342_v5  ;;  %v2459_v47 = vsel %vm741_vm1, %v2342_v5, -inf  ;;  %v2490_v32 = vmax.f32 %v2250_v37, %v2439_v56  ;;  %v2603_v18 = vrot.slane %v2439_v56, 1  ;;  %5285 = vmatmul.msk.f32.gmra.mxu0 %vm1683_vm4, %v7170_v49 }
 0x139   : > { %v4098_v2 = vmax.f32 %v3954_v55, %v4006_v13  ;;  %v3955_v33 = vmax.f32 %v3811_v27, %v3864_v25  ;;  %v2491_v61 = vmax.f32 %v2251_v50, %v2343_v7  ;;  %v2604_v48 = vrot.slane %v2343_v7, 1 }
 0x13a   : > { %v2606_v22 = vrot.slane %v2459_v47, 1  ;;  %v2783_v54 = vrot.slane %v2439_v56, 3  ;;  %v2784_v46 = vrot.slane %v2343_v7, 3  ;;  %v2786_v8 = vrot.slane %v2459_v47, 3 }
 0x13b   : > { %5375 = vmatmul.msk.f32.gmra.mxu3 %vm1683_vm4, %v4098_v2  ;;  %v4099_v31 = vmax.f32 %v3955_v33, %v4008_v11  ;;  %v2605_v1 = vsel %vm1030_vm2, %v2603_v18, %v2604_v48  ;;  %v2963_v37 = vrot.slane %v2439_v56, 4  ;;  %v2964_v45 = vrot.slane %v2343_v7, 4 }
 0x13c   : > { %v2607_v20 = vsel %vm1030_vm2, %v2604_v48, %v2606_v22  ;;  %v2710_v43 = vmax.f32 %v2490_v32, %v2605_v1  ;;  %v2785_v13 = vsel %vm1247_vm3, %v2783_v54, %v2784_v46  ;;  %v2787_v50 = vsel %vm1247_vm3, %v2784_v46, %v2786_v8  ;;  %5319 = vmatmul.msk.f32.gmra.mxu1 %vm1683_vm4, %v6995_v59 }
 0x13d   : > { %v2711_v10 = vmax.f32 %v2491_v61, %v2607_v20  ;;  %v2965_v0 = vsel %vm1464_vm0, %v2963_v37, %v2964_v45  ;;  %v2966_v35 = vrot.slane %v2459_v47, 4  ;;  %v7227_v36 = vadd.f32 %v2012_v42, %v1800_v39 }
 0x13e   : > { %v2890_v5 = vmax.f32 %v2710_v43, %v2785_v13  ;;  %v790_v21 = vrot.slane %v7208_v38, 6  ;;  %v791_v56 = vrot.slane %v7211_v16, 6  ;;  %v7235_v55 = vmax.f32 %v2132_v6, %v6931_v29 }
 0x13f   : > { %v2891_v27 = vmax.f32 %v2711_v10, %v2787_v50  ;;  %v2967_v25 = vsel %vm1464_vm0, %v2964_v45, %v2966_v35  ;;  %v7242_v11 = vmax.f32 %v2133_v26, %v6933_v58  ;;  %v3350_v7 = vmax.f32 %v7139_v60, %v6897_v24  ;;  %v7312_v24 = vld [vmem:[%s8540_s4] ss:$0 sm:$0xff] }
 0x140   : > { %v7246_v47 = vmax.f32 %v2890_v5, %v2965_v0  ;;  %v792_v32 = vsel %vm741_vm1, %v790_v21, %v791_v56  ;;  %v902_v15 = vsel %vm741_vm1, -inf, %v790_v21  ;;  %v926_v6 = vsel %vm741_vm1, %v791_v56, -inf }
 0x141   : > { %v7251_v18 = vmax.f32 %v2891_v27, %v2967_v25  ;;  %v966_v2 = vmax.f32 %v7208_v38, %v902_v15  ;;  %v967_v33 = vmax.f32 %v7211_v16, %v792_v32  ;;  %v1111_v41 = vrot.slane %v902_v15, 1 }
 0x142   : > { %v3444_v26 = vmax.f32 %v3412_v19, %v7246_v47  ;;  %v1112_v61 = vrot.slane %v792_v32, 1  ;;  %v1114_v48 = vrot.slane %v926_v6, 1  ;;  %v1328_v22 = vrot.slane %v902_v15, 3  ;;  %5347 = vmatmul.msk.f32.gmra.mxu2 %vm1683_vm4, %v7246_v47 }
 0x143   : > { %5376 = vmatmul.msk.f32.gmra.mxu3 %vm1683_vm4, %v4099_v31  ;;  %v3445_v38 = vmax.f32 %v3413_v17, %v7251_v18  ;;  %v1329_v16 = vrot.slane %v792_v32, 3  ;;  %v1331_v54 = vrot.slane %v926_v6, 3  ;;  %v1545_v46 = vrot.slane %v902_v15, 4 }
 0x144   : > { %v3515_v8 = vrot.slane %v3444_v26, 6  ;;  %v1113_v14 = vsel %vm1030_vm2, %v1111_v41, %v1112_v61  ;;  %v1115_v19 = vsel %vm1030_vm2, %v1112_v61, %v1114_v48  ;;  %v1546_v39 = vrot.slane %v792_v32, 4 }
 0x145   : > { %v3516_v42 = vrot.slane %v3445_v38, 6  ;;  %v1231_v1 = vmax.f32 %v966_v2, %v1113_v14  ;;  %v1232_v37 = vmax.f32 %v967_v33, %v1115_v19  ;;  %v1330_v45 = vsel %vm1247_vm3, %v1328_v22, %v1329_v16 }
 0x146   : > { %v3597_v31 = vsel %vm741_vm1, -inf, %v3515_v8  ;;  %v1332_v20 = vsel %vm1247_vm3, %v1329_v16, %v1331_v54  ;;  %v1547_v30 = vsel %vm1464_vm0, %v1545_v46, %v1546_v39  ;;  %v1548_v17 = vrot.slane %v926_v6, 4  ;;  %v3206_v46 = vpop.f32.mrf.mxu2 }
 0x147   : > { %v3517_v43 = vsel %vm741_vm1, %v3515_v8, %v3516_v42  ;;  %v3636_v13 = vmax.f32 %v3444_v26, %v3597_v31  ;;  %v3721_v50 = vrot.slane %v3597_v31, 1  ;;  %v3865_v10 = vrot.slane %v3597_v31, 3 }
 0x148   : > { %v3722_v0 = vrot.slane %v3517_v43, 1  ;;  %v3866_v35 = vrot.slane %v3517_v43, 3  ;;  %v4009_v5 = vrot.slane %v3597_v31, 4  ;;  %v4010_v21 = vrot.slane %v3517_v43, 4 }
 0x149   : > { %v3613_v56 = vsel %vm741_vm1, %v3516_v42, -inf  ;;  %v3637_v27 = vmax.f32 %v3445_v38, %v3517_v43  ;;  %v1448_v25 = vmax.f32 %v1231_v1, %v1330_v45  ;;  %v1449_v32 = vmax.f32 %v1232_v37, %v1332_v20  ;;  %v4236_v45 = vpop.f32.mrf.mxu3 }
 0x14a   : > { %v3723_v15 = vsel %vm1030_vm2, %v3721_v50, %v3722_v0  ;;  %v3867_v2 = vsel %vm1247_vm3, %v3865_v10, %v3866_v35  ;;  %v4011_v6 = vsel %vm1464_vm0, %v4009_v5, %v4010_v21  ;;  %v3724_v33 = vrot.slane %v3613_v56, 1  ;;  %5348 = vmatmul.msk.f32.gmra.mxu2 %vm1683_vm4, %v7251_v18 }
 0x14b   : > { %v3812_v41 = vmax.f32 %v3636_v13, %v3723_v15  ;;  %v3868_v26 = vrot.slane %v3613_v56, 3  ;;  %v4012_v61 = vrot.slane %v3613_v56, 4  ;;  %v1549_v48 = vsel %vm1464_vm0, %v1546_v39, %v1548_v17 }
 0x14c   : > { %v3725_v22 = vsel %vm1030_vm2, %v3722_v0, %v3724_v33  ;;  %v7281_v38 = vmax.f32 %v1448_v25, %v1547_v30  ;;  %v7283_v16 = vmax.f32 %v1449_v32, %v1549_v48  ;;  %v2212_v54 = vmax.f32 %v7235_v55, %v7164_v44 }
 0x14d   : > { %v3956_v8 = vmax.f32 %v3812_v41, %v3867_v2  ;;  %v3813_v14 = vmax.f32 %v3637_v27, %v3725_v22  ;;  %v3869_v19 = vsel %vm1247_vm3, %v3866_v35, %v3868_v26  ;;  %v4013_v42 = vsel %vm1464_vm0, %v4010_v21, %v4012_v61  ;;  %v7325_v21 = vld [vmem:[%s8541_s5] ss:$0 sm:$0xff]  ;;  %v1803_v2 = vpop.f32.mrf.mxu0 }
 0x14e   : > { %v2213_v39 = vmax.f32 %v7242_v11, %v7170_v49  ;;  %v2252_v1 = vmax.f32 %v2212_v54, %v7281_v38  ;;  %v3351_v37 = vmax.f32 %v7143_v52, %v6901_v51  ;;  %v7298_v55 = vmax.f32 %v3350_v7, %v6990_v4  ;;  %5286 = vmatmul.msk.f32.gmra.mxu0 %vm1683_vm4, %v7281_v38  ;;  %v5603_v11 = vld [vmem:[%s5719_s28 + $0xb0] sm:$0xff] }
 0x14f   : > { %v4100_v31 = vmax.f32 %v3956_v8, %v4011_v6  ;;  %v3957_v20 = vmax.f32 %v3813_v14, %v3869_v19  ;;  %v3302_v30 = vadd.f32 %v3206_v46, %v7227_v36  ;;  %v535_v17 = vmax.f32 %v7066_v23, %v5603_v11  ;;  %v2015_v6 = vpop.f32.mrf.mxu1  ;;  %5320 = vmatmul.msk.f32.gmra.mxu1 %vm1683_vm4, %v6998_v63 }
 0x150   : > { %v2253_v43 = vmax.f32 %v2213_v39, %v7283_v16  ;;  %v2344_v51 = vrot.slane %v2252_v1, 6  ;;  %v7307_v13 = vmax.f32 %v3351_v37, %v6992_v3  ;;  %v3414_v36 = vmax.f32 %v7298_v55, %v7246_v47 }
 0x151   : > { %5377 = vmatmul.msk.f32.gmra.mxu3 %vm1683_vm4, %v4100_v31  ;;  %v4101_v7 = vmax.f32 %v3957_v20, %v4013_v42  ;;  %v4332_v50 = vadd.f32 %v4236_v45, %v3302_v30  ;;  %v536_v10 = vmax.f32 %v7070_v40, %v6846_v62  ;;  %v583_v56 = vmax.f32 %v535_v17, %v6995_v59  ;;  %v3209_v42 = vpop.f32.mrf.mxu2  ;;  %v4239_v11 = vpop.f32.mrf.mxu3 }
 0x152   : > { %v2345_v0 = vrot.slane %v2253_v43, 6  ;;  %v2440_v35 = vsel %vm741_vm1, -inf, %v2344_v51  ;;  %v3415_v5 = vmax.f32 %v7307_v13, %v7251_v18  ;;  %v2016_v26 = vadd.f32 %v2015_v6, %v1803_v2  ;;  %v7349_v13 = vld [vmem:[%s5719_s28 + $0xf0] sm:$0xff] }
 0x153   : > { %v2492_v27 = vmax.f32 %v2252_v1, %v2440_v35  ;;  %v2608_v25 = vrot.slane %v2440_v35, 1  ;;  %v2788_v32 = vrot.slane %v2440_v35, 3  ;;  %v2968_v15 = vrot.slane %v2440_v35, 4  ;;  %v7353_v35 = vld [vmem:[%s5719_s28 + $0xf8] sm:$0xff] }
 0x154   : > { %v2346_v62 = vsel %vm741_vm1, %v2344_v51, %v2345_v0  ;;  %v2460_v33 = vsel %vm741_vm1, %v2345_v0, -inf  ;;  %v4368_v41 = vmul.f32 %v7312_v24, %v4332_v50  ;;  %v2134_v55 = vmax.f32 %v7164_v44, %v6931_v29 }
 0x155   : > { %v2493_v61 = vmax.f32 %v2253_v43, %v2346_v62  ;;  %v2609_v48 = vrot.slane %v2346_v62, 1  ;;  %v2611_v22 = vrot.slane %v2460_v33, 1  ;;  %v2789_v54 = vrot.slane %v2346_v62, 3 }
 0x156   : > { %v2791_v46 = vrot.slane %v2460_v33, 3  ;;  %v2969_v8 = vrot.slane %v2346_v62, 4  ;;  %v2971_v14 = vrot.slane %v2460_v33, 4  ;;  %v7334_v19 = vadd.f32 %v7325_v21, %v4368_v41  ;;  %5287 = vmatmul.msk.f32.gmra.mxu0 %vm1683_vm4, %v7283_v16  ;;  %v1806_v62 = vpop.f32.mrf.mxu0 }
 0x157   : > { %v2610_v39 = vsel %vm1030_vm2, %v2608_v25, %v2609_v48  ;;  %v2612_v1 = vsel %vm1030_vm2, %v2609_v48, %v2611_v22  ;;  %v2790_v37 = vsel %vm1247_vm3, %v2788_v32, %v2789_v54  ;;  %v3303_v51 = vadd.f32 %v3209_v42, %v2016_v26  ;;  %v2018_v32 = vpop.f32.mrf.mxu1  ;;  %5321 = vmatmul.msk.f32.gmra.mxu1 %vm1683_vm4, %v7066_v23 }
 0x158   : > { %v2712_v45 = vmax.f32 %v2492_v27, %v2610_v39  ;;  %v2713_v31 = vmax.f32 %v2493_v61, %v2612_v1  ;;  %v2792_v20 = vsel %vm1247_vm3, %v2789_v54, %v2791_v46  ;;  %v2970_v30 = vsel %vm1464_vm0, %v2968_v15, %v2969_v8 }
 0x159   : > { %5378 = vmatmul.msk.f32.gmra.mxu3 %vm1683_vm4, %v4101_v7  ;;  %v2972_v17 = vsel %vm1464_vm0, %v2969_v8, %v2971_v14  ;;  %v5395_v43 = vmul.f32 -1.442695, %v7334_v19  ;;  %v584_v50 = vmax.f32 %v536_v10, %v6998_v63  ;;  %v631_v27 = vmax.f32 %v583_v56, %v7193_v53 }
 0x15a   : > { %v2892_v0 = vmax.f32 %v2712_v45, %v2790_v37  ;;  %v2893_v29 = vmax.f32 %v2713_v31, %v2792_v20  ;;  %v2135_v25 = vmax.f32 %v7170_v49, %v6933_v58  ;;  %v4333_v7 = vadd.f32 %v4239_v11, %v3303_v51 }
 0x15b   : > { %5460 = vpow2.f32 %v5395_v43  ;;  %v632_v15 = vmax.f32 %v584_v50, %v7196_v12  ;;  %v7360_v2 = vmax.f32 %v2134_v55, %v7082_v57  ;;  %v7369_v56 = vmax.f32 %v631_v27, %v7349_v13 }
 0x15c   : > { %v7364_v10 = vmax.f32 %v2892_v0, %v2970_v30  ;;  %v7366_v6 = vmax.f32 %v2893_v29, %v2972_v17  ;;  %v4369_v58 = vmul.f32 %v7312_v24, %v4333_v7  ;;  %v7376_v41 = vmax.f32 %v2135_v25, %v7084_v9 }
 0x15d   : > { %v7373_v33 = vmax.f32 %v632_v15, %v7353_v35  ;;  %v793_v48 = vrot.slane %v7369_v56, 6  ;;  %v7386_v54 = vadd.f32 %v2018_v32, %v1806_v62  ;;  %v3353_v55 = vmax.f32 %v7251_v18, %v6992_v3 }
 0x15e   : > { %v3446_v26 = vmax.f32 %v3414_v36, %v7364_v10  ;;  %v3447_v61 = vmax.f32 %v3415_v5, %v7366_v6  ;;  %5349 = vmatmul.msk.f32.gmra.mxu2 %vm1683_vm4, %v7364_v10  ;;  %v7384_v22 = vadd.f32 %v7325_v21, %v4369_v58  ;;  %v3352_v36 = vmax.f32 %v7246_v47, %v6990_v4 }
 0x15f   : > { %v794_v42 = vrot.slane %v7373_v33, 6  ;;  %v7395_v1 = vsel %vm741_vm1, -inf, %v793_v48 }
 0x160   : > { %v3518_v8 = vrot.slane %v3446_v26, 6  ;;  %v3519_v14 = vrot.slane %v3447_v61, 6  ;;  %v5396_v39 = vmul.f32 -1.442695, %v7384_v22  ;;  %v7411_v7 = vmax.f32 %v3352_v36, %v7139_v60 }
 0x161   : > { %v5461_v5 = vpop.eup %5460  ;;  %v795_v27 = vsel %vm741_vm1, %v793_v48, %v794_v42  ;;  %v927_v25 = vsel %vm741_vm1, %v794_v42, -inf  ;;  %v968_v58 = vmax.f32 %v7369_v56, %v7395_v1  ;;  %v1116_v56 = vrot.slane %v7395_v1, 1 }
 0x162   : > { %v3520_v45 = vsel %vm741_vm1, %v3518_v8, %v3519_v14  ;;  %v3598_v31 = vsel %vm741_vm1, -inf, %v3518_v8  ;;  %v7403_v20 = vadd.f32 1.0, %v5461_v5  ;;  %v3614_v4 = vsel %vm741_vm1, %v3519_v14, -inf }
 0x163   : > { %v3638_v30 = vmax.f32 %v3446_v26, %v3598_v31  ;;  %v3726_v11 = vrot.slane %v3598_v31, 1  ;;  %v3727_v17 = vrot.slane %v3520_v45, 1  ;;  %v3870_v43 = vrot.slane %v3598_v31, 3 }
 0x164   : > { %v3871_v51 = vrot.slane %v3520_v45, 3  ;;  %v4014_v50 = vrot.slane %v3598_v31, 4  ;;  %v4015_v0 = vrot.slane %v3520_v45, 4  ;;  %5462 = vrcp.f32 %v7403_v20 }
 0x165   : > { %v3728_v29 = vsel %vm1030_vm2, %v3726_v11, %v3727_v17  ;;  %v3639_v62 = vmax.f32 %v3447_v61, %v3520_v45  ;;  %v4573_v8 = vand.u32 2147483647, %v7403_v20  ;;  %v3729_v48 = vrot.slane %v3614_v4, 1 }
 0x166   : > { %v3814_v32 = vmax.f32 %v3638_v30, %v3728_v29  ;;  %v3872_v15 = vsel %vm1247_vm3, %v3870_v43, %v3871_v51  ;;  %5350 = vmatmul.msk.f32.gmra.mxu2 %vm1683_vm4, %v7366_v6  ;;  %v4016_v26 = vsel %vm1464_vm0, %v4014_v50, %v4015_v0  ;;  %v3873_v14 = vrot.slane %v3614_v4, 3 }
 0x167   : > { %v4017_v5 = vrot.slane %v3614_v4, 4  ;;  %5464 = vpow2.f32 %v5396_v39  ;;  %v969_v36 = vmax.f32 %v7373_v33, %v795_v27  ;;  %v3730_v31 = vsel %vm1030_vm2, %v3727_v17, %v3729_v48 }
 0x168   : > { %v3958_v42 = vmax.f32 %v3814_v32, %v3872_v15  ;;  %v3874_v61 = vsel %vm1247_vm3, %v3871_v51, %v3873_v14  ;;  %v1117_v45 = vrot.slane %v795_v27, 1  ;;  %v4575_v43 = vand.u32 2147483648, %v7403_v20 }
 0x169   : > { %v3815_v50 = vmax.f32 %v3639_v62, %v3730_v31  ;;  %v1119_v29 = vrot.slane %v927_v25, 1  ;;  %v4018_v4 = vsel %vm1464_vm0, %v4015_v0, %v4017_v5  ;;  %v1333_v33 = vrot.slane %v7395_v1, 3 }
 0x16a   : > { %v5463_v30 = vpop.eup %5462  ;;  %v4102_v11 = vmax.f32 %v3958_v42, %v4016_v26  ;;  %v1118_v39 = vsel %vm1030_vm2, %v1116_v56, %v1117_v45  ;;  %v1334_v15 = vrot.slane %v795_v27, 3  ;;  %v1336_v62 = vrot.slane %v927_v25, 3 }
 0x16b   : > { %v4565_v37 = vmul.f32 %v5463_v30, %v7403_v20  ;;  %v3959_v17 = vmax.f32 %v3815_v50, %v3874_v61  ;;  %v1120_v51 = vsel %vm1030_vm2, %v1117_v45, %v1119_v29  ;;  %v1233_v32 = vmax.f32 %v968_v58, %v1118_v39 }
 0x16c   : > { %5379 = vmatmul.msk.f32.gmra.mxu3 %vm1683_vm4, %v4102_v11  ;;  %v1234_v48 = vmax.f32 %v969_v36, %v1120_v51  ;;  %v1550_v14 = vrot.slane %v7395_v1, 4  ;;  %vm4570_vm6 = vweird.f32 %v5463_v30  ;;  %v1335_v0 = vsel %vm1247_vm3, %v1333_v33, %v1334_v15  ;;  %v4242_v33 = vpop.f32.mrf.mxu3 }
 0x16d   : > { %v4566_v26 = vsub.f32 1.0, %v4565_v37  ;;  %v5465_v42 = vpop.eup %5464  ;;  %v1551_v5 = vrot.slane %v795_v27, 4  ;;  %v1553_v31 = vrot.slane %v927_v25, 4  ;;  %v1337_v61 = vsel %vm1247_vm3, %v1334_v15, %v1336_v62  ;;  %v3212_v27 = vpop.f32.mrf.mxu2 }
 0x16e   : > { %v7433_v46 = vadd.f32 1.0, %v5465_v42  ;;  %v1450_v11 = vmax.f32 %v1233_v32, %v1335_v0  ;;  %v4103_v45 = vmax.f32 %v3959_v17, %v4018_v4  ;;  %v1451_v58 = vmax.f32 %v1234_v48, %v1337_v61 }
 0x16f   : > { %v4567_v56 = vmul.f32 %v5463_v30, %v4566_v26  ;;  %v1552_v37 = vsel %vm1464_vm0, %v1550_v14, %v1551_v5  ;;  %v1554_v36 = vsel %vm1464_vm0, %v1551_v5, %v1553_v31  ;;  %vm4569_vm7 = vweird.f32 %v7403_v20 }
 0x170   : > { %v4576_v50 = vor.u32 1.1754944e-38, %v4575_v43  ;;  %5466 = vrcp.f32 %v7433_v46  ;;  %vm4571_vm8 = vmor %vm4569_vm7, %vm4570_vm6  ;;  %v4590_v25 = vand.u32 2147483648, %v7433_v46  ;;  %v7442_v29 = vmax.f32 %v1450_v11, %v1552_v37  ;;  %v1809_v11 = vpop.f32.mrf.mxu0 }
 0x171   : > { %v4568_v1 = vadd.f32 %v5463_v30, %v4567_v56  ;;  %v7444_v4 = vmax.f32 %v1451_v58, %v1554_v36  ;;  %v7450_v39 = vmax.f32 %v3353_v55, %v7143_v52  ;;  %vm4574_vm9 = vcmp.eq.f32.partialorder %v4573_v8, 8.507059e+37 }
 0x172   : > { %v3416_v43 = vmax.f32 %v7411_v7, %v7364_v10  ;;  %v3304_v17 = vadd.f32 %v3212_v27, %v7386_v54  ;;  %v4588_v3 = vand.u32 2147483647, %v7433_v46  ;;  %v8586_v55 = vmax.f32 %v7360_v2, %v7281_v38  ;;  %5288 = vmatmul.msk.f32.gmra.mxu0 %vm1683_vm4, %v7442_v29 }
 0x173   : > { %v4572_v20 = vsel %vm4571_vm8, %v5463_v30, %v4568_v1  ;;  %v8587_v54 = vmax.f32 %v7376_v41, %v7283_v16  ;;  %v537_v26 = vmax.f32 %v7193_v53, %v6995_v59  ;;  %v538_v48 = vmax.f32 %v7196_v12, %v6998_v63 }
 0x174   : > { %v4577_v51 = vsel %vm4574_vm9, %v4576_v50, %v4572_v20  ;;  %5380 = vmatmul.msk.f32.gmra.mxu3 %vm1683_vm4, %v4103_v45  ;;  %v2254_v8 = vmax.f32 %v8586_v55, %v7442_v29  ;;  %v4334_v15 = vadd.f32 %v4242_v33, %v3304_v17  ;;  %vm4584_vm10 = vweird.f32 %v7433_v46  ;;  %v2021_v45 = vpop.f32.mrf.mxu1  ;;  %5322 = vmatmul.msk.f32.gmra.mxu1 %vm1683_vm4, %v7070_v40 }
 0x175   : > { %v2255_v30 = vmax.f32 %v8587_v54, %v7444_v4  ;;  %v5044_v32 = vmul.f32 %v4577_v51, %v7334_v19  ;;  %v4591_v2 = vor.u32 1.1754944e-38, %v4590_v25  ;;  %v3417_v41 = vmax.f32 %v7450_v39, %v7366_v6 }
 0x176   : > { %v2347_v62 = vrot.slane %v2254_v8, 6  ;;  %v5467_v42 = vpop.eup %5466  ;;  %v4370_v19 = vmul.f32 %v7312_v24, %v4334_v15  ;;  %v585_v0 = vmax.f32 %v537_v26, %v7066_v23  ;;  %v586_v59 = vmax.f32 %v538_v48, %v7070_v40 }
 0x177   : > { %v2348_v14 = vrot.slane %v2255_v30, 6  ;;  %5077 = vst.msk [vmem:[%s7460_s17] sm:$0xff] %vm5076_vm5, %v5044_v32  ;;  %v2136_v63 = vmax.f32 %v7281_v38, %v7082_v57  ;;  %v4580_v5 = vmul.f32 %v5467_v42, %v7433_v46  ;;  %vm4585_vm11 = vweird.f32 %v5467_v42 }
 0x178   : > { %vm7490_vm12 = vcmp.eq.f32.partialorder %v4588_v3, 8.507059e+37  ;;  %v2441_v61 = vsel %vm741_vm1, -inf, %v2347_v62  ;;  %vm4586_vm13 = vmor %vm4584_vm10, %vm4585_vm11 }
 0x179   : > { %v2349_v56 = vsel %vm741_vm1, %v2347_v62, %v2348_v14  ;;  %v2461_v23 = vsel %vm741_vm1, %v2348_v14, -inf  ;;  %v2494_v58 = vmax.f32 %v2254_v8, %v2441_v61  ;;  %v2613_v37 = vrot.slane %v2441_v61, 1  ;;  %v3215_v14 = vpop.f32.mrf.mxu2 }
 0x17a   : > { %v2495_v57 = vmax.f32 %v2255_v30, %v2349_v56  ;;  %v4581_v36 = vsub.f32 1.0, %v4580_v5  ;;  %v2614_v1 = vrot.slane %v2349_v56, 1  ;;  %v2616_v50 = vrot.slane %v2461_v23, 1  ;;  %5289 = vmatmul.msk.f32.gmra.mxu0 %vm1683_vm4, %v7444_v4 }
 0x17b   : > { %v2793_v27 = vrot.slane %v2441_v61, 3  ;;  %v2794_v25 = vrot.slane %v2349_v56, 3  ;;  %v2796_v33 = vrot.slane %v2461_v23, 3  ;;  %v2973_v20 = vrot.slane %v2441_v61, 4 }
 0x17c   : > { %v2974_v17 = vrot.slane %v2349_v56, 4  ;;  %v4582_v51 = vmul.f32 %v5467_v42, %v4581_v36  ;;  %v2615_v3 = vsel %vm1030_vm2, %v2613_v37, %v2614_v1  ;;  %v2617_v55 = vsel %vm1030_vm2, %v2614_v1, %v2616_v50  ;;  %v4245_v37 = vpop.f32.mrf.mxu3  ;;  %v2024_v36 = vpop.f32.mrf.mxu1  ;;  %5323 = vmatmul.msk.f32.gmra.mxu1 %vm1683_vm4, %v7193_v53 }
 0x17d   : > { %v2976_v54 = vrot.slane %v2461_v23, 4  ;;  %v2714_v40 = vmax.f32 %v2494_v58, %v2615_v3  ;;  %v2715_v8 = vmax.f32 %v2495_v57, %v2617_v55  ;;  %v2795_v30 = vsel %vm1247_vm3, %v2793_v27, %v2794_v25 }
 0x17e   : > { %v2797_v32 = vsel %vm1247_vm3, %v2794_v25, %v2796_v33  ;;  %v4583_v15 = vadd.f32 %v5467_v42, %v4582_v51  ;;  %v2975_v26 = vsel %vm1464_vm0, %v2973_v20, %v2974_v17  ;;  %v7508_v62 = vadd.f32 %v7325_v21, %v4370_v19 }
 0x17f   : > { %v2977_v48 = vsel %vm1464_vm0, %v2974_v17, %v2976_v54  ;;  %v2894_v5 = vmax.f32 %v2714_v40, %v2795_v30  ;;  %v2895_v56 = vmax.f32 %v2715_v8, %v2797_v32  ;;  %v2022_v61 = vadd.f32 %v2021_v45, %v1809_v11  ;;  %v1812_v45 = vpop.f32.mrf.mxu0 }
 0x180   : > { %v7514_v23 = vmax.f32 %v585_v0, %v7349_v13  ;;  %v4587_v58 = vsel %vm4586_vm13, %v5467_v42, %v4583_v15  ;;  %v5397_v57 = vmul.f32 -1.442695, %v7508_v62  ;;  %v7518_v1 = vmax.f32 %v586_v59, %v7353_v35 }
 0x181   : > { %v2137_v19 = vmax.f32 %v7283_v16, %v7084_v9  ;;  %v4592_v46 = vsel %vm7490_vm12, %v4591_v2, %v4587_v58  ;;  %v7526_v0 = vmax.f32 %v2894_v5, %v2975_v26  ;;  %v7528_v42 = vmax.f32 %v2895_v56, %v2977_v48 }
 0x182   : > { %v3305_v11 = vadd.f32 %v3215_v14, %v2022_v61  ;;  %v5045_v50 = vmul.f32 %v4592_v46, %v7384_v22  ;;  %5468 = vpow2.f32 %v5397_v57  ;;  %v796_v59 = vrot.slane %v7514_v23, 6 }
 0x183   : > { %v7533_v9 = vmax.f32 %v2136_v63, %v7164_v44  ;;  %v3448_v31 = vmax.f32 %v3416_v43, %v7526_v0  ;;  %v3449_v2 = vmax.f32 %v3417_v41, %v7528_v42  ;;  %v797_v25 = vrot.slane %v7518_v1, 6  ;;  %5351 = vmatmul.msk.f32.gmra.mxu2 %vm1683_vm4, %v7526_v0 }
 0x184   : > { %v4335_v27 = vadd.f32 %v4245_v37, %v3305_v11  ;;  %5078 = vst.msk [vmem:[%s7460_s17 + $0x8] sm:$0xff] %vm5076_vm5, %v5045_v50  ;;  %v7548_v22 = vadd.f32 %v2024_v36, %v1812_v45  ;;  %v7552_v43 = vsel %vm741_vm1, -inf, %v796_v59  ;;  %v7558_v41 = vmax.f32 %v2137_v19, %v7170_v49 }
 0x185   : > { %v3521_v63 = vrot.slane %v3448_v31, 6  ;;  %v3522_v33 = vrot.slane %v3449_v2, 6  ;;  %v7555_v39 = vsel %vm741_vm1, %v796_v59, %v797_v25  ;;  %v2216_v20 = vmax.f32 %v7533_v9, %v7442_v29 }
 0x186   : > { %v4371_v7 = vmul.f32 %v7312_v24, %v4335_v27  ;;  %v3354_v17 = vmax.f32 %v7364_v10, %v7139_v60  ;;  %v928_v19 = vsel %vm741_vm1, %v797_v25, -inf  ;;  %v970_v45 = vmax.f32 %v7514_v23, %v7552_v43 }
 0x187   : > { %v3523_v51 = vsel %vm741_vm1, %v3521_v63, %v3522_v33  ;;  %v3599_v3 = vsel %vm741_vm1, -inf, %v3521_v63  ;;  %v3615_v55 = vsel %vm741_vm1, %v3522_v33, -inf  ;;  %v1121_v50 = vrot.slane %v7552_v43, 1 }
 0x188   : > { %v7568_v54 = vadd.f32 %v7325_v21, %v4371_v7  ;;  %v5469_v40 = vpop.eup %5468  ;;  %v3640_v8 = vmax.f32 %v3448_v31, %v3599_v3  ;;  %v3731_v30 = vrot.slane %v3599_v3, 1  ;;  %v3732_v32 = vrot.slane %v3523_v51, 1 }
 0x189   : > { %v3875_v15 = vrot.slane %v3599_v3, 3  ;;  %v3876_v26 = vrot.slane %v3523_v51, 3  ;;  %v4019_v48 = vrot.slane %v3599_v3, 4  ;;  %v4020_v14 = vrot.slane %v3523_v51, 4 }
 0x18a   : > { %v7570_v5 = vadd.f32 1.0, %v5469_v40  ;;  %v3733_v56 = vsel %vm1030_vm2, %v3731_v30, %v3732_v32  ;;  %v3641_v61 = vmax.f32 %v3449_v2, %v3523_v51  ;;  %v3734_v58 = vrot.slane %v3615_v55, 1 }
 0x18b   : > { %v3878_v57 = vrot.slane %v3615_v55, 3  ;;  %v3816_v37 = vmax.f32 %v3640_v8, %v3733_v56  ;;  %v3877_v36 = vsel %vm1247_vm3, %v3875_v15, %v3876_v26  ;;  %5352 = vmatmul.msk.f32.gmra.mxu2 %vm1683_vm4, %v7528_v42  ;;  %v4021_v46 = vsel %vm1464_vm0, %v4019_v48, %v4020_v14 }
 0x18c   : > { %5470 = vrcp.f32 %v7570_v5  ;;  %v3735_v11 = vsel %vm1030_vm2, %v3732_v32, %v3734_v58  ;;  %v4022_v27 = vrot.slane %v3615_v55, 4  ;;  %v4603_v63 = vand.u32 2147483647, %v7570_v5 }
 0x18d   : > { %v3960_v59 = vmax.f32 %v3816_v37, %v3877_v36  ;;  %v3817_v31 = vmax.f32 %v3641_v61, %v3735_v11  ;;  %v3879_v2 = vsel %vm1247_vm3, %v3876_v26, %v3878_v57  ;;  %v5398_v25 = vmul.f32 -1.442695, %v7568_v54 }
 0x18e   : > { %v971_v33 = vmax.f32 %v7518_v1, %v7555_v39  ;;  %v1122_v7 = vrot.slane %v7555_v39, 1  ;;  %v4023_v23 = vsel %vm1464_vm0, %v4020_v14, %v4022_v27  ;;  %v1124_v40 = vrot.slane %v928_v19, 1  ;;  %v5604_v27 = vld [vmem:[%s5719_s28 + $0xd0] sm:$0xff] }
 0x18f   : > { %v4104_v51 = vmax.f32 %v3960_v59, %v4021_v46  ;;  %v3961_v3 = vmax.f32 %v3817_v31, %v3879_v2  ;;  %vm4599_vm14 = vweird.f32 %v7570_v5  ;;  %5472 = vpow2.f32 %v5398_v25 }
 0x190   : > { %v1123_v8 = vsel %vm1030_vm2, %v1121_v50, %v1122_v7  ;;  %v1338_v55 = vrot.slane %v7552_v43, 3  ;;  %v1339_v30 = vrot.slane %v7555_v39, 3  ;;  %v4605_v1 = vand.u32 2147483648, %v7570_v5 }
 0x191   : > { %5381 = vmatmul.msk.f32.gmra.mxu3 %vm1683_vm4, %v4104_v51  ;;  %v1125_v15 = vsel %vm1030_vm2, %v1122_v7, %v1124_v40  ;;  %v1235_v26 = vmax.f32 %v970_v45, %v1123_v8  ;;  %v1341_v48 = vrot.slane %v928_v19, 3  ;;  %v4105_v56 = vmax.f32 %v3961_v3, %v4023_v23  ;;  %v4248_v8 = vpop.f32.mrf.mxu3 }
 0x192   : > { %v5471_v32 = vpop.eup %5470  ;;  %v1236_v61 = vmax.f32 %v971_v33, %v1125_v15  ;;  %v1340_v58 = vsel %vm1247_vm3, %v1338_v55, %v1339_v30  ;;  %v1555_v36 = vrot.slane %v7552_v43, 4  ;;  %v1556_v46 = vrot.slane %v7555_v39, 4 }
 0x193   : > { %v4595_v14 = vmul.f32 %v5471_v32, %v7570_v5  ;;  %v1342_v57 = vsel %vm1247_vm3, %v1339_v30, %v1341_v48  ;;  %v1452_v37 = vmax.f32 %v1235_v26, %v1340_v58  ;;  %vm4600_vm15 = vweird.f32 %v5471_v32 }
 0x194   : > { %v1453_v50 = vmax.f32 %v1236_v61, %v1342_v57  ;;  %v1558_v59 = vrot.slane %v928_v19, 4  ;;  %v1557_v45 = vsel %vm1464_vm0, %v1555_v36, %v1556_v46  ;;  %v3355_v31 = vmax.f32 %v7366_v6, %v7143_v52  ;;  %v3218_v52 = vpop.f32.mrf.mxu2  ;;  %vm4601_vm7 = vmor %vm4599_vm14, %vm4600_vm15 }
 0x195   : > { %v4596_v11 = vsub.f32 1.0, %v4595_v14  ;;  %v7609_v2 = vmax.f32 %v3354_v17, %v7246_v47  ;;  %v539_v43 = vmax.f32 %v7349_v13, %v5604_v27  ;;  %v5473_v39 = vpop.eup %5472  ;;  %v7614_v19 = vmax.f32 %v1452_v37, %v1557_v45 }
 0x196   : > { %v1559_v33 = vsel %vm1464_vm0, %v1556_v46, %v1558_v59  ;;  %v2217_v7 = vmax.f32 %v7558_v41, %v7444_v4  ;;  %vm7618_vm6 = vcmp.eq.f32.partialorder %v4603_v63, 8.507059e+37  ;;  %v7622_v60 = vadd.f32 1.0, %v5473_v39  ;;  %v5605_v63 = vld [vmem:[%s5719_s28 + $0xd8] sm:$0xff] }
 0x197   : > { %v4597_v25 = vmul.f32 %v5471_v32, %v4596_v11  ;;  %v7624_v17 = vmax.f32 %v1453_v50, %v1559_v33  ;;  %v7627_v3 = vmax.f32 %v3355_v31, %v7251_v18  ;;  %v2256_v40 = vmax.f32 %v2216_v20, %v7614_v19  ;;  %5290 = vmatmul.msk.f32.gmra.mxu0 %vm1683_vm4, %v7614_v19  ;;  %v1815_v11 = vpop.f32.mrf.mxu0  ;;  %v2027_v50 = vpop.f32.mrf.mxu1 }
 0x198   : > { %v3306_v41 = vadd.f32 %v3218_v52, %v7548_v22  ;;  %v540_v55 = vmax.f32 %v7353_v35, %v5605_v63  ;;  %v4606_v30 = vor.u32 1.1754944e-38, %v4605_v1  ;;  %5474 = vrcp.f32 %v7622_v60  ;;  %5324 = vmatmul.msk.f32.gmra.mxu1 %vm1683_vm4, %v7196_v12 }
 0x199   : > { %v4598_v23 = vadd.f32 %v5471_v32, %v4597_v25  ;;  %5382 = vmatmul.msk.f32.gmra.mxu3 %vm1683_vm4, %v4105_v56  ;;  %v3418_v9 = vmax.f32 %v7609_v2, %v7526_v0  ;;  %v7646_v22 = vmax.f32 %v539_v43, %v7193_v53  ;;  %v4618_v15 = vand.u32 2147483647, %v7622_v60 }
 0x19a   : > { %v2257_v26 = vmax.f32 %v2217_v7, %v7624_v17  ;;  %v2350_v48 = vrot.slane %v2256_v40, 6  ;;  %v4620_v1 = vand.u32 2147483648, %v7622_v60  ;;  %v3419_v14 = vmax.f32 %v7627_v3, %v7528_v42 }
 0x19b   : > { %v4602_v20 = vsel %vm4601_vm7, %v5471_v32, %v4598_v23  ;;  %v4336_v56 = vadd.f32 %v4248_v8, %v3306_v41  ;;  %v7658_v58 = vmax.f32 %v540_v55, %v7196_v12  ;;  %v2028_v31 = vadd.f32 %v2027_v50, %v1815_v11 }
 0x19c   : > { %v4607_v5 = vsel %vm7618_vm6, %v4606_v30, %v4602_v20  ;;  %v2351_v53 = vrot.slane %v2257_v26, 6  ;;  %v2442_v32 = vsel %vm741_vm1, -inf, %v2350_v48  ;;  %v3221_v12 = vpop.f32.mrf.mxu2  ;;  %vm4614_vm9 = vweird.f32 %v7622_v60 }
 0x19d   : > { %v5046_v61 = vmul.f32 %v4607_v5, %v7508_v62  ;;  %v2496_v57 = vmax.f32 %v2256_v40, %v2442_v32  ;;  %v2618_v37 = vrot.slane %v2442_v32, 1  ;;  %v2798_v36 = vrot.slane %v2442_v32, 3 }
 0x19e   : > { %v2978_v46 = vrot.slane %v2442_v32, 4  ;;  %v2352_v59 = vsel %vm741_vm1, %v2350_v48, %v2351_v53  ;;  %v2462_v62 = vsel %vm741_vm1, %v2351_v53, -inf  ;;  %v4372_v45 = vmul.f32 %v7312_v24, %v4336_v56  ;;  %v5475_v27 = vpop.eup %5474 }
 0x19f   : > { %5079 = vst.msk [vmem:[%s7460_s17 + $0x10] sm:$0xff] %vm5076_vm5, %v5046_v61  ;;  %v2497_v43 = vmax.f32 %v2257_v26, %v2352_v59  ;;  %v2619_v39 = vrot.slane %v2352_v59, 1  ;;  %v2621_v25 = vrot.slane %v2462_v62, 1  ;;  %v2799_v33 = vrot.slane %v2352_v59, 3  ;;  %5291 = vmatmul.msk.f32.gmra.mxu0 %vm1683_vm4, %v7624_v17  ;;  %v4251_v26 = vpop.f32.mrf.mxu3  ;;  %v2030_v50 = vpop.f32.mrf.mxu1 }
 0x1a0   : > { %v4610_v7 = vmul.f32 %v5475_v27, %v7622_v60  ;;  %vm4615_vm8 = vweird.f32 %v5475_v27  ;;  %v2801_v52 = vrot.slane %v2462_v62, 3  ;;  %v2979_v51 = vrot.slane %v2352_v59, 4  ;;  %5325 = vmatmul.msk.f32.gmra.mxu1 %vm1683_vm4, %v7349_v13 }
 0x1a1   : > { %v2620_v23 = vsel %vm1030_vm2, %v2618_v37, %v2619_v39  ;;  %v2622_v40 = vsel %vm1030_vm2, %v2619_v39, %v2621_v25  ;;  %v2800_v41 = vsel %vm1247_vm3, %v2798_v36, %v2799_v33  ;;  %v2981_v8 = vrot.slane %v2462_v62, 4  ;;  %vm4616_vm11 = vmor %vm4614_vm9, %vm4615_vm8 }
 0x1a2   : > { %v4611_v63 = vsub.f32 1.0, %v4610_v7  ;;  %v2716_v55 = vmax.f32 %v2496_v57, %v2620_v23  ;;  %v2717_v30 = vmax.f32 %v2497_v43, %v2622_v40  ;;  %v2802_v20 = vsel %vm1247_vm3, %v2799_v33, %v2801_v52 }
 0x1a3   : > { %v2980_v48 = vsel %vm1464_vm0, %v2978_v46, %v2979_v51  ;;  %v2982_v5 = vsel %vm1464_vm0, %v2979_v51, %v2981_v8  ;;  %v7677_v56 = vadd.f32 %v7325_v21, %v4372_v45  ;;  %v3307_v61 = vadd.f32 %v3221_v12, %v2028_v31 }
 0x1a4   : > { %v4612_v53 = vmul.f32 %v5475_v27, %v4611_v63  ;;  %v2896_v32 = vmax.f32 %v2716_v55, %v2800_v41  ;;  %v2897_v37 = vmax.f32 %v2717_v30, %v2802_v20  ;;  %v799_v36 = vrot.slane %v7646_v22, 6 }
 0x1a5   : > { %v5399_v57 = vmul.f32 -1.442695, %v7677_v56  ;;  %v4337_v11 = vadd.f32 %v4251_v26, %v3307_v61  ;;  %v800_v59 = vrot.slane %v7658_v58, 6  ;;  %vm4619_vm10 = vcmp.eq.f32.partialorder %v4618_v15, 8.507059e+37 }
 0x1a6   : > { %v4613_v46 = vadd.f32 %v5475_v27, %v4612_v53  ;;  %v7685_v62 = vmax.f32 %v2896_v32, %v2980_v48  ;;  %v7687_v45 = vmax.f32 %v2897_v37, %v2982_v5  ;;  %v4621_v31 = vor.u32 1.1754944e-38, %v4620_v1 }
 0x1a7   : > { %5476 = vpow2.f32 %v5399_v57  ;;  %v4373_v60 = vmul.f32 %v7312_v24, %v4337_v11  ;;  %v7692_v43 = vsel %vm741_vm1, %v799_v36, %v800_v59  ;;  %v7703_v1 = vsel %vm741_vm1, -inf, %v799_v36  ;;  %v1818_v36 = vpop.f32.mrf.mxu0 }
 0x1a8   : > { %v4617_v39 = vsel %vm4616_vm11, %v5475_v27, %v4613_v46  ;;  %v3450_v15 = vmax.f32 %v3418_v9, %v7685_v62  ;;  %v3451_v25 = vmax.f32 %v3419_v14, %v7687_v45  ;;  %5353 = vmatmul.msk.f32.gmra.mxu2 %vm1683_vm4, %v7685_v62  ;;  %v2138_v2 = vmax.f32 %v7442_v29, %v7164_v44 }
 0x1a9   : > { %v4622_v24 = vsel %vm4619_vm10, %v4621_v31, %v4617_v39  ;;  %v7708_v27 = vadd.f32 %v7325_v21, %v4373_v60  ;;  %v7714_v3 = vsel %vm741_vm1, %v800_v59, -inf  ;;  %v972_v52 = vmax.f32 %v7646_v22, %v7703_v1 }
 0x1aa   : > { %v5047_v9 = vmul.f32 %v4622_v24, %v7568_v54  ;;  %v3524_v33 = vrot.slane %v3450_v15, 6  ;;  %v3525_v7 = vrot.slane %v3451_v25, 6  ;;  %v973_v51 = vmax.f32 %v7658_v58, %v7692_v43 }
 0x1ab   : > { %v5400_v14 = vmul.f32 -1.442695, %v7708_v27  ;;  %v1126_v21 = vrot.slane %v7703_v1, 1  ;;  %v1127_v40 = vrot.slane %v7692_v43, 1  ;;  %v1129_v57 = vrot.slane %v7714_v3, 1 }
 0x1ac   : > { %5080 = vst.msk [vmem:[%s7460_s17 + $0x18] sm:$0xff] %vm5076_vm5, %v5047_v9  ;;  %v3526_v12 = vsel %vm741_vm1, %v3524_v33, %v3525_v7  ;;  %v3600_v54 = vsel %vm741_vm1, -inf, %v3524_v33  ;;  %v3616_v23 = vsel %vm741_vm1, %v3525_v7, -inf  ;;  %v1343_v46 = vrot.slane %v7703_v1, 3 }
 0x1ad   : > { %v5477_v41 = vpop.eup %5476  ;;  %v3642_v8 = vmax.f32 %v3450_v15, %v3600_v54  ;;  %v3736_v63 = vrot.slane %v3600_v54, 1  ;;  %v3737_v55 = vrot.slane %v3526_v12, 1  ;;  %v3880_v22 = vrot.slane %v3600_v54, 3 }
 0x1ae   : > { %v3881_v30 = vrot.slane %v3526_v12, 3  ;;  %v4024_v20 = vrot.slane %v3600_v54, 4  ;;  %v4025_v58 = vrot.slane %v3526_v12, 4  ;;  %v7728_v26 = vadd.f32 1.0, %v5477_v41 }
 0x1af   : > { %v3738_v48 = vsel %vm1030_vm2, %v3736_v63, %v3737_v55  ;;  %v3643_v5 = vmax.f32 %v3451_v25, %v3526_v12  ;;  %v3739_v61 = vrot.slane %v3616_v23, 1  ;;  %v3883_v53 = vrot.slane %v3616_v23, 3 }
 0x1b0   : > { %v3818_v32 = vmax.f32 %v3642_v8, %v3738_v48  ;;  %v3882_v37 = vsel %vm1247_vm3, %v3880_v22, %v3881_v30  ;;  %5478 = vrcp.f32 %v7728_v26  ;;  %5354 = vmatmul.msk.f32.gmra.mxu2 %vm1683_vm4, %v7687_v45  ;;  %v4026_v11 = vsel %vm1464_vm0, %v4024_v20, %v4025_v58 }
 0x1b1   : > { %v3740_v59 = vsel %vm1030_vm2, %v3737_v55, %v3739_v61  ;;  %v1344_v31 = vrot.slane %v7692_v43, 3  ;;  %v3884_v15 = vsel %vm1247_vm3, %v3881_v30, %v3883_v53  ;;  %v4027_v25 = vrot.slane %v3616_v23, 4 }
 0x1b2   : > { %v3962_v60 = vmax.f32 %v3818_v32, %v3882_v37  ;;  %v3819_v39 = vmax.f32 %v3643_v5, %v3740_v59  ;;  %v4633_v24 = vand.u32 2147483647, %v7728_v26  ;;  %5480 = vpow2.f32 %v5400_v14 }
 0x1b3   : > { %v2031_v9 = vadd.f32 %v2030_v50, %v1818_v36  ;;  %v1128_v33 = vsel %vm1030_vm2, %v1126_v21, %v1127_v40  ;;  %v4028_v54 = vsel %vm1464_vm0, %v4025_v58, %v4027_v25  ;;  %v1130_v41 = vsel %vm1030_vm2, %v1127_v40, %v1129_v57 }
 0x1b4   : > { %v4106_v7 = vmax.f32 %v3962_v60, %v4026_v11  ;;  %v3963_v12 = vmax.f32 %v3819_v39, %v3884_v15  ;;  %v1237_v8 = vmax.f32 %v972_v52, %v1128_v33  ;;  %v1238_v63 = vmax.f32 %v973_v51, %v1130_v41 }
 0x1b5   : > { %v1345_v55 = vsel %vm1247_vm3, %v1343_v46, %v1344_v31  ;;  %v1346_v22 = vrot.slane %v7714_v3, 3  ;;  %v4635_v14 = vand.u32 2147483648, %v7728_v26  ;;  %v1560_v50 = vrot.slane %v7703_v1, 4 }
 0x1b6   : > { %v5479_v30 = vpop.eup %5478  ;;  %5383 = vmatmul.msk.f32.gmra.mxu3 %vm1683_vm4, %v4106_v7  ;;  %v1561_v21 = vrot.slane %v7692_v43, 4  ;;  %v1563_v23 = vrot.slane %v7714_v3, 4  ;;  %v4107_v40 = vmax.f32 %v3963_v12, %v4028_v54  ;;  %v1454_v51 = vmax.f32 %v1237_v8, %v1345_v55 }
 0x1b7   : > { %v4625_v20 = vmul.f32 %v5479_v30, %v7728_v26  ;;  %v1347_v52 = vsel %vm1247_vm3, %v1344_v31, %v1346_v22  ;;  %v2139_v61 = vmax.f32 %v7444_v4, %v7170_v49  ;;  %v2178_v43 = vmax.f32 %v2138_v2, %v7281_v38  ;;  %v3224_v2 = vpop.f32.mrf.mxu2  ;;  %v5607_v22 = vld [vmem:[%s5719_s28 + $0xe8] sm:$0xff] }
 0x1b8   : > { %v1455_v58 = vmax.f32 %v1238_v63, %v1347_v52  ;;  %v1562_v48 = vsel %vm1464_vm0, %v1560_v50, %v1561_v21  ;;  %v1564_v5 = vsel %vm1464_vm0, %v1561_v21, %v1563_v23  ;;  %v5481_v53 = vpop.eup %5480  ;;  %v3356_v3 = vmax.f32 %v7526_v0, %v7246_v47 }
 0x1b9   : > { %v4626_v1 = vsub.f32 1.0, %v4625_v20  ;;  %v7758_v32 = vmax.f32 %v1454_v51, %v1562_v48  ;;  %vm4630_vm12 = vweird.f32 %v5479_v30  ;;  %v7766_v37 = vadd.f32 1.0, %v5481_v53 }
 0x1ba   : > { %v2179_v36 = vmax.f32 %v2139_v61, %v7283_v16  ;;  %v3357_v49 = vmax.f32 %v7528_v42, %v7251_v18  ;;  %v7771_v11 = vmax.f32 %v1455_v58, %v1564_v5  ;;  %v2218_v59 = vmax.f32 %v2178_v43, %v7614_v19  ;;  %v5606_v18 = vld [vmem:[%s5719_s28 + $0xe0] sm:$0xff]  ;;  %v2033_v58 = vpop.f32.mrf.mxu1  ;;  %5326 = vmatmul.msk.f32.gmra.mxu1 %vm1683_vm4, %v7353_v35  ;;  %v1821_v61 = vpop.f32.mrf.mxu0 }
 0x1bb   : > { %v4627_v57 = vmul.f32 %v5479_v30, %v4626_v1  ;;  %v7775_v44 = vmax.f32 %v3356_v3, %v7364_v10  ;;  %5292 = vmatmul.msk.f32.gmra.mxu0 %vm1683_vm4, %v7758_v32  ;;  %vm4629_vm13 = vweird.f32 %v7728_v26  ;;  %vm7780_vm14 = vcmp.eq.f32.partialorder %v4633_v24, 8.507059e+37  ;;  %v4254_v26 = vpop.f32.mrf.mxu3 }
 0x1bc   : > { %5482 = vrcp.f32 %v7766_v37  ;;  %v7787_v46 = vmax.f32 %v5606_v18, %v7349_v13  ;;  %v2219_v60 = vmax.f32 %v2179_v36, %v7624_v17  ;;  %v2258_v39 = vmax.f32 %v2218_v59, %v7758_v32  ;;  %vm4631_vm15 = vmor %vm4629_vm13, %vm4630_vm12  ;;  %v7828_v18 = vld [vmem:[%s8540_s4] ss:$0 sm:$0xff] }
 0x1bd   : > { %v4628_v31 = vadd.f32 %v5479_v30, %v4627_v57  ;;  %v7792_v15 = vmax.f32 %v3357_v49, %v7366_v6  ;;  %v4636_v25 = vor.u32 1.1754944e-38, %v4635_v14  ;;  %v4648_v24 = vand.u32 2147483647, %v7766_v37 }
 0x1be   : > { %5384 = vmatmul.msk.f32.gmra.mxu3 %vm1683_vm4, %v4107_v40  ;;  %v4650_v13 = vand.u32 2147483648, %v7766_v37  ;;  %v3308_v33 = vadd.f32 %v3224_v2, %v2031_v9  ;;  %v2259_v12 = vmax.f32 %v2219_v60, %v7771_v11  ;;  %v2353_v54 = vrot.slane %v2258_v39, 6 }
 0x1bf   : > { %v4632_v7 = vsel %vm4631_vm15, %v5479_v30, %v4628_v31  ;;  %v3420_v41 = vmax.f32 %v7775_v44, %v7685_v62  ;;  %v3421_v63 = vmax.f32 %v7792_v15, %v7687_v45  ;;  %v7807_v14 = vmax.f32 %v5607_v22, %v7353_v35 }
 0x1c0   : > { %v4637_v8 = vsel %vm7780_vm14, %v4636_v25, %v4632_v7  ;;  %v4338_v55 = vadd.f32 %v4254_v26, %v3308_v33  ;;  %vm4644_vm6 = vweird.f32 %v7766_v37  ;;  %v2354_v30 = vrot.slane %v2259_v12, 6  ;;  %v3227_v33 = vpop.f32.mrf.mxu2 }
 0x1c1   : > { %v5048_v9 = vmul.f32 %v4637_v8, %v7677_v56  ;;  %v2443_v50 = vsel %vm741_vm1, -inf, %v2353_v54  ;;  %v802_v21 = vrot.slane %v7787_v46, 6  ;;  %v2034_v22 = vadd.f32 %v2033_v58, %v1821_v61 }
 0x1c2   : > { %v5483_v23 = vpop.eup %5482  ;;  %v2498_v20 = vmax.f32 %v2258_v39, %v2443_v50  ;;  %v2623_v40 = vrot.slane %v2443_v50, 1  ;;  %v2803_v52 = vrot.slane %v2443_v50, 3  ;;  %v2983_v51 = vrot.slane %v2443_v50, 4 }
 0x1c3   : > { %5081 = vst.msk [vmem:[%s7460_s17 + $0x20] sm:$0xff] %vm5076_vm5, %v5048_v9  ;;  %v4640_v56 = vmul.f32 %v5483_v23, %v7766_v37  ;;  %vm4645_vm7 = vweird.f32 %v5483_v23  ;;  %v2355_v48 = vsel %vm741_vm1, %v2353_v54, %v2354_v30  ;;  %v2463_v5 = vsel %vm741_vm1, %v2354_v30, -inf  ;;  %5293 = vmatmul.msk.f32.gmra.mxu0 %vm1683_vm4, %v7771_v11  ;;  %v7837_v54 = vld [vmem:[%s8541_s5] ss:$0 sm:$0xff]  ;;  %v4257_v50 = vpop.f32.mrf.mxu3 }
 0x1c4   : > { %v2499_v53 = vmax.f32 %v2259_v12, %v2355_v48  ;;  %v2624_v1 = vrot.slane %v2355_v48, 1  ;;  %v2626_v43 = vrot.slane %v2463_v5, 1  ;;  %v2804_v3 = vrot.slane %v2355_v48, 3  ;;  %vm4646_vm8 = vmor %vm4644_vm6, %vm4645_vm7 }
 0x1c5   : > { %v4641_v36 = vsub.f32 1.0, %v4640_v56  ;;  %v2806_v49 = vrot.slane %v2463_v5, 3  ;;  %v2984_v35 = vrot.slane %v2355_v48, 4  ;;  %v2986_v57 = vrot.slane %v2463_v5, 4 }
 0x1c6   : > { %v2625_v59 = vsel %vm1030_vm2, %v2623_v40, %v2624_v1  ;;  %v2627_v2 = vsel %vm1030_vm2, %v2624_v1, %v2626_v43  ;;  %v2805_v47 = vsel %vm1247_vm3, %v2803_v52, %v2804_v3  ;;  %v4374_v31 = vmul.f32 %v7828_v18, %v4338_v55 }
 0x1c7   : > { %v4642_v60 = vmul.f32 %v5483_v23, %v4641_v36  ;;  %v2718_v39 = vmax.f32 %v2498_v20, %v2625_v59  ;;  %v2719_v26 = vmax.f32 %v2499_v53, %v2627_v2  ;;  %v2807_v25 = vsel %vm1247_vm3, %v2804_v3, %v2806_v49 }
 0x1c8   : > { %v2985_v7 = vsel %vm1464_vm0, %v2983_v51, %v2984_v35  ;;  %v2987_v12 = vsel %vm1464_vm0, %v2984_v35, %v2986_v57  ;;  %v7840_v8 = vadd.f32 %v7837_v54, %v4374_v31  ;;  %v803_v20 = vrot.slane %v7807_v14, 6 }
 0x1c9   : > { %v4643_v55 = vadd.f32 %v5483_v23, %v4642_v60  ;;  %v2898_v9 = vmax.f32 %v2718_v39, %v2805_v47  ;;  %v2899_v30 = vmax.f32 %v2719_v26, %v2807_v25  ;;  %vm4649_vm9 = vcmp.eq.f32.partialorder %v4648_v24, 8.507059e+37 }
 0x1ca   : > { %v4651_v40 = vor.u32 1.1754944e-38, %v4650_v13  ;;  %v5401_v52 = vmul.f32 -1.442695, %v7840_v8  ;;  %v3309_v51 = vadd.f32 %v3227_v33, %v2034_v22  ;;  %v7852_v5 = vsel %vm741_vm1, -inf, %v802_v21 }
 0x1cb   : > { %v4647_v56 = vsel %vm4646_vm8, %v5483_v23, %v4643_v55  ;;  %v7847_v48 = vmax.f32 %v2898_v9, %v2985_v7  ;;  %v7849_v58 = vmax.f32 %v2899_v30, %v2987_v12  ;;  %v7855_v37 = vsel %vm741_vm1, %v802_v21, %v803_v20 }
 0x1cc   : > { %v4652_v61 = vsel %vm4649_vm9, %v4651_v40, %v4647_v56  ;;  %5484 = vpow2.f32 %v5401_v52  ;;  %v4339_v53 = vadd.f32 %v4257_v50, %v3309_v51  ;;  %v7867_v1 = vsel %vm741_vm1, %v803_v20, -inf  ;;  %v1824_v20 = vpop.f32.mrf.mxu0  ;;  %v2036_v40 = vpop.f32.mrf.mxu1 }
 0x1cd   : > { %v5049_v24 = vmul.f32 %v4652_v61, %v7708_v27  ;;  %v3452_v13 = vmax.f32 %v3420_v41, %v7847_v48  ;;  %v3453_v23 = vmax.f32 %v3421_v63, %v7849_v58  ;;  %5355 = vmatmul.msk.f32.gmra.mxu2 %vm1683_vm4, %v7847_v48  ;;  %v2140_v27 = vmax.f32 %v7614_v19, %v7281_v38 }
 0x1ce   : > { %v4375_v21 = vmul.f32 %v7828_v18, %v4339_v53  ;;  %v2141_v44 = vmax.f32 %v7624_v17, %v7283_v16  ;;  %v974_v15 = vmax.f32 %v7787_v46, %v7852_v5  ;;  %v975_v63 = vmax.f32 %v7807_v14, %v7855_v37 }
 0x1cf   : > { %5082 = vst.msk [vmem:[%s7460_s17 + $0x28] sm:$0xff] %vm5076_vm5, %v5049_v24  ;;  %v3527_v41 = vrot.slane %v3452_v13, 6  ;;  %v3528_v43 = vrot.slane %v3453_v23, 6  ;;  %v1131_v36 = vrot.slane %v7852_v5, 1  ;;  %v1132_v49 = vrot.slane %v7855_v37, 1 }
 0x1d0   : > { %v7883_v3 = vadd.f32 %v7837_v54, %v4375_v21  ;;  %v1134_v35 = vrot.slane %v7867_v1, 1  ;;  %v1348_v46 = vrot.slane %v7852_v5, 3  ;;  %v1349_v52 = vrot.slane %v7855_v37, 3 }
 0x1d1   : > { %v3529_v57 = vsel %vm741_vm1, %v3527_v41, %v3528_v43  ;;  %v3601_v59 = vsel %vm741_vm1, -inf, %v3527_v41  ;;  %v3617_v2 = vsel %vm741_vm1, %v3528_v43, -inf  ;;  %v1133_v61 = vsel %vm1030_vm2, %v1131_v36, %v1132_v49 }
 0x1d2   : > { %v5485_v47 = vpop.eup %5484  ;;  %v3644_v31 = vmax.f32 %v3452_v13, %v3601_v59  ;;  %v3741_v14 = vrot.slane %v3601_v59, 1  ;;  %v3742_v60 = vrot.slane %v3529_v57, 1  ;;  %v3885_v39 = vrot.slane %v3601_v59, 3 }
 0x1d3   : > { %v3886_v26 = vrot.slane %v3529_v57, 3  ;;  %v4029_v25 = vrot.slane %v3601_v59, 4  ;;  %v4030_v33 = vrot.slane %v3529_v57, 4  ;;  %v7892_v7 = vadd.f32 1.0, %v5485_v47 }
 0x1d4   : > { %v3743_v12 = vsel %vm1030_vm2, %v3741_v14, %v3742_v60  ;;  %v3645_v22 = vmax.f32 %v3453_v23, %v3529_v57  ;;  %v3744_v55 = vrot.slane %v3617_v2, 1  ;;  %v3888_v9 = vrot.slane %v3617_v2, 3 }
 0x1d5   : > { %v3820_v30 = vmax.f32 %v3644_v31, %v3743_v12  ;;  %v3887_v50 = vsel %vm1247_vm3, %v3885_v39, %v3886_v26  ;;  %5486 = vrcp.f32 %v7892_v7  ;;  %5356 = vmatmul.msk.f32.gmra.mxu2 %vm1683_vm4, %v7849_v58  ;;  %v4031_v51 = vsel %vm1464_vm0, %v4029_v25, %v4030_v33 }
 0x1d6   : > { %v3745_v56 = vsel %vm1030_vm2, %v3742_v60, %v3744_v55  ;;  %v1351_v53 = vrot.slane %v7867_v1, 3  ;;  %v3889_v23 = vsel %vm1247_vm3, %v3886_v26, %v3888_v9  ;;  %v4032_v21 = vrot.slane %v3617_v2, 4 }
 0x1d7   : > { %v3964_v24 = vmax.f32 %v3820_v30, %v3887_v50  ;;  %v3821_v13 = vmax.f32 %v3645_v22, %v3745_v56  ;;  %v4663_v41 = vand.u32 2147483647, %v7892_v7  ;;  %v5402_v43 = vmul.f32 -1.442695, %v7883_v3 }
 0x1d8   : > { %v2037_v57 = vadd.f32 %v2036_v40, %v1824_v20  ;;  %v1135_v59 = vsel %vm1030_vm2, %v1132_v49, %v1134_v35  ;;  %v4033_v14 = vsel %vm1464_vm0, %v4030_v33, %v4032_v21  ;;  %v1239_v60 = vmax.f32 %v974_v15, %v1133_v61  ;;  %v4260_v40 = vpop.f32.mrf.mxu3 }
 0x1d9   : > { %v4108_v47 = vmax.f32 %v3964_v24, %v4031_v51  ;;  %v3965_v31 = vmax.f32 %v3821_v13, %v3889_v23  ;;  %5488 = vpow2.f32 %v5402_v43  ;;  %v1240_v36 = vmax.f32 %v975_v63, %v1135_v59  ;;  %v7953_v43 = vld [vmem:[%s5719_s28 + $0xf0] sm:$0xff] }
 0x1da   : > { %v1350_v39 = vsel %vm1247_vm3, %v1348_v46, %v1349_v52  ;;  %v1352_v25 = vsel %vm1247_vm3, %v1349_v52, %v1351_v53  ;;  %v4665_v2 = vand.u32 2147483648, %v7892_v7  ;;  %v1565_v22 = vrot.slane %v7852_v5, 4 }
 0x1db   : > { %v5487_v26 = vpop.eup %5486  ;;  %5385 = vmatmul.msk.f32.gmra.mxu3 %vm1683_vm4, %v4108_v47  ;;  %v1456_v12 = vmax.f32 %v1239_v60, %v1350_v39  ;;  %v1566_v49 = vrot.slane %v7855_v37, 4  ;;  %v4109_v33 = vmax.f32 %v3965_v31, %v4033_v14  ;;  %v1457_v15 = vmax.f32 %v1240_v36, %v1352_v25  ;;  %v7961_v36 = vld [vmem:[%s5719_s28 + $0xf8] sm:$0xff] }
 0x1dc   : > { %v4655_v35 = vmul.f32 %v5487_v26, %v7892_v7  ;;  %v1568_v63 = vrot.slane %v7867_v1, 4  ;;  %v2180_v55 = vmax.f32 %v2140_v27, %v7442_v29  ;;  %v2181_v5 = vmax.f32 %v2141_v44, %v7444_v4  ;;  %v3230_v44 = vpop.f32.mrf.mxu2 }
 0x1dd   : > { %v1567_v46 = vsel %vm1464_vm0, %v1565_v22, %v1566_v49  ;;  %v3358_v37 = vmax.f32 %v7685_v62, %v7364_v10  ;;  %v3359_v1 = vmax.f32 %v7687_v45, %v7366_v6  ;;  %vm4660_vm10 = vweird.f32 %v5487_v26 }
 0x1de   : > { %v4656_v9 = vsub.f32 1.0, %v4655_v35  ;;  %v1569_v30 = vsel %vm1464_vm0, %v1566_v49, %v1568_v63  ;;  %v7929_v50 = vmax.f32 %v1456_v12, %v1567_v46  ;;  %v2220_v38 = vmax.f32 %v2180_v55, %v7758_v32 }
 0x1df   : > { %v7933_v20 = vmax.f32 %v1457_v15, %v1569_v30  ;;  %v2221_v27 = vmax.f32 %v2181_v5, %v7771_v11  ;;  %v7938_v16 = vmax.f32 %v3358_v37, %v7526_v0  ;;  %v5489_v10 = vpop.eup %5488  ;;  %v7941_v51 = vmax.f32 %v3359_v1, %v7528_v42 }
 0x1e0   : > { %v4657_v52 = vmul.f32 %v5487_v26, %v4656_v9  ;;  %v3310_v56 = vadd.f32 %v3230_v44, %v2037_v57  ;;  %v7943_v6 = vadd.f32 1.0, %v5489_v10  ;;  %v2260_v61 = vmax.f32 %v2220_v38, %v7929_v50  ;;  %v1827_v44 = vpop.f32.mrf.mxu0 }
 0x1e1   : > { %v2261_v53 = vmax.f32 %v2221_v27, %v7933_v20  ;;  %vm4659_vm11 = vweird.f32 %v7892_v7  ;;  %vm4664_vm12 = vcmp.eq.f32.partialorder %v4663_v41, 8.507059e+37  ;;  %v4666_v23 = vor.u32 1.1754944e-38, %v4665_v2 }
 0x1e2   : > { %v4658_v24 = vadd.f32 %v5487_v26, %v4657_v52  ;;  %v4340_v13 = vadd.f32 %v4260_v40, %v3310_v56  ;;  %vm4661_vm13 = vmor %vm4659_vm11, %vm4660_vm10  ;;  %5490 = vrcp.f32 %v7943_v6  ;;  %v3422_v21 = vmax.f32 %v7938_v16, %v7847_v48  ;;  %v2039_v40 = vpop.f32.mrf.mxu1 }
 0x1e3   : > { %5386 = vmatmul.msk.f32.gmra.mxu3 %vm1683_vm4, %v4109_v33  ;;  %v805_v57 = vrot.slane %v7953_v43, 6  ;;  %v2356_v47 = vrot.slane %v2260_v61, 6  ;;  %v2357_v7 = vrot.slane %v2261_v53, 6  ;;  %v3423_v41 = vmax.f32 %v7941_v51, %v7849_v58 }
 0x1e4   : > { %v4662_v59 = vsel %vm4661_vm13, %v5487_v26, %v4658_v24  ;;  %v4678_v14 = vand.u32 2147483647, %v7943_v6  ;;  %v4376_v60 = vmul.f32 %v7828_v18, %v4340_v13  ;;  %v806_v39 = vrot.slane %v7961_v36, 6 }
 0x1e5   : > { %v4667_v31 = vsel %vm4664_vm12, %v4666_v23, %v4662_v59  ;;  %v2358_v2 = vsel %vm741_vm1, %v2356_v47, %v2357_v7  ;;  %v2444_v26 = vsel %vm741_vm1, -inf, %v2356_v47  ;;  %v2464_v12 = vsel %vm741_vm1, %v2357_v7, -inf  ;;  %v3233_v23 = vpop.f32.mrf.mxu2 }
 0x1e6   : > { %v5050_v25 = vmul.f32 %v4667_v31, %v7840_v8  ;;  %v2500_v22 = vmax.f32 %v2260_v61, %v2444_v26  ;;  %v2501_v49 = vmax.f32 %v2261_v53, %v2358_v2  ;;  %v2628_v35 = vrot.slane %v2444_v26, 1 }
 0x1e7   : > { %v2629_v33 = vrot.slane %v2358_v2, 1  ;;  %vm4674_vm14 = vweird.f32 %v7943_v6  ;;  %v2631_v15 = vrot.slane %v2464_v12, 1  ;;  %v2808_v63 = vrot.slane %v2444_v26, 3 }
 0x1e8   : > { %5083 = vst.msk [vmem:[%s7460_s17 + $0x30] sm:$0xff] %vm5076_vm5, %v5050_v25  ;;  %v2809_v46 = vrot.slane %v2358_v2, 3  ;;  %v2811_v55 = vrot.slane %v2464_v12, 3  ;;  %v5491_v5 = vpop.eup %5490  ;;  %v2988_v37 = vrot.slane %v2444_v26, 4  ;;  %v2989_v9 = vrot.slane %v2358_v2, 4 }
 0x1e9   : > { %v2630_v8 = vsel %vm1030_vm2, %v2628_v35, %v2629_v33  ;;  %v2991_v30 = vrot.slane %v2464_v12, 4  ;;  %v4670_v1 = vmul.f32 %v5491_v5, %v7943_v6  ;;  %v4680_v38 = vand.u32 2147483648, %v7943_v6  ;;  %v4263_v12 = vpop.f32.mrf.mxu3 }
 0x1ea   : > { %v2632_v27 = vsel %vm1030_vm2, %v2629_v33, %v2631_v15  ;;  %v2720_v16 = vmax.f32 %v2500_v22, %v2630_v8  ;;  %v2810_v52 = vsel %vm1247_vm3, %v2808_v63, %v2809_v46  ;;  %v2812_v51 = vsel %vm1247_vm3, %v2809_v46, %v2811_v55 }
 0x1eb   : > { %v2721_v10 = vmax.f32 %v2501_v49, %v2632_v27  ;;  %v2990_v56 = vsel %vm1464_vm0, %v2988_v37, %v2989_v9  ;;  %v4671_v61 = vsub.f32 1.0, %v4670_v1  ;;  %v2992_v24 = vsel %vm1464_vm0, %v2989_v9, %v2991_v30 }
 0x1ec   : > { %v2900_v53 = vmax.f32 %v2720_v16, %v2810_v52  ;;  %v7980_v13 = vadd.f32 %v7837_v54, %v4376_v60  ;;  %v2040_v47 = vadd.f32 %v2039_v40, %v1827_v44  ;;  %v7983_v7 = vsel %vm741_vm1, %v805_v57, %v806_v39 }
 0x1ed   : > { %v2901_v59 = vmax.f32 %v2721_v10, %v2812_v51  ;;  %v7986_v31 = vsel %vm741_vm1, -inf, %v805_v57  ;;  %v4672_v25 = vmul.f32 %v5491_v5, %v4671_v61  ;;  %vm4675_vm15 = vweird.f32 %v5491_v5 }
 0x1ee   : > { %v7988_v2 = vmax.f32 %v2900_v53, %v2990_v56  ;;  %v5403_v26 = vmul.f32 -1.442695, %v7980_v13  ;;  %vm7991_vm6 = vcmp.eq.f32.partialorder %v4678_v14, 8.507059e+37  ;;  %v3311_v49 = vadd.f32 %v3233_v23, %v2040_v47  ;;  %vm4676_vm7 = vmor %vm4674_vm14, %vm4675_vm15 }
 0x1ef   : > { %v7995_v60 = vmax.f32 %v2901_v59, %v2992_v24  ;;  %v7998_v35 = vsel %vm741_vm1, %v806_v39, -inf  ;;  %v4673_v33 = vadd.f32 %v5491_v5, %v4672_v25  ;;  %v1136_v15 = vrot.slane %v7986_v31, 1  ;;  %v1830_v25 = vpop.f32.mrf.mxu0 }
 0x1f0   : > { %v3454_v57 = vmax.f32 %v3422_v21, %v7988_v2  ;;  %5492 = vpow2.f32 %v5403_v26  ;;  %5357 = vmatmul.msk.f32.gmra.mxu2 %vm1683_vm4, %v7988_v2  ;;  %v4681_v14 = vor.u32 1.1754944e-38, %v4680_v38  ;;  %v4341_v46 = vadd.f32 %v4263_v12, %v3311_v49  ;;  %v2042_v26 = vpop.f32.mrf.mxu1 }
 0x1f1   : > { %v3455_v63 = vmax.f32 %v3423_v41, %v7995_v60  ;;  %v1137_v55 = vrot.slane %v7983_v7, 1  ;;  %v4677_v39 = vsel %vm4676_vm7, %v5491_v5, %v4673_v33  ;;  %v976_v21 = vmax.f32 %v7953_v43, %v7986_v31 }
 0x1f2   : > { %v3530_v8 = vrot.slane %v3454_v57, 6  ;;  %v977_v37 = vmax.f32 %v7961_v36, %v7983_v7  ;;  %v4682_v9 = vsel %vm7991_vm6, %v4681_v14, %v4677_v39  ;;  %v4377_v30 = vmul.f32 %v7828_v18, %v4341_v46 }
 0x1f3   : > { %v3531_v6 = vrot.slane %v3455_v63, 6  ;;  %v1139_v41 = vrot.slane %v7998_v35, 1  ;;  %v5051_v1 = vmul.f32 %v4682_v9, %v7883_v3  ;;  %v1138_v38 = vsel %vm1030_vm2, %v1136_v15, %v1137_v55 }
 0x1f4   : > { %v3602_v5 = vsel %vm741_vm1, -inf, %v3530_v8  ;;  %v1353_v27 = vrot.slane %v7986_v31, 3  ;;  %v8027_v24 = vadd.f32 %v7837_v54, %v4377_v30  ;;  %v1354_v12 = vrot.slane %v7983_v7, 3 }
 0x1f5   : > { %v3532_v43 = vsel %vm741_vm1, %v3530_v8, %v3531_v6  ;;  %v3646_v16 = vmax.f32 %v3454_v57, %v3602_v5  ;;  %v3746_v36 = vrot.slane %v3602_v5, 1  ;;  %v3890_v44 = vrot.slane %v3602_v5, 3  ;;  %5084 = vst.msk [vmem:[%s7460_s17 + $0x38] sm:$0xff] %vm5076_vm5, %v5051_v1 }
 0x1f6   : > { %v5493_v40 = vpop.eup %5492  ;;  %v3747_v10 = vrot.slane %v3532_v43, 1  ;;  %v3891_v52 = vrot.slane %v3532_v43, 3  ;;  %v4034_v51 = vrot.slane %v3602_v5, 4  ;;  %v4035_v56 = vrot.slane %v3532_v43, 4 }
 0x1f7   : > { %v8023_v61 = vadd.f32 1.0, %v5493_v40  ;;  %v3618_v3 = vsel %vm741_vm1, %v3531_v6, -inf  ;;  %v3647_v53 = vmax.f32 %v3455_v63, %v3532_v43  ;;  %v1140_v49 = vsel %vm1030_vm2, %v1137_v55, %v1139_v41 }
 0x1f8   : > { %v3748_v23 = vsel %vm1030_vm2, %v3746_v36, %v3747_v10  ;;  %v3892_v59 = vsel %vm1247_vm3, %v3890_v44, %v3891_v52  ;;  %v3749_v47 = vrot.slane %v3618_v3, 1  ;;  %5358 = vmatmul.msk.f32.gmra.mxu2 %vm1683_vm4, %v7995_v60  ;;  %v1241_v33 = vmax.f32 %v976_v21, %v1138_v38 }
 0x1f9   : > { %v3822_v22 = vmax.f32 %v3646_v16, %v3748_v23  ;;  %5494 = vrcp.f32 %v8023_v61  ;;  %v4036_v57 = vsel %vm1464_vm0, %v4034_v51, %v4035_v56  ;;  %v3893_v14 = vrot.slane %v3618_v3, 3 }
 0x1fa   : > { %v3750_v15 = vsel %vm1030_vm2, %v3747_v10, %v3749_v47  ;;  %v4037_v63 = vrot.slane %v3618_v3, 4  ;;  %v5404_v8 = vmul.f32 -1.442695, %v8027_v24  ;;  %v2043_v9 = vadd.f32 %v2042_v26, %v1830_v25 }
 0x1fb   : > { %v3966_v46 = vmax.f32 %v3822_v22, %v3892_v59  ;;  %v3823_v39 = vmax.f32 %v3647_v53, %v3750_v15  ;;  %v4693_v6 = vand.u32 2147483647, %v8023_v61  ;;  %v3894_v30 = vsel %vm1247_vm3, %v3891_v52, %v3893_v14 }
 0x1fc   : > { %v4038_v1 = vsel %vm1464_vm0, %v4035_v56, %v4037_v63  ;;  %v1242_v5 = vmax.f32 %v977_v37, %v1140_v49  ;;  %5496 = vpow2.f32 %v5404_v8  ;;  %v1355_v41 = vsel %vm1247_vm3, %v1353_v27, %v1354_v12 }
 0x1fd   : > { %v4110_v55 = vmax.f32 %v3966_v46, %v4036_v57  ;;  %v3967_v21 = vmax.f32 %v3823_v39, %v3894_v30  ;;  %vm4689_vm8 = vweird.f32 %v8023_v61  ;;  %v1356_v38 = vrot.slane %v7998_v35, 3  ;;  %v4266_v46 = vpop.f32.mrf.mxu3 }
 0x1fe   : > { %v1458_v43 = vmax.f32 %v1241_v33, %v1355_v41  ;;  %v1570_v16 = vrot.slane %v7986_v31, 4  ;;  %v1571_v36 = vrot.slane %v7983_v7, 4  ;;  %v4695_v40 = vand.u32 2147483648, %v8023_v61 }
 0x1ff   : > { %v5495_v44 = vpop.eup %5494  ;;  %5387 = vmatmul.msk.f32.gmra.mxu3 %vm1683_vm4, %v4110_v55  ;;  %v1573_v37 = vrot.slane %v7998_v35, 4  ;;  %v2142_v10 = vmax.f32 %v7758_v32, %v7442_v29  ;;  %v2143_v27 = vmax.f32 %v7771_v11, %v7444_v4  ;;  %v4111_v51 = vmax.f32 %v3967_v21, %v4038_v1 }
 0x200   : > { %v4685_v52 = vmul.f32 %v5495_v44, %v8023_v61  ;;  %v1357_v31 = vsel %vm1247_vm3, %v1354_v12, %v1356_v38  ;;  %v1572_v7 = vsel %vm1464_vm0, %v1570_v16, %v1571_v36  ;;  %v3360_v4 = vmax.f32 %v7847_v48, %v7526_v0  ;;  %v3236_v12 = vpop.f32.mrf.mxu2 }
 0x201   : > { %v1459_v56 = vmax.f32 %v1242_v5, %v1357_v31  ;;  %v1574_v3 = vsel %vm1464_vm0, %v1571_v36, %v1573_v37  ;;  %v8058_v53 = vmax.f32 %v1458_v43, %v1572_v7  ;;  %v2182_v35 = vmax.f32 %v2142_v10, %v7614_v19  ;;  %v2045_v31 = vpop.f32.mrf.mxu1 }
 0x202   : > { %v4686_v23 = vsub.f32 1.0, %v4685_v52  ;;  %v2183_v29 = vmax.f32 %v2143_v27, %v7624_v17  ;;  %v3361_v59 = vmax.f32 %v7849_v58, %v7528_v42  ;;  %v5497_v47 = vpop.eup %5496  ;;  %vm4690_vm9 = vweird.f32 %v5495_v44 }
 0x203   : > { %v8066_v25 = vmax.f32 %v1459_v56, %v1574_v3  ;;  %v2222_v26 = vmax.f32 %v2182_v35, %v7929_v50  ;;  %v2144_v22 = vmax.f32 %v7929_v50, %v7614_v19  ;;  %v8071_v33 = vadd.f32 1.0, %v5497_v47  ;;  %vm4691_vm11 = vmor %vm4689_vm8, %vm4690_vm9 }
 0x204   : > { %v4687_v49 = vmul.f32 %v5495_v44, %v4686_v23  ;;  %v2223_v57 = vmax.f32 %v2183_v29, %v7933_v20  ;;  %v8075_v0 = vmax.f32 %v3360_v4, %v7685_v62  ;;  %vm8077_vm10 = vcmp.eq.f32.partialorder %v4693_v6, 8.507059e+37 }
 0x205   : > { %v2262_v15 = vmax.f32 %v2222_v26, %v8058_v53  ;;  %v8083_v14 = vmax.f32 %v3361_v59, %v7687_v45  ;;  %v3312_v63 = vadd.f32 %v3236_v12, %v2043_v9  ;;  %v4696_v39 = vor.u32 1.1754944e-38, %v4695_v40 }
 0x206   : > { %v4688_v19 = vadd.f32 %v5495_v44, %v4687_v49  ;;  %5498 = vrcp.f32 %v8071_v33  ;;  %v2145_v8 = vmax.f32 %v7933_v20, %v7624_v17  ;;  %v4708_v6 = vand.u32 2147483647, %v8071_v33 }
 0x207   : > { %5388 = vmatmul.msk.f32.gmra.mxu3 %vm1683_vm4, %v4111_v51  ;;  %v2263_v30 = vmax.f32 %v2223_v57, %v8066_v25  ;;  %v2359_v1 = vrot.slane %v2262_v15, 6  ;;  %v2184_v9 = vmax.f32 %v2144_v22, %v7758_v32  ;;  %v4710_v55 = vand.u32 2147483648, %v8071_v33  ;;  %v1833_v51 = vpop.f32.mrf.mxu0 }
 0x208   : > { %v4692_v5 = vsel %vm4691_vm11, %v5495_v44, %v4688_v19  ;;  %v3424_v21 = vmax.f32 %v8075_v0, %v7988_v2  ;;  %v4342_v17 = vadd.f32 %v4266_v46, %v3312_v63  ;;  %v3425_v43 = vmax.f32 %v8083_v14, %v7995_v60  ;;  %v3239_v42 = vpop.f32.mrf.mxu2 }
 0x209   : > { %v4697_v61 = vsel %vm8077_vm10, %v4696_v39, %v4692_v5  ;;  %v2360_v41 = vrot.slane %v2263_v30, 6  ;;  %v2445_v38 = vsel %vm741_vm1, -inf, %v2359_v1  ;;  %v2046_v46 = vadd.f32 %v2045_v31, %v1833_v51 }
 0x20a   : > { %v5052_v16 = vmul.f32 %v4697_v61, %v7980_v13  ;;  %v2502_v36 = vmax.f32 %v2262_v15, %v2445_v38  ;;  %v2633_v44 = vrot.slane %v2445_v38, 1  ;;  %v2813_v40 = vrot.slane %v2445_v38, 3 }
 0x20b   : > { %v2361_v37 = vsel %vm741_vm1, %v2359_v1, %v2360_v41  ;;  %v2465_v10 = vsel %vm741_vm1, %v2360_v41, -inf  ;;  %v2993_v27 = vrot.slane %v2445_v38, 4  ;;  %v4378_v52 = vmul.f32 %v7828_v18, %v4342_v17  ;;  %v4269_v1 = vpop.f32.mrf.mxu3 }
 0x20c   : > { %v5499_v7 = vpop.eup %5498  ;;  %5085 = vst.msk [vmem:[%s7460_s17 + $0x40] sm:$0xff] %vm5076_vm5, %v5052_v16  ;;  %v2503_v56 = vmax.f32 %v2263_v30, %v2361_v37  ;;  %v2634_v3 = vrot.slane %v2361_v37, 1  ;;  %v2636_v35 = vrot.slane %v2465_v10, 1  ;;  %v2814_v23 = vrot.slane %v2361_v37, 3 }
 0x20d   : > { %v4700_v13 = vmul.f32 %v5499_v7, %v8071_v33  ;;  %vm4705_vm12 = vweird.f32 %v5499_v7  ;;  %v2816_v29 = vrot.slane %v2465_v10, 3  ;;  %v2994_v4 = vrot.slane %v2361_v37, 4 }
 0x20e   : > { %v2635_v59 = vsel %vm1030_vm2, %v2633_v44, %v2634_v3  ;;  %v2637_v47 = vsel %vm1030_vm2, %v2634_v3, %v2636_v35  ;;  %v2815_v26 = vsel %vm1247_vm3, %v2813_v40, %v2814_v23  ;;  %v2996_v12 = vrot.slane %v2465_v10, 4 }
 0x20f   : > { %v4701_v22 = vsub.f32 1.0, %v4700_v13  ;;  %v2722_v49 = vmax.f32 %v2502_v36, %v2635_v59  ;;  %v2723_v57 = vmax.f32 %v2503_v56, %v2637_v47  ;;  %v2817_v0 = vsel %vm1247_vm3, %v2814_v23, %v2816_v29 }
 0x210   : > { %v2995_v15 = vsel %vm1464_vm0, %v2993_v27, %v2994_v4  ;;  %v2997_v14 = vsel %vm1464_vm0, %v2994_v4, %v2996_v12  ;;  %v8117_v63 = vadd.f32 %v7837_v54, %v4378_v52  ;;  %v2185_v5 = vmax.f32 %v2145_v8, %v7771_v11  ;;  %v1836_v27 = vpop.f32.mrf.mxu0  ;;  %v2048_v52 = vpop.f32.mrf.mxu1 }
 0x211   : > { %v4702_v19 = vmul.f32 %v5499_v7, %v4701_v22  ;;  %v2902_v39 = vmax.f32 %v2722_v49, %v2815_v26  ;;  %v2903_v30 = vmax.f32 %v2723_v57, %v2817_v0  ;;  %vm4704_vm13 = vweird.f32 %v8071_v33 }
 0x212   : > { %v5405_v17 = vmul.f32 -1.442695, %v8117_v63  ;;  %v3313_v61 = vadd.f32 %v3239_v42, %v2046_v46  ;;  %v2224_v41 = vmax.f32 %v2184_v9, %v8058_v53  ;;  %v4711_v16 = vor.u32 1.1754944e-38, %v4710_v55  ;;  %vm4706_vm14 = vmor %vm4704_vm13, %vm4705_vm12 }
 0x213   : > { %v4703_v38 = vadd.f32 %v5499_v7, %v4702_v19  ;;  %v8123_v36 = vmax.f32 %v2902_v39, %v2995_v15  ;;  %v8125_v44 = vmax.f32 %v2903_v30, %v2997_v14  ;;  %v2225_v37 = vmax.f32 %v2185_v5, %v8066_v25 }
 0x214   : > { %5500 = vpow2.f32 %v5405_v17  ;;  %v4343_v40 = vadd.f32 %v4269_v1, %v3313_v61  ;;  %v8130_v8 = vmax.f32 %v2224_v41, %v6112_v28  ;;  %vm4709_vm15 = vcmp.eq.f32.partialorder %v4708_v6, 8.507059e+37 }
 0x215   : > { %v4707_v10 = vsel %vm4706_vm14, %v5499_v7, %v4703_v38  ;;  %v3456_v9 = vmax.f32 %v3424_v21, %v8123_v36  ;;  %v3457_v55 = vmax.f32 %v3425_v43, %v8125_v44  ;;  %5359 = vmatmul.msk.f32.gmra.mxu2 %vm1683_vm4, %v8123_v36  ;;  %v8140_v56 = vmax.f32 %v2225_v37, %v6115_v34 }
 0x216   : > { %v4712_v51 = vsel %vm4709_vm15, %v4711_v16, %v4707_v10  ;;  %v4379_v31 = vmul.f32 %v7828_v18, %v4343_v40  ;;  %v2362_v7 = vrot.slane %v8130_v8, 6  ;;  %v3362_v43 = vmax.f32 %v7988_v2, %v7685_v62 }
 0x217   : > { %v5053_v33 = vmul.f32 %v4712_v51, %v8027_v24  ;;  %v3533_v6 = vrot.slane %v3456_v9, 6  ;;  %v3534_v21 = vrot.slane %v3457_v55, 6  ;;  %v8149_v35 = vadd.f32 %v2048_v52, %v1836_v27  ;;  %v3242_v27 = vpop.f32.mrf.mxu2 }
 0x218   : > { %v8147_v3 = vadd.f32 %v7837_v54, %v4379_v31  ;;  %v2363_v23 = vrot.slane %v8140_v56, 6  ;;  %v3363_v13 = vmax.f32 %v7995_v60, %v7687_v45  ;;  %v8160_v62 = vsel %vm741_vm1, -inf, %v2362_v7 }
 0x219   : > { %5086 = vst.msk [vmem:[%s7460_s17 + $0x48] sm:$0xff] %vm5076_vm5, %v5053_v33  ;;  %v3535_v29 = vsel %vm741_vm1, %v3533_v6, %v3534_v21  ;;  %v3603_v24 = vsel %vm741_vm1, -inf, %v3533_v6  ;;  %v3619_v4 = vsel %vm741_vm1, %v3534_v21, -inf  ;;  %v8168_v30 = vmax.f32 %v3362_v43, %v7847_v48  ;;  %v4272_v43 = vpop.f32.mrf.mxu3 }
 0x21a   : > { %v5501_v59 = vpop.eup %5500  ;;  %v3648_v47 = vmax.f32 %v3456_v9, %v3603_v24  ;;  %v3751_v26 = vrot.slane %v3603_v24, 1  ;;  %v3752_v12 = vrot.slane %v3535_v29, 1  ;;  %v3895_v22 = vrot.slane %v3603_v24, 3 }
 0x21b   : > { %v3896_v49 = vrot.slane %v3535_v29, 3  ;;  %v4039_v57 = vrot.slane %v3603_v24, 4  ;;  %v4040_v0 = vrot.slane %v3535_v29, 4  ;;  %v8162_v45 = vadd.f32 1.0, %v5501_v59 }
 0x21c   : > { %v3753_v42 = vsel %vm1030_vm2, %v3751_v26, %v3752_v12  ;;  %v3649_v15 = vmax.f32 %v3457_v55, %v3535_v29  ;;  %v3754_v14 = vrot.slane %v3619_v4, 1  ;;  %v3898_v46 = vrot.slane %v3619_v4, 3 }
 0x21d   : > { %v3824_v19 = vmax.f32 %v3648_v47, %v3753_v42  ;;  %v3897_v39 = vsel %vm1247_vm3, %v3895_v22, %v3896_v49  ;;  %5502 = vrcp.f32 %v8162_v45  ;;  %5360 = vmatmul.msk.f32.gmra.mxu2 %vm1683_vm4, %v8125_v44  ;;  %v4041_v1 = vsel %vm1464_vm0, %v4039_v57, %v4040_v0 }
 0x21e   : > { %v3755_v5 = vsel %vm1030_vm2, %v3752_v12, %v3754_v14  ;;  %v2504_v17 = vmax.f32 %v8130_v8, %v8160_v62  ;;  %v8177_v61 = vmax.f32 %v3363_v13, %v7849_v58  ;;  %v3899_v16 = vsel %vm1247_vm3, %v3896_v49, %v3898_v46  ;;  %v2051_v14 = vpop.f32.mrf.mxu1 }
 0x21f   : > { %v3968_v41 = vmax.f32 %v3824_v19, %v3897_v39  ;;  %v3825_v38 = vmax.f32 %v3649_v15, %v3755_v5  ;;  %v4042_v40 = vrot.slane %v3619_v4, 4  ;;  %v4723_v37 = vand.u32 2147483647, %v8162_v45  ;;  %v1839_v15 = vpop.f32.mrf.mxu0 }
 0x220   : > { %v4725_v10 = vand.u32 2147483648, %v8162_v45  ;;  %v5406_v9 = vmul.f32 -1.442695, %v8147_v3  ;;  %v2364_v55 = vsel %vm741_vm1, %v2362_v7, %v2363_v23  ;;  %v2466_v31 = vsel %vm741_vm1, %v2363_v23, -inf }
 0x221   : > { %v4112_v52 = vmax.f32 %v3968_v41, %v4041_v1  ;;  %v3969_v51 = vmax.f32 %v3825_v38, %v3899_v16  ;;  %v4043_v8 = vsel %vm1464_vm0, %v4040_v0, %v4042_v40  ;;  %v2505_v33 = vmax.f32 %v8140_v56, %v2364_v55 }
 0x222   : > { %5504 = vpow2.f32 %v5406_v9  ;;  %v2638_v6 = vrot.slane %v8160_v62, 1  ;;  %v2639_v21 = vrot.slane %v2364_v55, 1  ;;  %v2641_v24 = vrot.slane %v2466_v31, 1 }
 0x223   : > { %v5503_v13 = vpop.eup %5502  ;;  %5389 = vmatmul.msk.f32.gmra.mxu3 %vm1683_vm4, %v4112_v52  ;;  %v4113_v29 = vmax.f32 %v3969_v51, %v4043_v8  ;;  %v2818_v7 = vrot.slane %v8160_v62, 3  ;;  %v2819_v4 = vrot.slane %v2364_v55, 3  ;;  %v2821_v47 = vrot.slane %v2466_v31, 3  ;;  %v3245_v51 = vpop.f32.mrf.mxu2 }
 0x224   : > { %v4715_v59 = vmul.f32 %v5503_v13, %v8162_v45  ;;  %vm4720_vm6 = vweird.f32 %v5503_v13  ;;  %v2640_v23 = vsel %vm1030_vm2, %v2638_v6, %v2639_v21  ;;  %v2642_v56 = vsel %vm1030_vm2, %v2639_v21, %v2641_v24 }
 0x225   : > { %v2724_v26 = vmax.f32 %v2504_v17, %v2640_v23  ;;  %v2820_v12 = vsel %vm1247_vm3, %v2818_v7, %v2819_v4  ;;  %v2998_v22 = vrot.slane %v8160_v62, 4  ;;  %v2725_v57 = vmax.f32 %v2505_v33, %v2642_v56  ;;  %v4275_v33 = vpop.f32.mrf.mxu3 }
 0x226   : > { %v4716_v49 = vsub.f32 1.0, %v4715_v59  ;;  %v2822_v0 = vsel %vm1247_vm3, %v2819_v4, %v2821_v47  ;;  %v2999_v42 = vrot.slane %v2364_v55, 4  ;;  %v3001_v19 = vrot.slane %v2466_v31, 4 }
 0x227   : > { %v2904_v46 = vmax.f32 %v2724_v26, %v2820_v12  ;;  %v3426_v39 = vmax.f32 %v8168_v30, %v8123_v36  ;;  %v3427_v1 = vmax.f32 %v8177_v61, %v8125_v44  ;;  %v2905_v41 = vmax.f32 %v2725_v57, %v2822_v0 }
 0x228   : > { %v5505_v5 = vpop.eup %5504  ;;  %v4717_v17 = vmul.f32 %v5503_v13, %v4716_v49  ;;  %v3000_v62 = vsel %vm1464_vm0, %v2998_v22, %v2999_v42  ;;  %v3314_v38 = vadd.f32 %v3242_v27, %v8149_v35  ;;  %v3002_v40 = vsel %vm1464_vm0, %v2999_v42, %v3001_v19 }
 0x229   : > { %v8202_v16 = vadd.f32 1.0, %v5505_v5  ;;  %v8205_v9 = vmax.f32 %v2904_v46, %v3000_v62  ;;  %v2052_v55 = vadd.f32 %v2051_v14, %v1839_v15  ;;  %vm4719_vm7 = vweird.f32 %v8162_v45 }
 0x22a   : > { %v4718_v52 = vadd.f32 %v5503_v13, %v4717_v17  ;;  %v8208_v30 = vmax.f32 %v2905_v41, %v3002_v40  ;;  %v4344_v61 = vadd.f32 %v4272_v43, %v3314_v38  ;;  %vm4721_vm8 = vmor %vm4719_vm7, %vm4720_vm6  ;;  %vm4724_vm9 = vcmp.eq.f32.partialorder %v4723_v37, 8.507059e+37 }
 0x22b   : > { %v4726_v8 = vor.u32 1.1754944e-38, %v4725_v10  ;;  %5390 = vmatmul.msk.f32.gmra.mxu3 %vm1683_vm4, %v4113_v29  ;;  %5506 = vrcp.f32 %v8202_v16  ;;  %v3458_v27 = vmax.f32 %v3426_v39, %v8205_v9  ;;  %v4738_v21 = vand.u32 2147483647, %v8202_v16 }
 0x22c   : > { %v4722_v35 = vsel %vm4721_vm8, %v5503_v13, %v4718_v52  ;;  %v3459_v31 = vmax.f32 %v3427_v1, %v8208_v30  ;;  %v4380_v45 = vmul.f32 %v7828_v18, %v4344_v61  ;;  %v3315_v43 = vadd.f32 %v3245_v51, %v2052_v55  ;;  %v1842_v61 = vpop.f32.mrf.mxu0  ;;  %v2054_v51 = vpop.f32.mrf.mxu1 }
 0x22d   : > { %v4727_v6 = vsel %vm4724_vm9, %v4726_v8, %v4722_v35  ;;  %v3536_v10 = vrot.slane %v3458_v27, 6  ;;  %v4740_v13 = vand.u32 2147483648, %v8202_v16  ;;  %v2146_v4 = vmax.f32 %v8058_v53, %v7758_v32 }
 0x22e   : > { %v5054_v37 = vmul.f32 %v4727_v6, %v8117_v63  ;;  %v3537_v24 = vrot.slane %v3459_v31, 6  ;;  %v8219_v29 = vadd.f32 %v7837_v54, %v4380_v45  ;;  %v4345_v7 = vadd.f32 %v4275_v33, %v3315_v43 }
 0x22f   : > { %v2147_v59 = vmax.f32 %v8066_v25, %v7771_v11  ;;  %vm4734_vm10 = vweird.f32 %v8202_v16  ;;  %v3604_v23 = vsel %vm741_vm1, -inf, %v3536_v10  ;;  %v3364_v57 = vmax.f32 %v8123_v36, %v7847_v48 }
 0x230   : > { %5087 = vst.msk [vmem:[%s7460_s17 + $0x50] sm:$0xff] %vm5076_vm5, %v5054_v37  ;;  %v3538_v63 = vsel %vm741_vm1, %v3536_v10, %v3537_v24  ;;  %v5407_v47 = vmul.f32 -1.442695, %v8219_v29  ;;  %v3620_v56 = vsel %vm741_vm1, %v3537_v24, -inf  ;;  %v3650_v12 = vmax.f32 %v3458_v27, %v3604_v23  ;;  %v3248_v37 = vpop.f32.mrf.mxu2  ;;  %v4278_v24 = vpop.f32.mrf.mxu3 }
 0x231   : > { %v5507_v26 = vpop.eup %5506  ;;  %v3756_v22 = vrot.slane %v3604_v23, 1  ;;  %v3757_v49 = vrot.slane %v3538_v63, 1  ;;  %v3900_v32 = vrot.slane %v3604_v23, 3  ;;  %v3901_v11 = vrot.slane %v3538_v63, 3 }
 0x232   : > { %v4730_v53 = vmul.f32 %v5507_v26, %v8202_v16  ;;  %v4044_v25 = vrot.slane %v3604_v23, 4  ;;  %v4045_v42 = vrot.slane %v3538_v63, 4  ;;  %5508 = vpow2.f32 %v5407_v47 }
 0x233   : > { %v3758_v0 = vsel %vm1030_vm2, %v3756_v22, %v3757_v49  ;;  %v3651_v15 = vmax.f32 %v3459_v31, %v3538_v63  ;;  %v3902_v19 = vsel %vm1247_vm3, %v3900_v32, %v3901_v11  ;;  %v3759_v39 = vrot.slane %v3620_v56, 1 }
 0x234   : > { %v4731_v14 = vsub.f32 1.0, %v4730_v53  ;;  %v3826_v46 = vmax.f32 %v3650_v12, %v3758_v0  ;;  %vm4735_vm11 = vweird.f32 %v5507_v26  ;;  %v4046_v1 = vsel %vm1464_vm0, %v4044_v25, %v4045_v42  ;;  %v1845_v53 = vpop.f32.mrf.mxu0 }
 0x235   : > { %v3903_v5 = vrot.slane %v3620_v56, 3  ;;  %v4381_v17 = vmul.f32 %v7828_v18, %v4345_v7  ;;  %v3760_v48 = vsel %vm1030_vm2, %v3757_v49, %v3759_v39  ;;  %v2186_v36 = vmax.f32 %v2146_v4, %v7929_v50  ;;  %vm4736_vm12 = vmor %vm4734_vm10, %vm4735_vm11 }
 0x236   : > { %v4732_v41 = vmul.f32 %v5507_v26, %v4731_v14  ;;  %v3970_v62 = vmax.f32 %v3826_v46, %v3902_v19  ;;  %v3827_v38 = vmax.f32 %v3651_v15, %v3760_v48  ;;  %v4047_v55 = vrot.slane %v3620_v56, 4 }
 0x237   : > { %v3904_v40 = vsel %vm1247_vm3, %v3901_v11, %v3903_v5  ;;  %v8244_v52 = vadd.f32 %v7837_v54, %v4381_v17  ;;  %v2187_v27 = vmax.f32 %v2147_v59, %v7933_v20  ;;  %v2226_v18 = vmax.f32 %v2186_v36, %v6112_v28  ;;  %v2057_v11 = vpop.f32.mrf.mxu1 }
 0x238   : > { %v4733_v8 = vadd.f32 %v5507_v26, %v4732_v41  ;;  %v4114_v35 = vmax.f32 %v3970_v62, %v4046_v1  ;;  %v5509_v31 = vpop.eup %5508  ;;  %vm4739_vm13 = vcmp.eq.f32.partialorder %v4738_v21, 8.507059e+37  ;;  %v4741_v50 = vor.u32 1.1754944e-38, %v4740_v13  ;;  %v3251_v39 = vpop.f32.mrf.mxu2 }
 0x239   : > { %v3971_v45 = vmax.f32 %v3827_v38, %v3904_v40  ;;  %v5408_v33 = vmul.f32 -1.442695, %v8244_v52  ;;  %v8253_v6 = vadd.f32 1.0, %v5509_v31  ;;  %v2227_v20 = vmax.f32 %v2187_v27, %v6115_v34  ;;  %v4281_v38 = vpop.f32.mrf.mxu3  ;;  %v8297_v31 = vld [vmem:[%s8540_s4] ss:$0 sm:$0xff] }
 0x23a   : > { %v4737_v54 = vsel %vm4736_vm12, %v5507_v26, %v4733_v8  ;;  %5391 = vmatmul.msk.f32.gmra.mxu3 %vm1683_vm4, %v4114_v35  ;;  %v2266_v43 = vmax.f32 %v2226_v18, %v6112_v28  ;;  %v4048_v16 = vsel %vm1464_vm0, %v4045_v42, %v4047_v55  ;;  %v3365_v21 = vmax.f32 %v8125_v44, %v7849_v58 }
 0x23b   : > { %v4742_v10 = vsel %vm4739_vm13, %v4741_v50, %v4737_v54  ;;  %5510 = vpow2.f32 %v5408_v33  ;;  %v2055_v7 = vadd.f32 %v2054_v51, %v1842_v61  ;;  %v8263_v4 = vmax.f32 %v3364_v57, %v7988_v2 }
 0x23c   : > { %v5055_v13 = vmul.f32 %v4742_v10, %v8147_v3  ;;  %5512 = vrcp.f32 %v8253_v6  ;;  %v2267_v59 = vmax.f32 %v2227_v20, %v6115_v34  ;;  %v2365_v28 = vrot.slane %v2266_v43, 6 }
 0x23d   : > { %v4115_v63 = vmax.f32 %v3971_v45, %v4048_v16  ;;  %v4753_v23 = vand.u32 2147483647, %v8253_v6  ;;  %v8271_v44 = vmax.f32 %v3365_v21, %v7995_v60  ;;  %v4755_v3 = vand.u32 2147483648, %v8253_v6 }
 0x23e   : > { %5088 = vst.msk [vmem:[%s7460_s17 + $0x58] sm:$0xff] %vm5076_vm5, %v5055_v13  ;;  %v2366_v47 = vrot.slane %v2267_v59, 6  ;;  %v2447_v58 = vsel %vm741_vm1, -inf, %v2365_v28  ;;  %v3428_v2 = vmax.f32 %v8263_v4, %v8205_v9  ;;  %v3316_v26 = vadd.f32 %v3248_v37, %v2055_v7  ;;  %v1848_v37 = vpop.f32.mrf.mxu0  ;;  %v8310_v13 = vld [vmem:[%s8541_s5] ss:$0 sm:$0xff] }
 0x23f   : > { %v2506_v56 = vmax.f32 %v2266_v43, %v2447_v58  ;;  %vm4749_vm14 = vweird.f32 %v8253_v6  ;;  %v2643_v49 = vrot.slane %v2447_v58, 1  ;;  %v2823_v32 = vrot.slane %v2447_v58, 3  ;;  %v2060_v10 = vpop.f32.mrf.mxu1 }
 0x240   : > { %v2367_v12 = vsel %vm741_vm1, %v2365_v28, %v2366_v47  ;;  %v2467_v22 = vsel %vm741_vm1, %v2366_v47, -inf  ;;  %vm8283_vm15 = vcmp.eq.f32.partialorder %v4753_v23, 8.507059e+37  ;;  %v3003_v1 = vrot.slane %v2447_v58, 4 }
 0x241   : > { %v5511_v34 = vpop.eup %5510  ;;  %v2507_v57 = vmax.f32 %v2267_v59, %v2367_v12  ;;  %v2644_v0 = vrot.slane %v2367_v12, 1  ;;  %v2646_v42 = vrot.slane %v2467_v22, 1  ;;  %v2824_v46 = vrot.slane %v2367_v12, 3 }
 0x242   : > { %v5513_v60 = vpop.eup %5512  ;;  %5392 = vmatmul.msk.f32.gmra.mxu3 %vm1683_vm4, %v4115_v63  ;;  %v8280_v25 = vadd.f32 1.0, %v5511_v34  ;;  %v2826_v19 = vrot.slane %v2467_v22, 3  ;;  %v3429_v5 = vmax.f32 %v8271_v44, %v8208_v30  ;;  %v4346_v17 = vadd.f32 %v4278_v24, %v3316_v26 }
 0x243   : > { %v4745_v15 = vmul.f32 %v5513_v60, %v8253_v6  ;;  %v2645_v62 = vsel %vm1030_vm2, %v2643_v49, %v2644_v0  ;;  %v2647_v48 = vsel %vm1030_vm2, %v2644_v0, %v2646_v42  ;;  %v2825_v36 = vsel %vm1247_vm3, %v2823_v32, %v2824_v46  ;;  %v3254_v6 = vpop.f32.mrf.mxu2  ;;  %v4284_v49 = vpop.f32.mrf.mxu3 }
 0x244   : > { %5514 = vrcp.f32 %v8280_v25  ;;  %vm4750_vm6 = vweird.f32 %v5513_v60  ;;  %v4756_v40 = vor.u32 1.1754944e-38, %v4755_v3  ;;  %v2726_v55 = vmax.f32 %v2506_v56, %v2645_v62 }
 0x245   : > { %v4746_v41 = vsub.f32 1.0, %v4745_v15  ;;  %v2727_v61 = vmax.f32 %v2507_v57, %v2647_v48  ;;  %v2827_v8 = vsel %vm1247_vm3, %v2824_v46, %v2826_v19  ;;  %v3004_v35 = vrot.slane %v2367_v12, 4  ;;  %vm4751_vm8 = vmor %vm4749_vm14, %vm4750_vm6 }
 0x246   : > { %v3006_v27 = vrot.slane %v2467_v22, 4  ;;  %v2906_v18 = vmax.f32 %v2726_v55, %v2825_v36  ;;  %v4382_v50 = vmul.f32 %v8297_v31, %v4346_v17  ;;  %v2058_v45 = vadd.f32 %v2057_v11, %v1845_v53  ;;  %v1851_v19 = vpop.f32.mrf.mxu0 }
 0x247   : > { %v4747_v51 = vmul.f32 %v5513_v60, %v4746_v41  ;;  %v2907_v30 = vmax.f32 %v2727_v61, %v2827_v8  ;;  %vm4764_vm7 = vweird.f32 %v8280_v25  ;;  %v4768_v54 = vand.u32 2147483647, %v8280_v25 }
 0x248   : > { %v3005_v20 = vsel %vm1464_vm0, %v3003_v1, %v3004_v35  ;;  %v3007_v43 = vsel %vm1464_vm0, %v3004_v35, %v3006_v27  ;;  %v8313_v7 = vadd.f32 %v8310_v13, %v4382_v50  ;;  %v3317_v59 = vadd.f32 %v3251_v39, %v2058_v45  ;;  %v2063_v39 = vpop.f32.mrf.mxu1 }
 0x249   : > { %v4748_v33 = vadd.f32 %v5513_v60, %v4747_v51  ;;  %v3086_v21 = vmax.f32 %v2906_v18, %v3005_v20  ;;  %v3087_v24 = vmax.f32 %v2907_v30, %v3007_v43  ;;  %v4770_v23 = vand.u32 2147483648, %v8280_v25 }
 0x24a   : > { %v5515_v16 = vpop.eup %5514  ;;  %v2061_v47 = vadd.f32 %v2060_v10, %v1848_v37  ;;  %v5409_v56 = vmul.f32 -1.442695, %v8313_v7  ;;  %v4347_v12 = vadd.f32 %v4281_v38, %v3317_v59  ;;  %vm8324_vm9 = vcmp.eq.f32.partialorder %v4768_v54, 8.507059e+37 }
 0x24b   : > { %v4752_v28 = vsel %vm4751_vm8, %v5513_v60, %v4748_v33  ;;  %v4760_v63 = vmul.f32 %v5515_v16, %v8280_v25  ;;  %v3460_v44 = vmax.f32 %v3428_v2, %v3086_v21  ;;  %v3461_v3 = vmax.f32 %v3429_v5, %v3087_v24  ;;  %v4287_v50 = vpop.f32.mrf.mxu3 }
 0x24c   : > { %v4757_v58 = vsel %vm8283_vm15, %v4756_v40, %v4752_v28  ;;  %v3318_v22 = vadd.f32 %v3254_v6, %v2061_v47  ;;  %5516 = vpow2.f32 %v5409_v56  ;;  %vm4765_vm10 = vweird.f32 %v5515_v16  ;;  %v3257_v40 = vpop.f32.mrf.mxu2 }
 0x24d   : > { %v5056_v26 = vmul.f32 %v4757_v58, %v8219_v29  ;;  %v4761_v34 = vsub.f32 1.0, %v4760_v63  ;;  %v3539_v53 = vrot.slane %v3460_v44, 6  ;;  %v3540_v11 = vrot.slane %v3461_v3, 6  ;;  %vm4766_vm11 = vmor %vm4764_vm7, %vm4765_vm10 }
 0x24e   : > { %v4771_v4 = vor.u32 1.1754944e-38, %v4770_v23  ;;  %v4383_v2 = vmul.f32 %v8297_v31, %v4347_v12  ;;  %v4348_v0 = vadd.f32 %v4284_v49, %v3318_v22  ;;  %v2064_v59 = vadd.f32 %v2063_v39, %v1851_v19 }
 0x24f   : > { %5089 = vst.msk [vmem:[%s7460_s17 + $0x60] sm:$0xff] %vm5076_vm5, %v5056_v26  ;;  %v4762_v9 = vmul.f32 %v5515_v16, %v4761_v34  ;;  %v3541_v29 = vsel %vm741_vm1, %v3539_v53, %v3540_v11  ;;  %v3605_v60 = vsel %vm741_vm1, -inf, %v3539_v53  ;;  %v3621_v57 = vsel %vm741_vm1, %v3540_v11, -inf }
 0x250   : > { %v3652_v15 = vmax.f32 %v3460_v44, %v3605_v60  ;;  %v3761_v14 = vrot.slane %v3605_v60, 1  ;;  %v3762_v46 = vrot.slane %v3541_v29, 1  ;;  %v3905_v1 = vrot.slane %v3605_v60, 3  ;;  %v2066_v21 = vpop.f32.mrf.mxu1 }
 0x251   : > { %v4763_v42 = vadd.f32 %v5515_v16, %v4762_v9  ;;  %v3906_v5 = vrot.slane %v3541_v29, 3  ;;  %v4049_v17 = vrot.slane %v3605_v60, 4  ;;  %v4050_v41 = vrot.slane %v3541_v29, 4 }
 0x252   : > { %v3763_v48 = vsel %vm1030_vm2, %v3761_v14, %v3762_v46  ;;  %v3653_v36 = vmax.f32 %v3461_v3, %v3541_v29  ;;  %v3764_v38 = vrot.slane %v3621_v57, 1  ;;  %v5517_v55 = vpop.eup %5516  ;;  %v3908_v30 = vrot.slane %v3621_v57, 3 }
 0x253   : > { %v4767_v62 = vsel %vm4766_vm11, %v5515_v16, %v4763_v42  ;;  %v3828_v51 = vmax.f32 %v3652_v15, %v3763_v48  ;;  %v3907_v8 = vsel %vm1247_vm3, %v3905_v1, %v3906_v5  ;;  %v4051_v25 = vsel %vm1464_vm0, %v4049_v17, %v4050_v41  ;;  %v1854_v16 = vpop.f32.mrf.mxu0  ;;  %v4290_v56 = vpop.f32.mrf.mxu3 }
 0x254   : > { %v4772_v61 = vsel %vm8324_vm9, %v4771_v4, %v4767_v62  ;;  %v4546_v27 = vadd.f32 1.0, %v5517_v55  ;;  %v3765_v18 = vsel %vm1030_vm2, %v3762_v46, %v3764_v38  ;;  %v8344_v54 = vadd.f32 %v8310_v13, %v4383_v2  ;;  %v3260_v47 = vpop.f32.mrf.mxu2 }
 0x255   : > { %v5057_v35 = vmul.f32 %v4772_v61, %v8244_v52  ;;  %v3972_v45 = vmax.f32 %v3828_v51, %v3907_v8  ;;  %v3829_v33 = vmax.f32 %v3653_v36, %v3765_v18  ;;  %v4052_v20 = vrot.slane %v3621_v57, 4 }
 0x256   : > { %5518 = vrcp.f32 %v4546_v27  ;;  %v3909_v37 = vsel %vm1247_vm3, %v3906_v5, %v3908_v30  ;;  %v5410_v10 = vmul.f32 -1.442695, %v8344_v54  ;;  %v4384_v52 = vmul.f32 %v8297_v31, %v4348_v0 }
 0x257   : > { %5090 = vst.msk [vmem:[%s7460_s17 + $0x68] sm:$0xff] %vm5076_vm5, %v5057_v35  ;;  %v4116_v43 = vmax.f32 %v3972_v45, %v4051_v25  ;;  %v3973_v24 = vmax.f32 %v3829_v33, %v3909_v37  ;;  %v2067_v28 = vadd.f32 %v2066_v21, %v1854_v16  ;;  %v4053_v63 = vsel %vm1464_vm0, %v4050_v41, %v4052_v20 }
 0x258   : > { %5520 = vpow2.f32 %v5410_v10  ;;  %v8354_v23 = vadd.f32 %v8310_v13, %v4384_v52  ;;  %v3319_v6 = vadd.f32 %v3257_v40, %v2064_v59  ;;  %v4783_v9 = vand.u32 2147483647, %v4546_v27  ;;  %v2069_v60 = vpop.f32.mrf.mxu1 }
 0x259   : > { %5393 = vmatmul.msk.f32.gmra.mxu3 %vm1683_vm4, %v4116_v43  ;;  %v3320_v58 = vadd.f32 %v3260_v47, %v2067_v28  ;;  %v4117_v34 = vmax.f32 %v3973_v24, %v4053_v63  ;;  %v4785_v4 = vand.u32 2147483648, %v4546_v27  ;;  %vm4779_vm1 = vweird.f32 %v4546_v27 }
 0x25a   : > { %v5411_v3 = vmul.f32 -1.442695, %v8354_v23  ;;  %v4349_v12 = vadd.f32 %v4287_v50, %v3319_v6  ;;  %vm4784_vm3 = vcmp.eq.f32.partialorder %v4783_v9, 8.507059e+37 }
 0x25b   : > { %v4350_v22 = vadd.f32 %v4290_v56, %v3320_v58  ;;  %v1857_v29 = vpop.f32.mrf.mxu0  ;;  %v4786_v17 = vor.u32 1.1754944e-38, %v4785_v4  ;;  %v4293_v41 = vpop.f32.mrf.mxu3 }
 0x25c   : > { %v5519_v44 = vpop.eup %5518  ;;  %5522 = vpow2.f32 %v5411_v3  ;;  %v4385_v53 = vmul.f32 %v8297_v31, %v4349_v12  ;;  %v2070_v15 = vadd.f32 %v2069_v60, %v1857_v29  ;;  %v3263_v14 = vpop.f32.mrf.mxu2 }
 0x25d   : > { %v4775_v26 = vmul.f32 %v5519_v44, %v4546_v27  ;;  %v4386_v11 = vmul.f32 %v8297_v31, %v4350_v22  ;;  %vm4780_vm0 = vweird.f32 %v5519_v44 }
 0x25e   : > { %v5521_v49 = vpop.eup %5520  ;;  %v8363_v0 = vadd.f32 %v8310_v13, %v4385_v53  ;;  %v3321_v1 = vadd.f32 %v3263_v14, %v2070_v15  ;;  %vm4781_vm2 = vmor %vm4779_vm1, %vm4780_vm0 }
 0x25f   : > { %v4776_v32 = vsub.f32 1.0, %v4775_v26  ;;  %v8359_v2 = vadd.f32 1.0, %v5521_v49  ;;  %v8366_v42 = vadd.f32 %v8310_v13, %v4386_v11 }
 0x260   : > { %v5412_v19 = vmul.f32 -1.442695, %v8363_v0  ;;  %v4351_v36 = vadd.f32 %v4293_v41, %v3321_v1  ;;  %v2072_v8 = vpop.f32.mrf.mxu1 }
 0x261   : > { %v4777_v57 = vmul.f32 %v5519_v44, %v4776_v32  ;;  %5394 = vmatmul.msk.f32.gmra.mxu3 %vm1683_vm4, %v4117_v34  ;;  %5524 = vrcp.f32 %v8359_v2  ;;  %v5413_v39 = vmul.f32 -1.442695, %v8366_v42  ;;  %v4800_v20 = vand.u32 2147483648, %v8359_v2 }
 0x262   : > { %v5523_v5 = vpop.eup %5522  ;;  %5526 = vpow2.f32 %v5412_v19  ;;  %v4387_v61 = vmul.f32 %v8297_v31, %v4351_v36  ;;  %vm4794_vm12 = vweird.f32 %v8359_v2 }
 0x263   : > { %v4778_v46 = vadd.f32 %v5519_v44, %v4777_v57  ;;  %v4548_v48 = vadd.f32 1.0, %v5523_v5  ;;  %5528 = vpow2.f32 %v5413_v39  ;;  %v1860_v51 = vpop.f32.mrf.mxu0  ;;  %v4296_v37 = vpop.f32.mrf.mxu3  ;;  %v4801_v63 = vor.u32 1.1754944e-38, %v4800_v20 }
 0x264   : > { %v2073_v35 = vadd.f32 %v2072_v8, %v1860_v51  ;;  %v8378_v27 = vadd.f32 %v8310_v13, %v4387_v61  ;;  %v3266_v18 = vpop.f32.mrf.mxu2 }
 0x265   : > { %v4782_v62 = vsel %vm4781_vm2, %v5519_v44, %v4778_v46  ;;  %5530 = vrcp.f32 %v4548_v48  ;;  %v4813_v6 = vand.u32 2147483647, %v4548_v48  ;;  %v4815_v58 = vand.u32 2147483648, %v4548_v48 }
 0x266   : > { %v4787_v38 = vsel %vm4784_vm3, %v4786_v17, %v4782_v62  ;;  %v3322_v45 = vadd.f32 %v3266_v18, %v2073_v35  ;;  %v5414_v21 = vmul.f32 -1.442695, %v8378_v27  ;;  %vm4809_vm6 = vweird.f32 %v4548_v48 }
 0x267   : > { %v5058_v40 = vmul.f32 %v4787_v38, %v8313_v7  ;;  %v5525_v55 = vpop.eup %5524  ;;  %v4798_v7 = vand.u32 2147483647, %v8359_v2  ;;  %vm4814_vm7 = vcmp.eq.f32.partialorder %v4813_v6, 8.507059e+37  ;;  %v4816_v9 = vor.u32 1.1754944e-38, %v4815_v58 }
 0x268   : > { %v4790_v25 = vmul.f32 %v5525_v55, %v8359_v2  ;;  %v5527_v30 = vpop.eup %5526  ;;  %vm4795_vm4 = vweird.f32 %v5525_v55  ;;  %v4352_v28 = vadd.f32 %v4296_v37, %v3322_v45  ;;  %v2075_v3 = vpop.f32.mrf.mxu1 }
 0x269   : > { %5091 = vst.msk [vmem:[%s7460_s17 + $0x70] sm:$0xff] %vm5076_vm5, %v5058_v40  ;;  %v5529_v33 = vpop.eup %5528  ;;  %v8382_v43 = vadd.f32 1.0, %v5527_v30  ;;  %vm4796_vm13 = vmor %vm4794_vm12, %vm4795_vm4  ;;  %vm4799_vm14 = vcmp.eq.f32.partialorder %v4798_v7, 8.507059e+37 }
 0x26a   : > { %v4791_v50 = vsub.f32 1.0, %v4790_v25  ;;  %v8384_v16 = vadd.f32 1.0, %v5529_v33  ;;  %v4388_v49 = vmul.f32 %v8297_v31, %v4352_v28 }
 0x26b   : > { %v5531_v10 = vpop.eup %5530  ;;  %5532 = vrcp.f32 %v8382_v43  ;;  %v1863_v44 = vpop.f32.mrf.mxu0  ;;  %v4828_v60 = vand.u32 2147483647, %v8382_v43  ;;  %v4830_v14 = vand.u32 2147483648, %v8382_v43  ;;  %vm4824_vm11 = vweird.f32 %v8382_v43 }
 0x26c   : > { %v4792_v52 = vmul.f32 %v5525_v55, %v4791_v50  ;;  %v4805_v24 = vmul.f32 %v5531_v10, %v4548_v48  ;;  %5534 = vrcp.f32 %v8384_v16  ;;  %vm4810_vm15 = vweird.f32 %v5531_v10  ;;  %v3269_v12 = vpop.f32.mrf.mxu2  ;;  %v4299_v4 = vpop.f32.mrf.mxu3 }
 0x26d   : > { %5536 = vpow2.f32 %v5414_v21  ;;  %v2076_v32 = vadd.f32 %v2075_v3, %v1863_v44  ;;  %vm4811_vm8 = vmor %vm4809_vm6, %vm4810_vm15  ;;  %v8397_v57 = vadd.f32 %v8310_v13, %v4388_v49  ;;  %v4845_v19 = vand.u32 2147483648, %v8384_v16 }
 0x26e   : > { %v4793_v59 = vadd.f32 %v5525_v55, %v4792_v52  ;;  %v4806_v47 = vsub.f32 1.0, %v4805_v24  ;;  %v4843_v25 = vand.u32 2147483647, %v8384_v16  ;;  %vm4829_vm1 = vcmp.eq.f32.partialorder %v4828_v60, 8.507059e+37 }
 0x26f   : > { %v5415_v17 = vmul.f32 -1.442695, %v8397_v57  ;;  %v4831_v50 = vor.u32 1.1754944e-38, %v4830_v14  ;;  %vm4839_vm2 = vweird.f32 %v8384_v16  ;;  %v4846_v20 = vor.u32 1.1754944e-38, %v4845_v19 }
 0x270   : > { %v4797_v56 = vsel %vm4796_vm13, %v5525_v55, %v4793_v59  ;;  %v4807_v34 = vmul.f32 %v5531_v10, %v4806_v47  ;;  %v2078_v40 = vpop.f32.mrf.mxu1  ;;  %vm4844_vm4 = vcmp.eq.f32.partialorder %v4843_v25, 8.507059e+37 }
 0x271   : > { %v4802_v26 = vsel %vm4799_vm14, %v4801_v63, %v4797_v56  ;;  %v5533_v53 = vpop.eup %5532  ;;  %5538 = vpow2.f32 %v5415_v17 }
 0x272   : > { %v5059_v22 = vmul.f32 %v4802_v26, %v8344_v54  ;;  %v4808_v11 = vadd.f32 %v5531_v10, %v4807_v34  ;;  %v5535_v2 = vpop.eup %5534  ;;  %v4820_v29 = vmul.f32 %v5533_v53, %v8382_v43  ;;  %v3323_v54 = vadd.f32 %v3269_v12, %v2076_v32 }
 0x273   : > { %v4835_v46 = vmul.f32 %v5535_v2, %v8384_v16  ;;  %v5537_v39 = vpop.eup %5536  ;;  %vm4825_vm9 = vweird.f32 %v5533_v53  ;;  %v1866_v38 = vpop.f32.mrf.mxu0  ;;  %vm4840_vm10 = vweird.f32 %v5535_v2 }
 0x274   : > { %5092 = vst.msk [vmem:[%s7460_s17 + $0x78] sm:$0xff] %vm5076_vm5, %v5059_v22  ;;  %v4812_v15 = vsel %vm4811_vm8, %v5531_v10, %v4808_v11  ;;  %v4821_v5 = vsub.f32 1.0, %v4820_v29  ;;  %v4353_v41 = vadd.f32 %v4299_v4, %v3323_v54  ;;  %v8404_v36 = vadd.f32 1.0, %v5537_v39  ;;  %vm4826_vm0 = vmor %vm4824_vm11, %vm4825_vm9  ;;  %v4302_v33 = vpop.f32.mrf.mxu3 }
 0x275   : > { %v4817_v1 = vsel %vm4814_vm7, %v4816_v9, %v4812_v15  ;;  %v4836_v48 = vsub.f32 1.0, %v4835_v46  ;;  %v2079_v51 = vadd.f32 %v2078_v40, %v1866_v38  ;;  %vm4841_vm3 = vmor %vm4839_vm2, %vm4840_vm10 }
 0x276   : > { %v5060_v62 = vmul.f32 %v4817_v1, %v8354_v23  ;;  %v4822_v55 = vmul.f32 %v5533_v53, %v4821_v5  ;;  %v4389_v61 = vmul.f32 %v8297_v31, %v4353_v41  ;;  %5540 = vrcp.f32 %v8404_v36  ;;  %v3272_v23 = vpop.f32.mrf.mxu2 }
 0x277   : > { %v4837_v8 = vmul.f32 %v5535_v2, %v4836_v48  ;;  %v3324_v30 = vadd.f32 %v3272_v23, %v2079_v51  ;;  %v5539_v21 = vpop.eup %5538  ;;  %v4860_v22 = vand.u32 2147483648, %v8404_v36  ;;  %vm4854_vm13 = vweird.f32 %v8404_v36 }
 0x278   : > { %5093 = vst.msk [vmem:[%s7460_s17 + $0x80] sm:$0xff] %vm5076_vm5, %v5060_v62  ;;  %v4823_v35 = vadd.f32 %v5533_v53, %v4822_v55  ;;  %v8413_v18 = vadd.f32 %v8310_v13, %v4389_v61  ;;  %v4552_v47 = vadd.f32 1.0, %v5539_v21  ;;  %v2081_v58 = vpop.f32.mrf.mxu1 }
 0x279   : > { %v4838_v45 = vadd.f32 %v5535_v2, %v4837_v8  ;;  %v4354_v43 = vadd.f32 %v4302_v33, %v3324_v30  ;;  %v4861_v60 = vor.u32 1.1754944e-38, %v4860_v22 }
 0x27a   : > { %v4827_v7 = vsel %vm4826_vm0, %v5533_v53, %v4823_v35  ;;  %v5416_v37 = vmul.f32 -1.442695, %v8413_v18  ;;  %v4875_v38 = vand.u32 2147483648, %v4552_v47  ;;  %vm4869_vm7 = vweird.f32 %v4552_v47 }
 0x27b   : > { %v4832_v10 = vsel %vm4829_vm1, %v4831_v50, %v4827_v7  ;;  %v4842_v52 = vsel %vm4841_vm3, %v5535_v2, %v4838_v45  ;;  %v4390_v16 = vmul.f32 %v8297_v31, %v4354_v43  ;;  %v1869_v6 = vpop.f32.mrf.mxu0 }
 0x27c   : > { %v5061_v24 = vmul.f32 %v4832_v10, %v8363_v0  ;;  %v4847_v59 = vsel %vm4844_vm4, %v4846_v20, %v4842_v52  ;;  %5542 = vpow2.f32 %v5416_v37  ;;  %v5541_v28 = vpop.eup %5540  ;;  %v2082_v56 = vadd.f32 %v2081_v58, %v1869_v6  ;;  %v4305_v49 = vpop.f32.mrf.mxu3 }
 0x27d   : > { %v5062_v63 = vmul.f32 %v4847_v59, %v8366_v42  ;;  %v4850_v44 = vmul.f32 %v5541_v28, %v8404_v36  ;;  %v8426_v3 = vadd.f32 %v8310_v13, %v4390_v16  ;;  %5544 = vrcp.f32 %v4552_v47 }
 0x27e   : > { %5094 = vst.msk [vmem:[%s7460_s17 + $0x88] sm:$0xff] %vm5076_vm5, %v5061_v24  ;;  %v3275_v0 = vpop.f32.mrf.mxu2  ;;  %v4858_v42 = vand.u32 2147483647, %v8404_v36  ;;  %vm4855_vm12 = vweird.f32 %v5541_v28  ;;  %v4873_v36 = vand.u32 2147483647, %v4552_v47  ;;  %v4876_v35 = vor.u32 1.1754944e-38, %v4875_v38 }
 0x27f   : > { %5095 = vst.msk [vmem:[%s7460_s17 + $0x90] sm:$0xff] %vm5076_vm5, %v5062_v63  ;;  %v4851_v26 = vsub.f32 1.0, %v4850_v44  ;;  %v5417_v34 = vmul.f32 -1.442695, %v8426_v3  ;;  %v3325_v12 = vadd.f32 %v3275_v0, %v2082_v56  ;;  %vm4856_vm14 = vmor %vm4854_vm13, %vm4855_vm12 }
 0x280   : > { %v2084_v15 = vpop.f32.mrf.mxu1  ;;  %vm4859_vm15 = vcmp.eq.f32.partialorder %v4858_v42, 8.507059e+37  ;;  %vm4874_vm9 = vcmp.eq.f32.partialorder %v4873_v36, 8.507059e+37 }
 0x281   : > { %v4852_v53 = vmul.f32 %v5541_v28, %v4851_v26  ;;  %5546 = vpow2.f32 %v5417_v34  ;;  %v4355_v11 = vadd.f32 %v4305_v49, %v3325_v12 }
 0x282   : > { %v5543_v32 = vpop.eup %5542 }
 0x283   : > { %v8433_v9 = vadd.f32 1.0, %v5543_v32  ;;  %v4853_v4 = vadd.f32 %v5541_v28, %v4852_v53  ;;  %v4391_v2 = vmul.f32 %v8297_v31, %v4355_v11  ;;  %v5545_v29 = vpop.eup %5544  ;;  %v1872_v54 = vpop.f32.mrf.mxu0 }
 0x284   : > { %v4865_v46 = vmul.f32 %v5545_v29, %v4552_v47  ;;  %v2085_v1 = vadd.f32 %v2084_v15, %v1872_v54  ;;  %v4308_v61 = vpop.f32.mrf.mxu3  ;;  %vm4870_vm6 = vweird.f32 %v5545_v29 }
 0x285   : > { %5548 = vrcp.f32 %v8433_v9  ;;  %v4857_v14 = vsel %vm4856_vm14, %v5541_v28, %v4853_v4  ;;  %v8439_v19 = vadd.f32 %v8310_v13, %v4391_v2  ;;  %vm4871_vm8 = vmor %vm4869_vm7, %vm4870_vm6  ;;  %v4888_v43 = vand.u32 2147483647, %v8433_v9 }
 0x286   : > { %v4862_v39 = vsel %vm4859_vm15, %v4861_v60, %v4857_v14  ;;  %v3278_v5 = vpop.f32.mrf.mxu2  ;;  %v4866_v62 = vsub.f32 1.0, %v4865_v46  ;;  %v4890_v10 = vand.u32 2147483648, %v8433_v9  ;;  %vm4884_vm11 = vweird.f32 %v8433_v9 }
 0x287   : > { %v5547_v17 = vpop.eup %5546  ;;  %v5063_v41 = vmul.f32 %v4862_v39, %v8378_v27  ;;  %v5418_v48 = vmul.f32 -1.442695, %v8439_v19  ;;  %v3326_v55 = vadd.f32 %v3278_v5, %v2085_v1  ;;  %vm4889_vm1 = vcmp.eq.f32.partialorder %v4888_v43, 8.507059e+37 }
 0x288   : > { %v8443_v40 = vadd.f32 1.0, %v5547_v17  ;;  %v4867_v51 = vmul.f32 %v5545_v29, %v4866_v62  ;;  %v2087_v50 = vpop.f32.mrf.mxu1 }
 0x289   : > { %5096 = vst.msk [vmem:[%s7460_s17 + $0x98] sm:$0xff] %vm5076_vm5, %v5063_v41  ;;  %5550 = vpow2.f32 %v5418_v48  ;;  %v4356_v23 = vadd.f32 %v4308_v61, %v3326_v55 }
 0x28a   : > { %5552 = vrcp.f32 %v8443_v40  ;;  %v4868_v25 = vadd.f32 %v5545_v29, %v4867_v51  ;;  %v4903_v42 = vand.u32 2147483647, %v8443_v40  ;;  %v4905_v22 = vand.u32 2147483648, %v8443_v40 }
 0x28b   : > { %v5549_v8 = vpop.eup %5548  ;;  %v1875_v30 = vpop.f32.mrf.mxu0  ;;  %v4392_v7 = vmul.f32 %v8297_v31, %v4356_v23  ;;  %vm4899_vm3 = vweird.f32 %v8443_v40 }
 0x28c   : > { %v4880_v27 = vmul.f32 %v5549_v8, %v8433_v9  ;;  %v4872_v45 = vsel %vm4871_vm8, %v5545_v29, %v4868_v25  ;;  %v2088_v20 = vadd.f32 %v2087_v50, %v1875_v30  ;;  %vm4885_vm10 = vweird.f32 %v5549_v8  ;;  %v4311_v6 = vpop.f32.mrf.mxu3 }
 0x28d   : > { %v4877_v37 = vsel %vm4874_vm9, %v4876_v35, %v4872_v45  ;;  %v8454_v16 = vadd.f32 %v8310_v13, %v4392_v7  ;;  %vm4886_vm0 = vmor %vm4884_vm11, %vm4885_vm10  ;;  %v4906_v60 = vor.u32 1.1754944e-38, %v4905_v22  ;;  %vm4904_vm12 = vcmp.eq.f32.partialorder %v4903_v42, 8.507059e+37 }
 0x28e   : > { %v4881_v33 = vsub.f32 1.0, %v4880_v27  ;;  %v3281_v52 = vpop.f32.mrf.mxu2  ;;  %v5064_v24 = vmul.f32 %v4877_v37, %v8397_v57  ;;  %v4891_v57 = vor.u32 1.1754944e-38, %v4890_v10 }
 0x28f   : > { %v5551_v21 = vpop.eup %5550  ;;  %v3327_v28 = vadd.f32 %v3281_v52, %v2088_v20  ;;  %v5419_v56 = vmul.f32 -1.442695, %v8454_v16 }
 0x290   : > { %v4882_v59 = vmul.f32 %v5549_v8, %v4881_v33  ;;  %v5553_v63 = vpop.eup %5552  ;;  %v4555_v47 = vadd.f32 1.0, %v5551_v21  ;;  %5097 = vst.msk [vmem:[%s7460_s17 + $0xa0] sm:$0xff] %vm5076_vm5, %v5064_v24  ;;  %v2090_v9 = vpop.f32.mrf.mxu1 }
 0x291   : > { %v4895_v44 = vmul.f32 %v5553_v63, %v8443_v40  ;;  %v4357_v34 = vadd.f32 %v4311_v6, %v3327_v28  ;;  %vm4900_vm2 = vweird.f32 %v5553_v63 }
 0x292   : > { %v4883_v58 = vadd.f32 %v5549_v8, %v4882_v59  ;;  %5554 = vrcp.f32 %v4555_v47  ;;  %vm4901_vm4 = vmor %vm4899_vm3, %vm4900_vm2  ;;  %v4920_v62 = vand.u32 2147483648, %v4555_v47  ;;  %v4918_v36 = vand.u32 2147483647, %v4555_v47 }
 0x293   : > { %v4896_v26 = vsub.f32 1.0, %v4895_v44  ;;  %5556 = vpow2.f32 %v5419_v56  ;;  %v4393_v53 = vmul.f32 %v8297_v31, %v4357_v34  ;;  %v1878_v11 = vpop.f32.mrf.mxu0  ;;  %vm4914_vm14 = vweird.f32 %v4555_v47 }
 0x294   : > { %v4887_v0 = vsel %vm4886_vm0, %v5549_v8, %v4883_v58  ;;  %v2091_v5 = vadd.f32 %v2090_v9, %v1878_v11  ;;  %v4921_v51 = vor.u32 1.1754944e-38, %v4920_v62  ;;  %vm4919_vm6 = vcmp.eq.f32.partialorder %v4918_v36, 8.507059e+37 }
 0x295   : > { %v4892_v12 = vsel %vm4889_vm1, %v4891_v57, %v4887_v0  ;;  %v4897_v32 = vmul.f32 %v5553_v63, %v4896_v26  ;;  %v8470_v2 = vadd.f32 %v8310_v13, %v4393_v53 }
 0x296   : > { %v5065_v49 = vmul.f32 %v4892_v12, %v8413_v18  ;;  %v3284_v46 = vpop.f32.mrf.mxu2 }
 0x297   : > { %v4898_v4 = vadd.f32 %v5553_v63, %v4897_v32  ;;  %v5420_v14 = vmul.f32 -1.442695, %v8470_v2  ;;  %v3328_v38 = vadd.f32 %v3284_v46, %v2091_v5 }
 0x298   : > { %5098 = vst.msk [vmem:[%s7460_s17 + $0xa8] sm:$0xff] %vm5076_vm5, %v5065_v49  ;;  %v5555_v29 = vpop.eup %5554  ;;  %v2093_v61 = vpop.f32.mrf.mxu1 }
 0x299   : > { %v5557_v54 = vpop.eup %5556  ;;  %v4902_v18 = vsel %vm4901_vm4, %v5553_v63, %v4898_v4  ;;  %v4910_v15 = vmul.f32 %v5555_v29, %v4555_v47  ;;  %5558 = vpow2.f32 %v5420_v14  ;;  %vm4915_vm13 = vweird.f32 %v5555_v29 }
 0x29a   : > { %v4907_v39 = vsel %vm4904_vm12, %v4906_v60, %v4902_v18  ;;  %v4556_v1 = vadd.f32 1.0, %v5557_v54  ;;  %vm4916_vm15 = vmor %vm4914_vm14, %vm4915_vm13 }
 0x29b   : > { %v5066_v17 = vmul.f32 %v4907_v39, %v8426_v3  ;;  %v4911_v41 = vsub.f32 1.0, %v4910_v15  ;;  %v1881_v55 = vpop.f32.mrf.mxu0 }
 0x29c   : > { %5560 = vrcp.f32 %v4556_v1  ;;  %v2094_v50 = vadd.f32 %v2093_v61, %v1881_v55  ;;  %v4935_v43 = vand.u32 2147483648, %v4556_v1  ;;  %v4933_v21 = vand.u32 2147483647, %v4556_v1 }
 0x29d   : > { %5099 = vst.msk [vmem:[%s7460_s17 + $0xb0] sm:$0xff] %vm5076_vm5, %v5066_v17  ;;  %v4912_v48 = vmul.f32 %v5555_v29, %v4911_v41  ;;  %vm4929_vm8 = vweird.f32 %v4556_v1 }
 0x29e   : > { %v3287_v7 = vpop.f32.mrf.mxu2  ;;  %v4936_v47 = vor.u32 1.1754944e-38, %v4935_v43  ;;  %vm4934_vm10 = vcmp.eq.f32.partialorder %v4933_v21, 8.507059e+37 }
 0x29f   : > { %v4913_v40 = vadd.f32 %v5555_v29, %v4912_v48  ;;  %v5559_v8 = vpop.eup %5558  ;;  %v3329_v10 = vadd.f32 %v3287_v7, %v2094_v50 }
 0x2a0   : > { %v4557_v35 = vadd.f32 1.0, %v5559_v8  ;;  %v2096_v26 = vpop.f32.mrf.mxu1 }
 0x2a1   : > { %v4917_v25 = vsel %vm4916_vm15, %v5555_v29, %v4913_v40 }
 0x2a2   : > { %v5561_v27 = vpop.eup %5560  ;;  %v4922_v23 = vsel %vm4919_vm6, %v4921_v51, %v4917_v25  ;;  %5562 = vrcp.f32 %v4557_v35  ;;  %v4950_v42 = vand.u32 2147483648, %v4557_v35  ;;  %v4948_v32 = vand.u32 2147483647, %v4557_v35 }
 0x2a3   : > { %v5067_v45 = vmul.f32 %v4922_v23, %v8439_v19  ;;  %v4925_v33 = vmul.f32 %v5561_v27, %v4556_v1  ;;  %vm4930_vm7 = vweird.f32 %v5561_v27  ;;  %v1884_v0 = vpop.f32.mrf.mxu0  ;;  %vm4944_vm0 = vweird.f32 %v4557_v35 }
 0x2a4   : > { %vm4931_vm9 = vmor %vm4929_vm8, %vm4930_vm7  ;;  %v2097_v29 = vadd.f32 %v2096_v26, %v1884_v0  ;;  %vm4949_vm2 = vcmp.eq.f32.partialorder %v4948_v32, 8.507059e+37 }
 0x2a5   : > { %5100 = vst.msk [vmem:[%s7460_s17 + $0xb8] sm:$0xff] %vm5076_vm5, %v5067_v45  ;;  %v4926_v20 = vsub.f32 1.0, %v4925_v33 }
 0x2a6   : > { %v4314_v3 = vpop.f32.mrf.mxu3  ;;  %v3290_v11 = vpop.f32.mrf.mxu2 }
 0x2a7   : > { %v4358_v30 = vadd.f32 %v4314_v3, %v3328_v38  ;;  %v4927_v52 = vmul.f32 %v5561_v27, %v4926_v20  ;;  %v3330_v14 = vadd.f32 %v3290_v11, %v2097_v29 }
 0x2a8   : > { %v5563_v63 = vpop.eup %5562  ;;  %v2099_v39 = vpop.f32.mrf.mxu1 }
 0x2a9   : > { %v4394_v37 = vmul.f32 %v8297_v31, %v4358_v30  ;;  %v4928_v59 = vadd.f32 %v5561_v27, %v4927_v52  ;;  %v4940_v44 = vmul.f32 %v5563_v63, %v4557_v35  ;;  %vm4945_vm11 = vweird.f32 %v5563_v63 }
 0x2aa   : > { %vm4946_vm1 = vmor %vm4944_vm0, %vm4945_vm11 }
 0x2ab   : > { %v8481_v24 = vadd.f32 %v8310_v13, %v4394_v37  ;;  %v4932_v58 = vsel %vm4931_vm9, %v5561_v27, %v4928_v59  ;;  %v4941_v12 = vsub.f32 1.0, %v4940_v44  ;;  %v1887_v46 = vpop.f32.mrf.mxu0 }
 0x2ac   : > { %v4937_v56 = vsel %vm4934_vm10, %v4936_v47, %v4932_v58  ;;  %v2100_v62 = vadd.f32 %v2099_v39, %v1887_v46 }
 0x2ad   : > { %v5421_v19 = vmul.f32 -1.442695, %v8481_v24  ;;  %v5068_v34 = vmul.f32 %v4937_v56, %v8454_v16  ;;  %v4942_v49 = vmul.f32 %v5563_v63, %v4941_v12  ;;  %v4951_v16 = vor.u32 1.1754944e-38, %v4950_v42 }
 0x2ae   : > { %v4317_v28 = vpop.f32.mrf.mxu3  ;;  %v3293_v36 = vpop.f32.mrf.mxu2 }
 0x2af   : > { %v4359_v6 = vadd.f32 %v4317_v28, %v3329_v10  ;;  %5564 = vpow2.f32 %v5421_v19  ;;  %5101 = vst.msk [vmem:[%s7460_s17 + $0xc0] sm:$0xff] %vm5076_vm5, %v5068_v34  ;;  %v4943_v4 = vadd.f32 %v5563_v63, %v4942_v49  ;;  %v3331_v61 = vadd.f32 %v3293_v36, %v2100_v62 }
 0x2b0   : > { %v2102_v58 = vpop.f32.mrf.mxu1 }
 0x2b1   : > { %v4395_v57 = vmul.f32 %v8297_v31, %v4359_v6  ;;  %v4947_v54 = vsel %vm4946_vm1, %v5563_v63, %v4943_v4 }
 0x2b2   : > { %v4952_v18 = vsel %vm4949_vm2, %v4951_v16, %v4947_v54 }
 0x2b3   : > { %v8487_v22 = vadd.f32 %v8310_v13, %v4395_v57  ;;  %v5069_v15 = vmul.f32 %v4952_v18, %v8470_v2 }
 0x2b5   : > { %v5422_v53 = vmul.f32 -1.442695, %v8487_v22  ;;  %v5565_v9 = vpop.eup %5564  ;;  %5102 = vst.msk [vmem:[%s7460_s17 + $0xc8] sm:$0xff] %vm5076_vm5, %v5069_v15 }
 0x2b6   : > { %v4558_v60 = vadd.f32 1.0, %v5565_v9  ;;  %v3296_v57 = vpop.f32.mrf.mxu2 }
 0x2b7   : > { %5566 = vpow2.f32 %v5422_v53 }
 0x2b8   : > { %5568 = vrcp.f32 %v4558_v60  ;;  %v4965_v51 = vand.u32 2147483648, %v4558_v60  ;;  %v4963_v25 = vand.u32 2147483647, %v4558_v60  ;;  %vm4959_vm4 = vweird.f32 %v4558_v60  ;;  %v2105_v11 = vpop.f32.mrf.mxu1 }
 0x2ba   : > { %v4966_v50 = vor.u32 1.1754944e-38, %v4965_v51  ;;  %vm4964_vm13 = vcmp.eq.f32.partialorder %v4963_v25, 8.507059e+37 }
 0x2bd   : > { %v5567_v1 = vpop.eup %5566  ;;  %v4320_v5 = vpop.f32.mrf.mxu3 }
 0x2be   : > { %v4559_v17 = vadd.f32 1.0, %v5567_v1  ;;  %v4360_v41 = vadd.f32 %v4320_v5, %v3330_v14  ;;  %v5569_v48 = vpop.eup %5568  ;;  %v3299_v14 = vpop.f32.mrf.mxu2  ;;  %v5614_v5 = vld [vmem:[%s8540_s4] ss:$0 sm:$0xff] }
 0x2bf   : > { %v4955_v38 = vmul.f32 %v5569_v48, %v4558_v60  ;;  %vm4960_vm3 = vweird.f32 %v5569_v48 }
 0x2c0   : > { %5570 = vrcp.f32 %v4559_v17  ;;  %v4396_v40 = vmul.f32 %v8297_v31, %v4360_v41  ;;  %vm4961_vm12 = vmor %vm4959_vm4, %vm4960_vm3  ;;  %v4980_v10 = vand.u32 2147483648, %v4559_v17  ;;  %v4978_v59 = vand.u32 2147483647, %v4559_v17 }
 0x2c1   : > { %v4956_v55 = vsub.f32 1.0, %v4955_v38  ;;  %vm4974_vm15 = vweird.f32 %v4559_v17 }
 0x2c2   : > { %v8497_v2 = vadd.f32 %v8310_v13, %v4396_v40  ;;  %vm4979_vm7 = vcmp.eq.f32.partialorder %v4978_v59, 8.507059e+37  ;;  %v5615_v40 = vld [vmem:[%s8541_s5] ss:$0 sm:$0xff] }
 0x2c3   : > { %v4957_v8 = vmul.f32 %v5569_v48, %v4956_v55 }
 0x2c4   : > { %v5423_v3 = vmul.f32 -1.442695, %v8497_v2 }
 0x2c5   : > { %v4323_v27 = vpop.f32.mrf.mxu3  ;;  %v4958_v35 = vadd.f32 %v5569_v48, %v4957_v8 }
 0x2c6   : > { %v5571_v23 = vpop.eup %5570  ;;  %v4361_v30 = vadd.f32 %v4323_v27, %v3331_v61  ;;  %5572 = vpow2.f32 %v5423_v3 }
 0x2c7   : > { %v4970_v45 = vmul.f32 %v5571_v23, %v4559_v17  ;;  %v4962_v33 = vsel %vm4961_vm12, %v5569_v48, %v4958_v35  ;;  %vm4975_vm14 = vweird.f32 %v5571_v23 }
 0x2c8   : > { %v4397_v7 = vmul.f32 %v8297_v31, %v4361_v30  ;;  %v4967_v20 = vsel %vm4964_vm13, %v4966_v50, %v4962_v33  ;;  %vm4976_vm6 = vmor %vm4974_vm15, %vm4975_vm14  ;;  %v4981_v31 = vor.u32 1.1754944e-38, %v4980_v10 }
 0x2c9   : > { %v4971_v37 = vsub.f32 1.0, %v4970_v45  ;;  %v5070_v43 = vmul.f32 %v4967_v20, %v8481_v24 }
 0x2ca   : > { %v8503_v52 = vadd.f32 %v8310_v13, %v4397_v7  ;;  %v1890_v13 = vpop.f32.mrf.mxu0 }
 0x2cb   : > { %v4972_v21 = vmul.f32 %v5571_v23, %v4971_v37  ;;  %5103 = vst.msk [vmem:[%s7460_s17 + $0xd0] sm:$0xff] %vm5076_vm5, %v5070_v43  ;;  %v2103_v34 = vadd.f32 %v2102_v58, %v1890_v13 }
 0x2cc   : > { %v5424_v19 = vmul.f32 -1.442695, %v8503_v52  ;;  %v5573_v28 = vpop.eup %5572 }
 0x2cd   : > { %v4973_v63 = vadd.f32 %v5571_v23, %v4972_v21  ;;  %v4560_v47 = vadd.f32 1.0, %v5573_v28  ;;  %v3332_v32 = vadd.f32 %v3296_v57, %v2103_v34 }
 0x2ce   : > { %5574 = vpow2.f32 %v5424_v19 }
 0x2cf   : > { %v4977_v24 = vsel %vm4976_vm6, %v5571_v23, %v4973_v63  ;;  %5576 = vrcp.f32 %v4560_v47  ;;  %v4995_v49 = vand.u32 2147483648, %v4560_v47  ;;  %v4993_v4 = vand.u32 2147483647, %v4560_v47 }
 0x2d0   : > { %v4982_v6 = vsel %vm4979_vm7, %v4981_v31, %v4977_v24  ;;  %vm4989_vm9 = vweird.f32 %v4560_v47 }
 0x2d1   : > { %v5071_v44 = vmul.f32 %v4982_v6, %v8487_v22  ;;  %v4996_v54 = vor.u32 1.1754944e-38, %v4995_v49  ;;  %vm4994_vm11 = vcmp.eq.f32.partialorder %v4993_v4, 8.507059e+37 }
 0x2d2   : > { %v1893_v53 = vpop.f32.mrf.mxu0 }
 0x2d3   : > { %5104 = vst.msk [vmem:[%s7460_s17 + $0xd8] sm:$0xff] %vm5076_vm5, %v5071_v44  ;;  %v2106_v60 = vadd.f32 %v2105_v11, %v1893_v53 }
 0x2d4   : > { %v5575_v56 = vpop.eup %5574 }
 0x2d5   : > { %v4561_v0 = vadd.f32 1.0, %v5575_v56  ;;  %v5577_v26 = vpop.eup %5576  ;;  %v3333_v48 = vadd.f32 %v3299_v14, %v2106_v60 }
 0x2d6   : > { %v4985_v12 = vmul.f32 %v5577_v26, %v4560_v47  ;;  %vm4990_vm8 = vweird.f32 %v5577_v26 }
 0x2d7   : > { %5578 = vrcp.f32 %v4561_v0  ;;  %vm4991_vm10 = vmor %vm4989_vm9, %vm4990_vm8  ;;  %v5010_v62 = vand.u32 2147483648, %v4561_v0  ;;  %v5008_v38 = vand.u32 2147483647, %v4561_v0  ;;  %vm5004_vm1 = vweird.f32 %v4561_v0 }
 0x2d8   : > { %v4986_v42 = vsub.f32 1.0, %v4985_v12 }
 0x2d9   : > { %v5011_v8 = vor.u32 1.1754944e-38, %v5010_v62  ;;  %vm5009_vm3 = vcmp.eq.f32.partialorder %v5008_v38, 8.507059e+37 }
 0x2da   : > { %v4987_v9 = vmul.f32 %v5577_v26, %v4986_v42 }
 0x2dc   : > { %v4988_v16 = vadd.f32 %v5577_v26, %v4987_v9  ;;  %v4326_v22 = vpop.f32.mrf.mxu3 }
 0x2dd   : > { %v5579_v29 = vpop.eup %5578  ;;  %v4362_v15 = vadd.f32 %v4326_v22, %v3332_v32 }
 0x2de   : > { %v5000_v18 = vmul.f32 %v5579_v29, %v4561_v0  ;;  %v4992_v46 = vsel %vm4991_vm10, %v5577_v26, %v4988_v16  ;;  %vm5005_vm0 = vweird.f32 %v5579_v29 }
 0x2df   : > { %v4997_v39 = vsel %vm4994_vm11, %v4996_v54, %v4992_v46  ;;  %v4398_v17 = vmul.f32 %v5614_v5, %v4362_v15  ;;  %vm5006_vm2 = vmor %vm5004_vm1, %vm5005_vm0 }
 0x2e0   : > { %v5001_v1 = vsub.f32 1.0, %v5000_v18  ;;  %v5072_v41 = vmul.f32 %v4997_v39, %v8497_v2 }
 0x2e1   : > { %v4434_v55 = vadd.f32 %v5615_v40, %v4398_v17 }
 0x2e2   : > { %v5002_v36 = vmul.f32 %v5579_v29, %v5001_v1  ;;  %5105 = vst.msk [vmem:[%s7460_s17 + $0xe0] sm:$0xff] %vm5076_vm5, %v5072_v41 }
 0x2e3   : > { %v5425_v51 = vmul.f32 -1.442695, %v4434_v55 }
 0x2e4   : > { %v5003_v61 = vadd.f32 %v5579_v29, %v5002_v36  ;;  %v4329_v25 = vpop.f32.mrf.mxu3 }
 0x2e5   : > { %5580 = vpow2.f32 %v5425_v51  ;;  %v4363_v3 = vadd.f32 %v4329_v25, %v3333_v48 }
 0x2e6   : > { %v5007_v2 = vsel %vm5006_vm2, %v5579_v29, %v5003_v61 }
 0x2e7   : > { %v5012_v27 = vsel %vm5009_vm3, %v5011_v8, %v5007_v2  ;;  %v4399_v35 = vmul.f32 %v5614_v5, %v4363_v3 }
 0x2e8   : > { %v5073_v23 = vmul.f32 %v5012_v27, %v8503_v52 }
 0x2e9   : > { %v4435_v30 = vadd.f32 %v5615_v40, %v4399_v35 }
 0x2ea   : > { %5106 = vst.msk [vmem:[%s7460_s17 + $0xe8] sm:$0xff] %vm5076_vm5, %v5073_v23 }
 0x2eb   : > { %v5581_v50 = vpop.eup %5580  ;;  %v5426_v45 = vmul.f32 -1.442695, %v4435_v30 }
 0x2ec   : > { %v4562_v33 = vadd.f32 1.0, %v5581_v50 }
 0x2ed   : > { %5582 = vpow2.f32 %v5426_v45 }
 0x2ee   : > { %5584 = vrcp.f32 %v4562_v33  ;;  %v5025_v21 = vand.u32 2147483648, %v4562_v33  ;;  %v5023_v52 = vand.u32 2147483647, %v4562_v33  ;;  %vm5019_vm12 = vweird.f32 %v4562_v33 }
 0x2f0   : > { %v5026_v63 = vor.u32 1.1754944e-38, %v5025_v21  ;;  %vm5024_vm14 = vcmp.eq.f32.partialorder %v5023_v52, 8.507059e+37 }
 0x2f3   : > { %v5583_v7 = vpop.eup %5582 }
 0x2f4   : > { %v5585_v20 = vpop.eup %5584  ;;  %v4563_v37 = vadd.f32 1.0, %v5583_v7 }
 0x2f5   : > { %v5015_v43 = vmul.f32 %v5585_v20, %v4562_v33  ;;  %vm5020_vm4 = vweird.f32 %v5585_v20 }
 0x2f6   : > { %5586 = vrcp.f32 %v4563_v37  ;;  %vm5021_vm13 = vmor %vm5019_vm12, %vm5020_vm4  ;;  %v5040_v58 = vand.u32 2147483648, %v4563_v37  ;;  %v5038_v56 = vand.u32 2147483647, %v4563_v37  ;;  %vm5034_vm6 = vweird.f32 %v4563_v37 }
 0x2f7   : > { %v5016_v10 = vsub.f32 1.0, %v5015_v43 }
 0x2f8   : > { %v5041_v0 = vor.u32 1.1754944e-38, %v5040_v58  ;;  %vm5039_vm8 = vcmp.eq.f32.partialorder %v5038_v56, 8.507059e+37 }
 0x2f9   : > { %v5017_v59 = vmul.f32 %v5585_v20, %v5016_v10 }
 0x2fb   : > { %v5018_v19 = vadd.f32 %v5585_v20, %v5017_v59 }
 0x2fc   : > { %v5587_v28 = vpop.eup %5586 }
 0x2fd   : > { %v5022_v31 = vsel %vm5021_vm13, %v5585_v20, %v5018_v19  ;;  %v5030_v47 = vmul.f32 %v5587_v28, %v4563_v37  ;;  %vm5035_vm15 = vweird.f32 %v5587_v28 }
 0x2fe   : > { %v5027_v24 = vsel %vm5024_vm14, %v5026_v63, %v5022_v31  ;;  %vm5036_vm7 = vmor %vm5034_vm6, %vm5035_vm15 }
 0x2ff   : > { %v5074_v6 = vmul.f32 %v5027_v24, %v4434_v55  ;;  %v5031_v13 = vsub.f32 1.0, %v5030_v47 }
 0x301   : > { %5107 = vst.msk [vmem:[%s7460_s17 + $0xf0] sm:$0xff] %vm5076_vm5, %v5074_v6  ;;  %v5032_v44 = vmul.f32 %v5587_v28, %v5031_v13 }
 0x303   : > { %v5033_v57 = vadd.f32 %v5587_v28, %v5032_v44 }
 0x305   : > { %v5037_v26 = vsel %vm5036_vm7, %v5587_v28, %v5033_v57 }
 0x306   : > { %v5042_v34 = vsel %vm5039_vm8, %v5041_v0, %v5037_v26 }
 0x307   : > { %v5075_v12 = vmul.f32 %v5042_v34, %v4435_v30 }
 0x309   : > { %5108 = vst.msk [vmem:[%s7460_s17 + $0xf8] sm:$0xff] %vm5076_vm5, %v5075_v12 }
 0x30a PF: > { %s16_s22 = sadd.s32 1, %s5638_s22   ;;  %s8602_s21 = smov %s5634_s0 }
 0x30b   : > { %p13_p5 = scmp.ge.s32.totalorder %s16_s22, 4   ;;  %s8603_s0 = smov %s8605_s2 }
 0x30d   :  { %15 = sbr.rel (!%p13_p5) target bundleno = 2 (0x2), region = 83 }

</bundles_post_ra>
